<compile_context>
chip_gen: v7x
topology: tpu7x:2x2x1
jax: 0.10.0
libtpu: 0.0.40
codegen_flags: <defaults>
</compile_context>

<pallas_src>
import jax
import jax.numpy as jnp
import numpy as np
from jax.experimental import pallas as pl
from jax.experimental.pallas import tpu as pltpu

NUM_QUBITS = 6
NUM_LAYER = 3
NUM_ANGLES = NUM_LAYER * (4 * NUM_QUBITS - 1)   # 69
ANG_PAD = 128                                   # angle axis padded to a full lane width
DIM = 2 ** NUM_QUBITS                           # 64
PACKED = 2 * DIM                                # 128 lanes: [re | im]


def qrnn_kernel(x_ref, w_ref, b_ref, s_ref, o_ref):
    # ---------------- Linear layer: one small MXU dot per batch tile ----------------
    # Precision.HIGHEST -> full-f32 MXU passes so angle error stays tiny before it
    # feeds 33 trig-based gates.
    angles = jnp.dot(x_ref[...], w_ref[...],
                     preferred_element_type=jnp.float32,
                     precision=jax.lax.Precision.HIGHEST) + b_ref[...]     # (BT, 128)

    # -------- hoisted lane-wide coefficient precompute (off the gate chain) ---------
    # Column c of every plane below belongs to the gate whose theta is angles[:, c];
    # its phi / lambda (columns c+1 / c+2) are brought to column c with lane rolls so
    # everything stays a full-lane (BT, 128) op.
    ang_p1 = pltpu.roll(angles, ANG_PAD - 1, 1)          # phi    = angles[:, c+1] at col c
    ang_p2 = pltpu.roll(angles, ANG_PAD - 2, 1)          # lambda = angles[:, c+2] at col c
    ch = jnp.cos(0.5 * angles)                           # cos(theta/2)  (RXX + U3)
    sh = jnp.sin(0.5 * angles)                           # sin(theta/2)
    cph, sph = jnp.cos(ang_p1), jnp.sin(ang_p1)          # cos/sin(phi)
    clm, slm = jnp.cos(ang_p2), jnp.sin(ang_p2)          # cos/sin(lambda)
    cpl, spl = jnp.cos(ang_p1 + ang_p2), jnp.sin(ang_p1 + ang_p2)   # cos/sin(phi+lambda)
    # U3 = [[a, b], [c, d]]:
    #   a = cos(t/2)             b = -e^{i lam} sin(t/2)
    #   c = e^{i phi} sin(t/2)   d = e^{i (phi+lam)} cos(t/2)
    bre, bim = -sh * clm, -sh * slm
    cre, cim = sh * cph, sh * sph
    dre, dim_ = ch * cpl, ch * spl

    # -------------- per-lane constants kept live across the gate chain --------------
    # Only the lane iota (int32) and ONE f32 sign plane stay live (~16 vregs at
    # bt=64); per-gate bit masks are recomputed (1 AND + 1 cmp) at each use site.
    bt = s_ref.shape[0]
    lane = jax.lax.broadcasted_iota(jnp.int32, (bt, PACKED), 1)
    sgn_i = jnp.where(lane >= DIM, 1.0, -1.0).astype(jnp.float32)   # [-1 | +1]

    # Packed [re | im] layout: lanes 0..63 real, 64..127 imag.  Every qubit-flip
    # mask is < 64, so the butterfly rolls below never mix the two halves (the
    # wrapped-around lanes are always discarded by the select).  This invariant
    # breaks if NUM_QUBITS > 6 or the packing changes.
    assert (1 << (NUM_QUBITS - 1)) < DIM and PACKED == 2 * DIM

    s = s_ref[...]                                       # (BT, 128) [re | im]

    def col(a, c):                                       # (BT, 1) coefficient column
        return a[:, c:c + 1]

    def flip(v, m):
        # v[:, j] -> v[:, j ^ m], single-bit m: 2 XLU rolls + 1 VPU select.
        hit = (lane & m) != 0
        return jnp.where(hit, pltpu.roll(v, m, 1), pltpu.roll(v, PACKED - m, 1))

    def jmul(t):
        # multiply a packed complex vector by i: [re | im] -> [-im | re]
        return sgn_i * pltpu.roll(t, DIM, 1)

    def apply_rxx(v, c, i):
        # RXX(t) = cos(t/2) I - i sin(t/2) X_i X_{i+1}
        hi = 1 << (NUM_QUBITS - 1 - i)
        lo = 1 << (NUM_QUBITS - 2 - i)
        f = flip(flip(v, hi), lo)                        # both wire bits flipped
        return col(ch, c) * v - jmul(col(sh, c) * f)

    def apply_u3(v, c, wire):
        # Single 4-term MAC with lane-blended coefficient planes:
        #   out = A*v + B*f + i*(C*f + D*v),  f = state with the wire bit flipped
        #   bit == 0 rows: A = cos(t/2), B = b_re, C = b_im, D = 0
        #   bit == 1 rows: A = d_re,     B = c_re, C = c_im, D = d_im
        m = 1 << (NUM_QUBITS - 1 - wire)
        bit = (lane & m) != 0
        A = jnp.where(bit, col(dre, c), col(ch, c))
        Bk = jnp.where(bit, col(cre, c), col(bre, c))
        Ck = jnp.where(bit, col(cim, c), col(bim, c))
        Dk = jnp.where(bit, col(dim_, c), 0.0)
        f = flip(v, m)
        return A * v + Bk * f + jmul(Ck * f + Dk * v)

    # ---------------- circuit: 3 matchgate layers, statically unrolled ---------------
    for lay in range(NUM_LAYER):
        c = lay * (4 * NUM_QUBITS - 1)
        for i in range(NUM_QUBITS - 1):
            s = apply_rxx(s, c, i)
            c += 1
            s = apply_u3(s, c, i)
            c += 3
        s = apply_u3(s, c, NUM_QUBITS - 1)

    o_ref[...] = s


@jax.jit
def qrnn_forward(x, W, b, state_re, state_im):
    B, in_size = x.shape

    # ---- pad the angle axis 69 -> 128 so every in-kernel plane is full-lane ----
    W_pad = jnp.zeros((in_size, ANG_PAD), jnp.float32).at[:, :NUM_ANGLES].set(
        W.astype(jnp.float32))
    b_pad = jnp.zeros((1, ANG_PAD), jnp.float32).at[0, :NUM_ANGLES].set(
        b.astype(jnp.float32))

    # ---- pad batch to a multiple of 8 sublanes; spill-free batch tile <= 64 ----
    B_pad = ((B + 7) // 8) * 8
    if B_pad >= 16:
        # keep >= 2 grid steps so both TensorCores can get work on v7x
        bt_cap = min(64, (B_pad // 2) // 8 * 8)
    else:
        bt_cap = B_pad
    bt = 8
    for cand in (64, 32, 16, 8):
        if cand <= bt_cap and B_pad % cand == 0:
            bt = cand
            break
    grid = (B_pad // bt,)

    x_pad = jnp.zeros((B_pad, in_size), jnp.float32).at[:B].set(x.astype(jnp.float32))
    s_packed = (jnp.zeros((B_pad, PACKED), jnp.float32)
                .at[:B, :DIM].set(state_re.astype(jnp.float32))
                .at[:B, DIM:].set(state_im.astype(jnp.float32)))

    out = pl.pallas_call(
        qrnn_kernel,
        out_shape=jax.ShapeDtypeStruct((B_pad, PACKED), jnp.float32),
        grid=grid,
        in_specs=[
            pl.BlockSpec((bt, in_size), lambda i: (i, 0)),
            # W / b blocks are constant (block index (0, 0) every grid step), so
            # Pallas does not re-DMA them between consecutive steps.
            pl.BlockSpec((in_size, ANG_PAD), lambda i: (0, 0)),
            pl.BlockSpec((1, ANG_PAD), lambda i: (0, 0)),
            pl.BlockSpec((bt, PACKED), lambda i: (i, 0)),
        ],
        out_specs=pl.BlockSpec((bt, PACKED), lambda i: (i, 0)),
        input_output_aliases={3: 0},     # donate the freshly built packed state
        compiler_params=pltpu.CompilerParams(
            dimension_semantics=("parallel",)),
    )(x_pad, W_pad, b_pad, s_packed)
    return out[:B, :DIM], out[:B, DIM:]


# ------------------------------ pure-numpy reference ------------------------------
def _u3_np(psi, th, ph, lam, wire):
    idx = np.arange(DIM)
    mask = 1 << (NUM_QUBITS - 1 - wire)
    bit = (idx >> (NUM_QUBITS - 1 - wire)) & 1
    f = psi[:, idx ^ mask]
    co = np.cos(th / 2)[:, None]
    sn = np.sin(th / 2)[:, None]
    a = co
    bb = -sn * np.exp(1j * lam)[:, None]
    cc = sn * np.exp(1j * ph)[:, None]
    dd = co * np.exp(1j * (ph + lam))[:, None]
    return np.where(bit[None, :] == 0, a * psi + bb * f, cc * f + dd * psi)


def ref_forward_np(x, W, b, state_re, state_im):
    angles = x.astype(np.float64) @ W.astype(np.float64) + b.astype(np.float64)
    psi = state_re.astype(np.complex128) + 1j * state_im.astype(np.complex128)
    idx = np.arange(DIM)
    for lay in range(NUM_LAYER):
        base = lay * (4 * NUM_QUBITS - 1)
        ang = 0
        for i in range(NUM_QUBITS - 1):
            theta = angles[:, base + ang]
            ang += 1
            mask = (1 << (NUM_QUBITS - 1 - i)) | (1 << (NUM_QUBITS - 2 - i))
            f = psi[:, idx ^ mask]
            co = np.cos(theta / 2)[:, None]
            sn = np.sin(theta / 2)[:, None]
            psi = co * psi - 1j * sn * f
            th, ph, lam = (angles[:, base + ang], angles[:, base + ang + 1],
                           angles[:, base + ang + 2])
            ang += 3
            psi = _u3_np(psi, th, ph, lam, i)
        th, ph, lam = (angles[:, base + ang], angles[:, base + ang + 1],
                       angles[:, base + ang + 2])
        psi = _u3_np(psi, th, ph, lam, NUM_QUBITS - 1)
    return psi


if __name__ == "__main__":
    B = 2
    input_size = 32

    key = jax.random.PRNGKey(0)
    k1, k2, k3 = jax.random.split(key, 3)
    bound = 1.0 / np.sqrt(input_size)   # torch.nn.Linear default init range
    W = jax.random.uniform(k1, (input_size, NUM_ANGLES), jnp.float32, -bound, bound)
    b = jax.random.uniform(k2, (NUM_ANGLES,), jnp.float32, -bound, bound)
    x = jax.random.normal(k3, (B, input_size), jnp.float32)

    # fresh QuantumDevice state |000000>
    state_re = jnp.zeros((B, DIM), jnp.float32).at[:, 0].set(1.0)
    state_im = jnp.zeros((B, DIM), jnp.float32)

    out_re, out_im = qrnn_forward(x, W, b, state_re, state_im)
    jax.block_until_ready((out_re, out_im))

    # correctness checks vs. numpy reference + unitarity (norm preservation)
    psi_ref = ref_forward_np(np.asarray(x), np.asarray(W), np.asarray(b),
                             np.asarray(state_re), np.asarray(state_im))
    assert np.allclose(np.asarray(out_re), psi_ref.real, atol=1e-4), "real part mismatch"
    assert np.allclose(np.asarray(out_im), psi_ref.imag, atol=1e-4), "imag part mismatch"
    norms = np.asarray(jnp.sum(out_re ** 2 + out_im ** 2, axis=1))
    assert np.allclose(norms, 1.0, atol=1e-4), norms

    print("KERNEL_OK")
</pallas_src>

<mosaic_0001>
module attributes {stable_mosaic.version = 11 : i64} {
  func.func @qrnn_kernel(%arg0: i32, %arg1: memref<8x32xf32, #tpu.memory_space<vmem>>, %arg2: memref<32x128xf32, #tpu.memory_space<vmem>>, %arg3: memref<1x128xf32, #tpu.memory_space<vmem>>, %arg4: memref<8x128xf32, #tpu.memory_space<vmem>>, %arg5: memref<8x128xf32, #tpu.memory_space<vmem>>) attributes {dimension_semantics = [#tpu.dimension_semantics<parallel>], iteration_bounds = array<i64: 1>, scalar_prefetch = 0 : i64, scratch_operands = 0 : i64, tpu.core_type = #tpu.core_type<tc>, window_params = [{transform_indices = @transform_0, window_bounds = array<i64: 8, 32>}, {pipeline_mode = #tpu.pipeline_mode<synchronous>, transform_indices = @transform_1, window_bounds = array<i64: 32, 128>}, {pipeline_mode = #tpu.pipeline_mode<synchronous>, transform_indices = @transform_2, window_bounds = array<i64: 1, 128>}, {transform_indices = @transform_3, window_bounds = array<i64: 8, 128>}, {transform_indices = @transform_4, window_bounds = array<i64: 8, 128>}]} {
    %c0 = arith.constant 0 : index
    %c0_0 = arith.constant 0 : index
    %0 = vector.load %arg1[%c0, %c0_0] : memref<8x32xf32, #tpu.memory_space<vmem>>, vector<8x32xf32>
    %c0_1 = arith.constant 0 : index
    %c0_2 = arith.constant 0 : index
    %1 = vector.load %arg2[%c0_1, %c0_2] : memref<32x128xf32, #tpu.memory_space<vmem>>, vector<32x128xf32>
    %cst = arith.constant dense<0.000000e+00> : vector<8x128xf32>
    %2 = tpu.matmul %0, %1, %cst {dimension_numbers = #tpu.dot_dimension_numbers<[1], [0], [0], [1], [0, 0, 1, 1], [], []>, precision = #tpu.contract_precision<fp32>} : vector<8x32xf32>, vector<32x128xf32>, vector<8x128xf32> -> vector<8x128xf32>
    %c0_3 = arith.constant 0 : index
    %c0_4 = arith.constant 0 : index
    %3 = vector.load %arg3[%c0_3, %c0_4] : memref<1x128xf32, #tpu.memory_space<vmem>>, vector<1x128xf32>
    %4 = vector.broadcast %3 : vector<1x128xf32> to vector<8x128xf32>
    %5 = arith.addf %2, %4 : vector<8x128xf32>
    %c127_i32 = arith.constant 127 : i32
    %6 = tpu.dynamic_rotate %5 by %c127_i32 dim 1 : vector<8x128xf32>, i32 -> vector<8x128xf32>
    %c126_i32 = arith.constant 126 : i32
    %7 = tpu.dynamic_rotate %5 by %c126_i32 dim 1 : vector<8x128xf32>, i32 -> vector<8x128xf32>
    %cst_5 = arith.constant 5.000000e-01 : f32
    %8 = vector.broadcast %cst_5 : f32 to vector<8x128xf32>
    %9 = arith.mulf %8, %5 : vector<8x128xf32>
    %10 = math.cos %9 : vector<8x128xf32>
    %cst_6 = arith.constant 5.000000e-01 : f32
    %11 = vector.broadcast %cst_6 : f32 to vector<8x128xf32>
    %12 = arith.mulf %11, %5 : vector<8x128xf32>
    %13 = math.sin %12 : vector<8x128xf32>
    %14 = math.cos %6 : vector<8x128xf32>
    %15 = math.sin %6 : vector<8x128xf32>
    %16 = math.cos %7 : vector<8x128xf32>
    %17 = math.sin %7 : vector<8x128xf32>
    %18 = arith.addf %6, %7 : vector<8x128xf32>
    %19 = math.cos %18 : vector<8x128xf32>
    %20 = arith.addf %6, %7 : vector<8x128xf32>
    %21 = math.sin %20 : vector<8x128xf32>
    %cst_7 = arith.constant 0.000000e+00 : f32
    %22 = vector.broadcast %cst_7 : f32 to vector<8x128xf32>
    %23 = arith.subf %22, %13 : vector<8x128xf32>
    %24 = arith.mulf %23, %16 : vector<8x128xf32>
    %cst_8 = arith.constant 0.000000e+00 : f32
    %25 = vector.broadcast %cst_8 : f32 to vector<8x128xf32>
    %26 = arith.subf %25, %13 : vector<8x128xf32>
    %27 = arith.mulf %26, %17 : vector<8x128xf32>
    %28 = arith.mulf %13, %14 : vector<8x128xf32>
    %29 = arith.mulf %13, %15 : vector<8x128xf32>
    %30 = arith.mulf %10, %19 : vector<8x128xf32>
    %31 = arith.mulf %10, %21 : vector<8x128xf32>
    %32 = tpu.iota {dimensions = array<i32: 1>} : vector<8x128xi32>
    %c64_i32 = arith.constant 64 : i32
    %33 = vector.broadcast %c64_i32 : i32 to vector<8x128xi32>
    %34 = arith.cmpi sge, %32, %33 : vector<8x128xi32>
    %cst_9 = arith.constant 1.000000e+00 : f32
    %cst_10 = arith.constant -1.000000e+00 : f32
    %35 = vector.broadcast %cst_9 : f32 to vector<8x128xf32>
    %36 = vector.broadcast %cst_10 : f32 to vector<8x128xf32>
    %37 = arith.select %34, %35, %36 : vector<8x128xi1>, vector<8x128xf32>
    %c0_11 = arith.constant 0 : index
    %c0_12 = arith.constant 0 : index
    %38 = vector.load %arg4[%c0_11, %c0_12] : memref<8x128xf32, #tpu.memory_space<vmem>>, vector<8x128xf32>
    %c32_i32 = arith.constant 32 : i32
    %39 = vector.broadcast %c32_i32 : i32 to vector<8x128xi32>
    %40 = arith.andi %32, %39 : vector<8x128xi32>
    %c0_i32 = arith.constant 0 : i32
    %41 = vector.broadcast %c0_i32 : i32 to vector<8x128xi32>
    %42 = arith.cmpi ne, %40, %41 : vector<8x128xi32>
    %c32_i32_13 = arith.constant 32 : i32
    %43 = tpu.dynamic_rotate %38 by %c32_i32_13 dim 1 : vector<8x128xf32>, i32 -> vector<8x128xf32>
    %c96_i32 = arith.constant 96 : i32
    %44 = tpu.dynamic_rotate %38 by %c96_i32 dim 1 : vector<8x128xf32>, i32 -> vector<8x128xf32>
    %45 = arith.select %42, %43, %44 : vector<8x128xi1>, vector<8x128xf32>
    %c16_i32 = arith.constant 16 : i32
    %46 = vector.broadcast %c16_i32 : i32 to vector<8x128xi32>
    %47 = arith.andi %32, %46 : vector<8x128xi32>
    %c0_i32_14 = arith.constant 0 : i32
    %48 = vector.broadcast %c0_i32_14 : i32 to vector<8x128xi32>
    %49 = arith.cmpi ne, %47, %48 : vector<8x128xi32>
    %c16_i32_15 = arith.constant 16 : i32
    %50 = tpu.dynamic_rotate %45 by %c16_i32_15 dim 1 : vector<8x128xf32>, i32 -> vector<8x128xf32>
    %c112_i32 = arith.constant 112 : i32
    %51 = tpu.dynamic_rotate %45 by %c112_i32 dim 1 : vector<8x128xf32>, i32 -> vector<8x128xf32>
    %52 = arith.select %49, %50, %51 : vector<8x128xi1>, vector<8x128xf32>
    %53 = vector.extract_strided_slice %10 {offsets = [0, 0], sizes = [8, 1], strides = [1, 1]} : vector<8x128xf32> to vector<8x1xf32>
    %54 = vector.broadcast %53 : vector<8x1xf32> to vector<8x128xf32>
    %55 = arith.mulf %54, %38 : vector<8x128xf32>
    %56 = vector.extract_strided_slice %13 {offsets = [0, 0], sizes = [8, 1], strides = [1, 1]} : vector<8x128xf32> to vector<8x1xf32>
    %57 = vector.broadcast %56 : vector<8x1xf32> to vector<8x128xf32>
    %58 = arith.mulf %57, %52 : vector<8x128xf32>
    %c64_i32_16 = arith.constant 64 : i32
    %59 = tpu.dynamic_rotate %58 by %c64_i32_16 dim 1 : vector<8x128xf32>, i32 -> vector<8x128xf32>
    %60 = arith.mulf %37, %59 : vector<8x128xf32>
    %61 = arith.subf %55, %60 : vector<8x128xf32>
    %c32_i32_17 = arith.constant 32 : i32
    %62 = vector.broadcast %c32_i32_17 : i32 to vector<8x128xi32>
    %63 = arith.andi %32, %62 : vector<8x128xi32>
    %c0_i32_18 = arith.constant 0 : i32
    %64 = vector.broadcast %c0_i32_18 : i32 to vector<8x128xi32>
    %65 = arith.cmpi ne, %63, %64 : vector<8x128xi32>
    %66 = vector.extract_strided_slice %30 {offsets = [0, 1], sizes = [8, 1], strides = [1, 1]} : vector<8x128xf32> to vector<8x1xf32>
    %67 = vector.extract_strided_slice %10 {offsets = [0, 1], sizes = [8, 1], strides = [1, 1]} : vector<8x128xf32> to vector<8x1xf32>
    %68 = vector.shape_cast %66 : vector<8x1xf32> to vector<8x1xf32>
    %69 = vector.broadcast %68 : vector<8x1xf32> to vector<8x128xf32>
    %70 = vector.shape_cast %67 : vector<8x1xf32> to vector<8x1xf32>
    %71 = vector.broadcast %70 : vector<8x1xf32> to vector<8x128xf32>
    %72 = arith.select %65, %69, %71 : vector<8x128xi1>, vector<8x128xf32>
    %73 = vector.extract_strided_slice %28 {offsets = [0, 1], sizes = [8, 1], strides = [1, 1]} : vector<8x128xf32> to vector<8x1xf32>
    %74 = vector.extract_strided_slice %24 {offsets = [0, 1], sizes = [8, 1], strides = [1, 1]} : vector<8x128xf32> to vector<8x1xf32>
    %75 = vector.shape_cast %73 : vector<8x1xf32> to vector<8x1xf32>
    %76 = vector.broadcast %75 : vector<8x1xf32> to vector<8x128xf32>
    %77 = vector.shape_cast %74 : vector<8x1xf32> to vector<8x1xf32>
    %78 = vector.broadcast %77 : vector<8x1xf32> to vector<8x128xf32>
    %79 = arith.select %65, %76, %78 : vector<8x128xi1>, vector<8x128xf32>
    %80 = vector.extract_strided_slice %29 {offsets = [0, 1], sizes = [8, 1], strides = [1, 1]} : vector<8x128xf32> to vector<8x1xf32>
    %81 = vector.extract_strided_slice %27 {offsets = [0, 1], sizes = [8, 1], strides = [1, 1]} : vector<8x128xf32> to vector<8x1xf32>
    %82 = vector.shape_cast %80 : vector<8x1xf32> to vector<8x1xf32>
    %83 = vector.broadcast %82 : vector<8x1xf32> to vector<8x128xf32>
    %84 = vector.shape_cast %81 : vector<8x1xf32> to vector<8x1xf32>
    %85 = vector.broadcast %84 : vector<8x1xf32> to vector<8x128xf32>
    %86 = arith.select %65, %83, %85 : vector<8x128xi1>, vector<8x128xf32>
    %87 = vector.extract_strided_slice %31 {offsets = [0, 1], sizes = [8, 1], strides = [1, 1]} : vector<8x128xf32> to vector<8x1xf32>
    %cst_19 = arith.constant 0.000000e+00 : f32
    %88 = vector.shape_cast %87 : vector<8x1xf32> to vector<8x1xf32>
    %89 = vector.broadcast %88 : vector<8x1xf32> to vector<8x128xf32>
    %90 = vector.broadcast %cst_19 : f32 to vector<8x128xf32>
    %91 = arith.select %65, %89, %90 : vector<8x128xi1>, vector<8x128xf32>
    %c32_i32_20 = arith.constant 32 : i32
    %92 = vector.broadcast %c32_i32_20 : i32 to vector<8x128xi32>
    %93 = arith.andi %32, %92 : vector<8x128xi32>
    %c0_i32_21 = arith.constant 0 : i32
    %94 = vector.broadcast %c0_i32_21 : i32 to vector<8x128xi32>
    %95 = arith.cmpi ne, %93, %94 : vector<8x128xi32>
    %c32_i32_22 = arith.constant 32 : i32
    %96 = tpu.dynamic_rotate %61 by %c32_i32_22 dim 1 : vector<8x128xf32>, i32 -> vector<8x128xf32>
    %c96_i32_23 = arith.constant 96 : i32
    %97 = tpu.dynamic_rotate %61 by %c96_i32_23 dim 1 : vector<8x128xf32>, i32 -> vector<8x128xf32>
    %98 = arith.select %95, %96, %97 : vector<8x128xi1>, vector<8x128xf32>
    %99 = arith.mulf %72, %61 : vector<8x128xf32>
    %100 = arith.mulf %79, %98 : vector<8x128xf32>
    %101 = arith.addf %99, %100 : vector<8x128xf32>
    %102 = arith.mulf %86, %98 : vector<8x128xf32>
    %103 = arith.mulf %91, %61 : vector<8x128xf32>
    %104 = arith.addf %102, %103 : vector<8x128xf32>
    %c64_i32_24 = arith.constant 64 : i32
    %105 = tpu.dynamic_rotate %104 by %c64_i32_24 dim 1 : vector<8x128xf32>, i32 -> vector<8x128xf32>
    %106 = arith.mulf %37, %105 : vector<8x128xf32>
    %107 = arith.addf %101, %106 : vector<8x128xf32>
    %c16_i32_25 = arith.constant 16 : i32
    %108 = vector.broadcast %c16_i32_25 : i32 to vector<8x128xi32>
    %109 = arith.andi %32, %108 : vector<8x128xi32>
    %c0_i32_26 = arith.constant 0 : i32
    %110 = vector.broadcast %c0_i32_26 : i32 to vector<8x128xi32>
    %111 = arith.cmpi ne, %109, %110 : vector<8x128xi32>
    %c16_i32_27 = arith.constant 16 : i32
    %112 = tpu.dynamic_rotate %107 by %c16_i32_27 dim 1 : vector<8x128xf32>, i32 -> vector<8x128xf32>
    %c112_i32_28 = arith.constant 112 : i32
    %113 = tpu.dynamic_rotate %107 by %c112_i32_28 dim 1 : vector<8x128xf32>, i32 -> vector<8x128xf32>
    %114 = arith.select %111, %112, %113 : vector<8x128xi1>, vector<8x128xf32>
    %c8_i32 = arith.constant 8 : i32
    %115 = vector.broadcast %c8_i32 : i32 to vector<8x128xi32>
    %116 = arith.andi %32, %115 : vector<8x128xi32>
    %c0_i32_29 = arith.constant 0 : i32
    %117 = vector.broadcast %c0_i32_29 : i32 to vector<8x128xi32>
    %118 = arith.cmpi ne, %116, %117 : vector<8x128xi32>
    %c8_i32_30 = arith.constant 8 : i32
    %119 = tpu.dynamic_rotate %114 by %c8_i32_30 dim 1 : vector<8x128xf32>, i32 -> vector<8x128xf32>
    %c120_i32 = arith.constant 120 : i32
    %120 = tpu.dynamic_rotate %114 by %c120_i32 dim 1 : vector<8x128xf32>, i32 -> vector<8x128xf32>
    %121 = arith.select %118, %119, %120 : vector<8x128xi1>, vector<8x128xf32>
    %122 = vector.extract_strided_slice %10 {offsets = [0, 4], sizes = [8, 1], strides = [1, 1]} : vector<8x128xf32> to vector<8x1xf32>
    %123 = vector.broadcast %122 : vector<8x1xf32> to vector<8x128xf32>
    %124 = arith.mulf %123, %107 : vector<8x128xf32>
    %125 = vector.extract_strided_slice %13 {offsets = [0, 4], sizes = [8, 1], strides = [1, 1]} : vector<8x128xf32> to vector<8x1xf32>
    %126 = vector.broadcast %125 : vector<8x1xf32> to vector<8x128xf32>
    %127 = arith.mulf %126, %121 : vector<8x128xf32>
    %c64_i32_31 = arith.constant 64 : i32
    %128 = tpu.dynamic_rotate %127 by %c64_i32_31 dim 1 : vector<8x128xf32>, i32 -> vector<8x128xf32>
    %129 = arith.mulf %37, %128 : vector<8x128xf32>
    %130 = arith.subf %124, %129 : vector<8x128xf32>
    %c16_i32_32 = arith.constant 16 : i32
    %131 = vector.broadcast %c16_i32_32 : i32 to vector<8x128xi32>
    %132 = arith.andi %32, %131 : vector<8x128xi32>
    %c0_i32_33 = arith.constant 0 : i32
    %133 = vector.broadcast %c0_i32_33 : i32 to vector<8x128xi32>
    %134 = arith.cmpi ne, %132, %133 : vector<8x128xi32>
    %135 = vector.extract_strided_slice %30 {offsets = [0, 5], sizes = [8, 1], strides = [1, 1]} : vector<8x128xf32> to vector<8x1xf32>
    %136 = vector.extract_strided_slice %10 {offsets = [0, 5], sizes = [8, 1], strides = [1, 1]} : vector<8x128xf32> to vector<8x1xf32>
    %137 = vector.shape_cast %135 : vector<8x1xf32> to vector<8x1xf32>
    %138 = vector.broadcast %137 : vector<8x1xf32> to vector<8x128xf32>
    %139 = vector.shape_cast %136 : vector<8x1xf32> to vector<8x1xf32>
    %140 = vector.broadcast %139 : vector<8x1xf32> to vector<8x128xf32>
    %141 = arith.select %134, %138, %140 : vector<8x128xi1>, vector<8x128xf32>
    %142 = vector.extract_strided_slice %28 {offsets = [0, 5], sizes = [8, 1], strides = [1, 1]} : vector<8x128xf32> to vector<8x1xf32>
    %143 = vector.extract_strided_slice %24 {offsets = [0, 5], sizes = [8, 1], strides = [1, 1]} : vector<8x128xf32> to vector<8x1xf32>
    %144 = vector.shape_cast %142 : vector<8x1xf32> to vector<8x1xf32>
    %145 = vector.broadcast %144 : vector<8x1xf32> to vector<8x128xf32>
    %146 = vector.shape_cast %143 : vector<8x1xf32> to vector<8x1xf32>
    %147 = vector.broadcast %146 : vector<8x1xf32> to vector<8x128xf32>
    %148 = arith.select %134, %145, %147 : vector<8x128xi1>, vector<8x128xf32>
    %149 = vector.extract_strided_slice %29 {offsets = [0, 5], sizes = [8, 1], strides = [1, 1]} : vector<8x128xf32> to vector<8x1xf32>
    %150 = vector.extract_strided_slice %27 {offsets = [0, 5], sizes = [8, 1], strides = [1, 1]} : vector<8x128xf32> to vector<8x1xf32>
    %151 = vector.shape_cast %149 : vector<8x1xf32> to vector<8x1xf32>
    %152 = vector.broadcast %151 : vector<8x1xf32> to vector<8x128xf32>
    %153 = vector.shape_cast %150 : vector<8x1xf32> to vector<8x1xf32>
    %154 = vector.broadcast %153 : vector<8x1xf32> to vector<8x128xf32>
    %155 = arith.select %134, %152, %154 : vector<8x128xi1>, vector<8x128xf32>
    %156 = vector.extract_strided_slice %31 {offsets = [0, 5], sizes = [8, 1], strides = [1, 1]} : vector<8x128xf32> to vector<8x1xf32>
    %cst_34 = arith.constant 0.000000e+00 : f32
    %157 = vector.shape_cast %156 : vector<8x1xf32> to vector<8x1xf32>
    %158 = vector.broadcast %157 : vector<8x1xf32> to vector<8x128xf32>
    %159 = vector.broadcast %cst_34 : f32 to vector<8x128xf32>
    %160 = arith.select %134, %158, %159 : vector<8x128xi1>, vector<8x128xf32>
    %c16_i32_35 = arith.constant 16 : i32
    %161 = vector.broadcast %c16_i32_35 : i32 to vector<8x128xi32>
    %162 = arith.andi %32, %161 : vector<8x128xi32>
    %c0_i32_36 = arith.constant 0 : i32
    %163 = vector.broadcast %c0_i32_36 : i32 to vector<8x128xi32>
    %164 = arith.cmpi ne, %162, %163 : vector<8x128xi32>
    %c16_i32_37 = arith.constant 16 : i32
    %165 = tpu.dynamic_rotate %130 by %c16_i32_37 dim 1 : vector<8x128xf32>, i32 -> vector<8x128xf32>
    %c112_i32_38 = arith.constant 112 : i32
    %166 = tpu.dynamic_rotate %130 by %c112_i32_38 dim 1 : vector<8x128xf32>, i32 -> vector<8x128xf32>
    %167 = arith.select %164, %165, %166 : vector<8x128xi1>, vector<8x128xf32>
    %168 = arith.mulf %141, %130 : vector<8x128xf32>
    %169 = arith.mulf %148, %167 : vector<8x128xf32>
    %170 = arith.addf %168, %169 : vector<8x128xf32>
    %171 = arith.mulf %155, %167 : vector<8x128xf32>
    %172 = arith.mulf %160, %130 : vector<8x128xf32>
    %173 = arith.addf %171, %172 : vector<8x128xf32>
    %c64_i32_39 = arith.constant 64 : i32
    %174 = tpu.dynamic_rotate %173 by %c64_i32_39 dim 1 : vector<8x128xf32>, i32 -> vector<8x128xf32>
    %175 = arith.mulf %37, %174 : vector<8x128xf32>
    %176 = arith.addf %170, %175 : vector<8x128xf32>
    %c8_i32_40 = arith.constant 8 : i32
    %177 = vector.broadcast %c8_i32_40 : i32 to vector<8x128xi32>
    %178 = arith.andi %32, %177 : vector<8x128xi32>
    %c0_i32_41 = arith.constant 0 : i32
    %179 = vector.broadcast %c0_i32_41 : i32 to vector<8x128xi32>
    %180 = arith.cmpi ne, %178, %179 : vector<8x128xi32>
    %c8_i32_42 = arith.constant 8 : i32
    %181 = tpu.dynamic_rotate %176 by %c8_i32_42 dim 1 : vector<8x128xf32>, i32 -> vector<8x128xf32>
    %c120_i32_43 = arith.constant 120 : i32
    %182 = tpu.dynamic_rotate %176 by %c120_i32_43 dim 1 : vector<8x128xf32>, i32 -> vector<8x128xf32>
    %183 = arith.select %180, %181, %182 : vector<8x128xi1>, vector<8x128xf32>
    %c4_i32 = arith.constant 4 : i32
    %184 = vector.broadcast %c4_i32 : i32 to vector<8x128xi32>
    %185 = arith.andi %32, %184 : vector<8x128xi32>
    %c0_i32_44 = arith.constant 0 : i32
    %186 = vector.broadcast %c0_i32_44 : i32 to vector<8x128xi32>
    %187 = arith.cmpi ne, %185, %186 : vector<8x128xi32>
    %c4_i32_45 = arith.constant 4 : i32
    %188 = tpu.dynamic_rotate %183 by %c4_i32_45 dim 1 : vector<8x128xf32>, i32 -> vector<8x128xf32>
    %c124_i32 = arith.constant 124 : i32
    %189 = tpu.dynamic_rotate %183 by %c124_i32 dim 1 : vector<8x128xf32>, i32 -> vector<8x128xf32>
    %190 = arith.select %187, %188, %189 : vector<8x128xi1>, vector<8x128xf32>
    %191 = vector.extract_strided_slice %10 {offsets = [0, 8], sizes = [8, 1], strides = [1, 1]} : vector<8x128xf32> to vector<8x1xf32>
    %192 = vector.broadcast %191 : vector<8x1xf32> to vector<8x128xf32>
    %193 = arith.mulf %192, %176 : vector<8x128xf32>
    %194 = vector.extract_strided_slice %13 {offsets = [0, 8], sizes = [8, 1], strides = [1, 1]} : vector<8x128xf32> to vector<8x1xf32>
    %195 = vector.broadcast %194 : vector<8x1xf32> to vector<8x128xf32>
    %196 = arith.mulf %195, %190 : vector<8x128xf32>
    %c64_i32_46 = arith.constant 64 : i32
    %197 = tpu.dynamic_rotate %196 by %c64_i32_46 dim 1 : vector<8x128xf32>, i32 -> vector<8x128xf32>
    %198 = arith.mulf %37, %197 : vector<8x128xf32>
    %199 = arith.subf %193, %198 : vector<8x128xf32>
    %c8_i32_47 = arith.constant 8 : i32
    %200 = vector.broadcast %c8_i32_47 : i32 to vector<8x128xi32>
    %201 = arith.andi %32, %200 : vector<8x128xi32>
    %c0_i32_48 = arith.constant 0 : i32
    %202 = vector.broadcast %c0_i32_48 : i32 to vector<8x128xi32>
    %203 = arith.cmpi ne, %201, %202 : vector<8x128xi32>
    %204 = vector.extract_strided_slice %30 {offsets = [0, 9], sizes = [8, 1], strides = [1, 1]} : vector<8x128xf32> to vector<8x1xf32>
    %205 = vector.extract_strided_slice %10 {offsets = [0, 9], sizes = [8, 1], strides = [1, 1]} : vector<8x128xf32> to vector<8x1xf32>
    %206 = vector.shape_cast %204 : vector<8x1xf32> to vector<8x1xf32>
    %207 = vector.broadcast %206 : vector<8x1xf32> to vector<8x128xf32>
    %208 = vector.shape_cast %205 : vector<8x1xf32> to vector<8x1xf32>
    %209 = vector.broadcast %208 : vector<8x1xf32> to vector<8x128xf32>
    %210 = arith.select %203, %207, %209 : vector<8x128xi1>, vector<8x128xf32>
    %211 = vector.extract_strided_slice %28 {offsets = [0, 9], sizes = [8, 1], strides = [1, 1]} : vector<8x128xf32> to vector<8x1xf32>
    %212 = vector.extract_strided_slice %24 {offsets = [0, 9], sizes = [8, 1], strides = [1, 1]} : vector<8x128xf32> to vector<8x1xf32>
    %213 = vector.shape_cast %211 : vector<8x1xf32> to vector<8x1xf32>
    %214 = vector.broadcast %213 : vector<8x1xf32> to vector<8x128xf32>
    %215 = vector.shape_cast %212 : vector<8x1xf32> to vector<8x1xf32>
    %216 = vector.broadcast %215 : vector<8x1xf32> to vector<8x128xf32>
    %217 = arith.select %203, %214, %216 : vector<8x128xi1>, vector<8x128xf32>
    %218 = vector.extract_strided_slice %29 {offsets = [0, 9], sizes = [8, 1], strides = [1, 1]} : vector<8x128xf32> to vector<8x1xf32>
    %219 = vector.extract_strided_slice %27 {offsets = [0, 9], sizes = [8, 1], strides = [1, 1]} : vector<8x128xf32> to vector<8x1xf32>
    %220 = vector.shape_cast %218 : vector<8x1xf32> to vector<8x1xf32>
    %221 = vector.broadcast %220 : vector<8x1xf32> to vector<8x128xf32>
    %222 = vector.shape_cast %219 : vector<8x1xf32> to vector<8x1xf32>
    %223 = vector.broadcast %222 : vector<8x1xf32> to vector<8x128xf32>
    %224 = arith.select %203, %221, %223 : vector<8x128xi1>, vector<8x128xf32>
    %225 = vector.extract_strided_slice %31 {offsets = [0, 9], sizes = [8, 1], strides = [1, 1]} : vector<8x128xf32> to vector<8x1xf32>
    %cst_49 = arith.constant 0.000000e+00 : f32
    %226 = vector.shape_cast %225 : vector<8x1xf32> to vector<8x1xf32>
    %227 = vector.broadcast %226 : vector<8x1xf32> to vector<8x128xf32>
    %228 = vector.broadcast %cst_49 : f32 to vector<8x128xf32>
    %229 = arith.select %203, %227, %228 : vector<8x128xi1>, vector<8x128xf32>
    %c8_i32_50 = arith.constant 8 : i32
    %230 = vector.broadcast %c8_i32_50 : i32 to vector<8x128xi32>
    %231 = arith.andi %32, %230 : vector<8x128xi32>
    %c0_i32_51 = arith.constant 0 : i32
    %232 = vector.broadcast %c0_i32_51 : i32 to vector<8x128xi32>
    %233 = arith.cmpi ne, %231, %232 : vector<8x128xi32>
    %c8_i32_52 = arith.constant 8 : i32
    %234 = tpu.dynamic_rotate %199 by %c8_i32_52 dim 1 : vector<8x128xf32>, i32 -> vector<8x128xf32>
    %c120_i32_53 = arith.constant 120 : i32
    %235 = tpu.dynamic_rotate %199 by %c120_i32_53 dim 1 : vector<8x128xf32>, i32 -> vector<8x128xf32>
    %236 = arith.select %233, %234, %235 : vector<8x128xi1>, vector<8x128xf32>
    %237 = arith.mulf %210, %199 : vector<8x128xf32>
    %238 = arith.mulf %217, %236 : vector<8x128xf32>
    %239 = arith.addf %237, %238 : vector<8x128xf32>
    %240 = arith.mulf %224, %236 : vector<8x128xf32>
    %241 = arith.mulf %229, %199 : vector<8x128xf32>
    %242 = arith.addf %240, %241 : vector<8x128xf32>
    %c64_i32_54 = arith.constant 64 : i32
    %243 = tpu.dynamic_rotate %242 by %c64_i32_54 dim 1 : vector<8x128xf32>, i32 -> vector<8x128xf32>
    %244 = arith.mulf %37, %243 : vector<8x128xf32>
    %245 = arith.addf %239, %244 : vector<8x128xf32>
    %c4_i32_55 = arith.constant 4 : i32
    %246 = vector.broadcast %c4_i32_55 : i32 to vector<8x128xi32>
    %247 = arith.andi %32, %246 : vector<8x128xi32>
    %c0_i32_56 = arith.constant 0 : i32
    %248 = vector.broadcast %c0_i32_56 : i32 to vector<8x128xi32>
    %249 = arith.cmpi ne, %247, %248 : vector<8x128xi32>
    %c4_i32_57 = arith.constant 4 : i32
    %250 = tpu.dynamic_rotate %245 by %c4_i32_57 dim 1 : vector<8x128xf32>, i32 -> vector<8x128xf32>
    %c124_i32_58 = arith.constant 124 : i32
    %251 = tpu.dynamic_rotate %245 by %c124_i32_58 dim 1 : vector<8x128xf32>, i32 -> vector<8x128xf32>
    %252 = arith.select %249, %250, %251 : vector<8x128xi1>, vector<8x128xf32>
    %c2_i32 = arith.constant 2 : i32
    %253 = vector.broadcast %c2_i32 : i32 to vector<8x128xi32>
    %254 = arith.andi %32, %253 : vector<8x128xi32>
    %c0_i32_59 = arith.constant 0 : i32
    %255 = vector.broadcast %c0_i32_59 : i32 to vector<8x128xi32>
    %256 = arith.cmpi ne, %254, %255 : vector<8x128xi32>
    %c2_i32_60 = arith.constant 2 : i32
    %257 = tpu.dynamic_rotate %252 by %c2_i32_60 dim 1 : vector<8x128xf32>, i32 -> vector<8x128xf32>
    %c126_i32_61 = arith.constant 126 : i32
    %258 = tpu.dynamic_rotate %252 by %c126_i32_61 dim 1 : vector<8x128xf32>, i32 -> vector<8x128xf32>
    %259 = arith.select %256, %257, %258 : vector<8x128xi1>, vector<8x128xf32>
    %260 = vector.extract_strided_slice %10 {offsets = [0, 12], sizes = [8, 1], strides = [1, 1]} : vector<8x128xf32> to vector<8x1xf32>
    %261 = vector.broadcast %260 : vector<8x1xf32> to vector<8x128xf32>
    %262 = arith.mulf %261, %245 : vector<8x128xf32>
    %263 = vector.extract_strided_slice %13 {offsets = [0, 12], sizes = [8, 1], strides = [1, 1]} : vector<8x128xf32> to vector<8x1xf32>
    %264 = vector.broadcast %263 : vector<8x1xf32> to vector<8x128xf32>
    %265 = arith.mulf %264, %259 : vector<8x128xf32>
    %c64_i32_62 = arith.constant 64 : i32
    %266 = tpu.dynamic_rotate %265 by %c64_i32_62 dim 1 : vector<8x128xf32>, i32 -> vector<8x128xf32>
    %267 = arith.mulf %37, %266 : vector<8x128xf32>
    %268 = arith.subf %262, %267 : vector<8x128xf32>
    %c4_i32_63 = arith.constant 4 : i32
    %269 = vector.broadcast %c4_i32_63 : i32 to vector<8x128xi32>
    %270 = arith.andi %32, %269 : vector<8x128xi32>
    %c0_i32_64 = arith.constant 0 : i32
    %271 = vector.broadcast %c0_i32_64 : i32 to vector<8x128xi32>
    %272 = arith.cmpi ne, %270, %271 : vector<8x128xi32>
    %273 = vector.extract_strided_slice %30 {offsets = [0, 13], sizes = [8, 1], strides = [1, 1]} : vector<8x128xf32> to vector<8x1xf32>
    %274 = vector.extract_strided_slice %10 {offsets = [0, 13], sizes = [8, 1], strides = [1, 1]} : vector<8x128xf32> to vector<8x1xf32>
    %275 = vector.shape_cast %273 : vector<8x1xf32> to vector<8x1xf32>
    %276 = vector.broadcast %275 : vector<8x1xf32> to vector<8x128xf32>
    %277 = vector.shape_cast %274 : vector<8x1xf32> to vector<8x1xf32>
    %278 = vector.broadcast %277 : vector<8x1xf32> to vector<8x128xf32>
    %279 = arith.select %272, %276, %278 : vector<8x128xi1>, vector<8x128xf32>
    %280 = vector.extract_strided_slice %28 {offsets = [0, 13], sizes = [8, 1], strides = [1, 1]} : vector<8x128xf32> to vector<8x1xf32>
    %281 = vector.extract_strided_slice %24 {offsets = [0, 13], sizes = [8, 1], strides = [1, 1]} : vector<8x128xf32> to vector<8x1xf32>
    %282 = vector.shape_cast %280 : vector<8x1xf32> to vector<8x1xf32>
    %283 = vector.broadcast %282 : vector<8x1xf32> to vector<8x128xf32>
    %284 = vector.shape_cast %281 : vector<8x1xf32> to vector<8x1xf32>
    %285 = vector.broadcast %284 : vector<8x1xf32> to vector<8x128xf32>
    %286 = arith.select %272, %283, %285 : vector<8x128xi1>, vector<8x128xf32>
    %287 = vector.extract_strided_slice %29 {offsets = [0, 13], sizes = [8, 1], strides = [1, 1]} : vector<8x128xf32> to vector<8x1xf32>
    %288 = vector.extract_strided_slice %27 {offsets = [0, 13], sizes = [8, 1], strides = [1, 1]} : vector<8x128xf32> to vector<8x1xf32>
    %289 = vector.shape_cast %287 : vector<8x1xf32> to vector<8x1xf32>
    %290 = vector.broadcast %289 : vector<8x1xf32> to vector<8x128xf32>
    %291 = vector.shape_cast %288 : vector<8x1xf32> to vector<8x1xf32>
    %292 = vector.broadcast %291 : vector<8x1xf32> to vector<8x128xf32>
    %293 = arith.select %272, %290, %292 : vector<8x128xi1>, vector<8x128xf32>
    %294 = vector.extract_strided_slice %31 {offsets = [0, 13], sizes = [8, 1], strides = [1, 1]} : vector<8x128xf32> to vector<8x1xf32>
    %cst_65 = arith.constant 0.000000e+00 : f32
    %295 = vector.shape_cast %294 : vector<8x1xf32> to vector<8x1xf32>
    %296 = vector.broadcast %295 : vector<8x1xf32> to vector<8x128xf32>
    %297 = vector.broadcast %cst_65 : f32 to vector<8x128xf32>
    %298 = arith.select %272, %296, %297 : vector<8x128xi1>, vector<8x128xf32>
    %c4_i32_66 = arith.constant 4 : i32
    %299 = vector.broadcast %c4_i32_66 : i32 to vector<8x128xi32>
    %300 = arith.andi %32, %299 : vector<8x128xi32>
    %c0_i32_67 = arith.constant 0 : i32
    %301 = vector.broadcast %c0_i32_67 : i32 to vector<8x128xi32>
    %302 = arith.cmpi ne, %300, %301 : vector<8x128xi32>
    %c4_i32_68 = arith.constant 4 : i32
    %303 = tpu.dynamic_rotate %268 by %c4_i32_68 dim 1 : vector<8x128xf32>, i32 -> vector<8x128xf32>
    %c124_i32_69 = arith.constant 124 : i32
    %304 = tpu.dynamic_rotate %268 by %c124_i32_69 dim 1 : vector<8x128xf32>, i32 -> vector<8x128xf32>
    %305 = arith.select %302, %303, %304 : vector<8x128xi1>, vector<8x128xf32>
    %306 = arith.mulf %279, %268 : vector<8x128xf32>
    %307 = arith.mulf %286, %305 : vector<8x128xf32>
    %308 = arith.addf %306, %307 : vector<8x128xf32>
    %309 = arith.mulf %293, %305 : vector<8x128xf32>
    %310 = arith.mulf %298, %268 : vector<8x128xf32>
    %311 = arith.addf %309, %310 : vector<8x128xf32>
    %c64_i32_70 = arith.constant 64 : i32
    %312 = tpu.dynamic_rotate %311 by %c64_i32_70 dim 1 : vector<8x128xf32>, i32 -> vector<8x128xf32>
    %313 = arith.mulf %37, %312 : vector<8x128xf32>
    %314 = arith.addf %308, %313 : vector<8x128xf32>
    %c2_i32_71 = arith.constant 2 : i32
    %315 = vector.broadcast %c2_i32_71 : i32 to vector<8x128xi32>
    %316 = arith.andi %32, %315 : vector<8x128xi32>
    %c0_i32_72 = arith.constant 0 : i32
    %317 = vector.broadcast %c0_i32_72 : i32 to vector<8x128xi32>
    %318 = arith.cmpi ne, %316, %317 : vector<8x128xi32>
    %c2_i32_73 = arith.constant 2 : i32
    %319 = tpu.dynamic_rotate %314 by %c2_i32_73 dim 1 : vector<8x128xf32>, i32 -> vector<8x128xf32>
    %c126_i32_74 = arith.constant 126 : i32
    %320 = tpu.dynamic_rotate %314 by %c126_i32_74 dim 1 : vector<8x128xf32>, i32 -> vector<8x128xf32>
    %321 = arith.select %318, %319, %320 : vector<8x128xi1>, vector<8x128xf32>
    %c1_i32 = arith.constant 1 : i32
    %322 = vector.broadcast %c1_i32 : i32 to vector<8x128xi32>
    %323 = arith.andi %32, %322 : vector<8x128xi32>
    %c0_i32_75 = arith.constant 0 : i32
    %324 = vector.broadcast %c0_i32_75 : i32 to vector<8x128xi32>
    %325 = arith.cmpi ne, %323, %324 : vector<8x128xi32>
    %c1_i32_76 = arith.constant 1 : i32
    %326 = tpu.dynamic_rotate %321 by %c1_i32_76 dim 1 : vector<8x128xf32>, i32 -> vector<8x128xf32>
    %c127_i32_77 = arith.constant 127 : i32
    %327 = tpu.dynamic_rotate %321 by %c127_i32_77 dim 1 : vector<8x128xf32>, i32 -> vector<8x128xf32>
    %328 = arith.select %325, %326, %327 : vector<8x128xi1>, vector<8x128xf32>
    %329 = vector.extract_strided_slice %10 {offsets = [0, 16], sizes = [8, 1], strides = [1, 1]} : vector<8x128xf32> to vector<8x1xf32>
    %330 = vector.broadcast %329 : vector<8x1xf32> to vector<8x128xf32>
    %331 = arith.mulf %330, %314 : vector<8x128xf32>
    %332 = vector.extract_strided_slice %13 {offsets = [0, 16], sizes = [8, 1], strides = [1, 1]} : vector<8x128xf32> to vector<8x1xf32>
    %333 = vector.broadcast %332 : vector<8x1xf32> to vector<8x128xf32>
    %334 = arith.mulf %333, %328 : vector<8x128xf32>
    %c64_i32_78 = arith.constant 64 : i32
    %335 = tpu.dynamic_rotate %334 by %c64_i32_78 dim 1 : vector<8x128xf32>, i32 -> vector<8x128xf32>
    %336 = arith.mulf %37, %335 : vector<8x128xf32>
    %337 = arith.subf %331, %336 : vector<8x128xf32>
    %c2_i32_79 = arith.constant 2 : i32
    %338 = vector.broadcast %c2_i32_79 : i32 to vector<8x128xi32>
    %339 = arith.andi %32, %338 : vector<8x128xi32>
    %c0_i32_80 = arith.constant 0 : i32
    %340 = vector.broadcast %c0_i32_80 : i32 to vector<8x128xi32>
    %341 = arith.cmpi ne, %339, %340 : vector<8x128xi32>
    %342 = vector.extract_strided_slice %30 {offsets = [0, 17], sizes = [8, 1], strides = [1, 1]} : vector<8x128xf32> to vector<8x1xf32>
    %343 = vector.extract_strided_slice %10 {offsets = [0, 17], sizes = [8, 1], strides = [1, 1]} : vector<8x128xf32> to vector<8x1xf32>
    %344 = vector.shape_cast %342 : vector<8x1xf32> to vector<8x1xf32>
    %345 = vector.broadcast %344 : vector<8x1xf32> to vector<8x128xf32>
    %346 = vector.shape_cast %343 : vector<8x1xf32> to vector<8x1xf32>
    %347 = vector.broadcast %346 : vector<8x1xf32> to vector<8x128xf32>
    %348 = arith.select %341, %345, %347 : vector<8x128xi1>, vector<8x128xf32>
    %349 = vector.extract_strided_slice %28 {offsets = [0, 17], sizes = [8, 1], strides = [1, 1]} : vector<8x128xf32> to vector<8x1xf32>
    %350 = vector.extract_strided_slice %24 {offsets = [0, 17], sizes = [8, 1], strides = [1, 1]} : vector<8x128xf32> to vector<8x1xf32>
    %351 = vector.shape_cast %349 : vector<8x1xf32> to vector<8x1xf32>
    %352 = vector.broadcast %351 : vector<8x1xf32> to vector<8x128xf32>
    %353 = vector.shape_cast %350 : vector<8x1xf32> to vector<8x1xf32>
    %354 = vector.broadcast %353 : vector<8x1xf32> to vector<8x128xf32>
    %355 = arith.select %341, %352, %354 : vector<8x128xi1>, vector<8x128xf32>
    %356 = vector.extract_strided_slice %29 {offsets = [0, 17], sizes = [8, 1], strides = [1, 1]} : vector<8x128xf32> to vector<8x1xf32>
    %357 = vector.extract_strided_slice %27 {offsets = [0, 17], sizes = [8, 1], strides = [1, 1]} : vector<8x128xf32> to vector<8x1xf32>
    %358 = vector.shape_cast %356 : vector<8x1xf32> to vector<8x1xf32>
    %359 = vector.broadcast %358 : vector<8x1xf32> to vector<8x128xf32>
    %360 = vector.shape_cast %357 : vector<8x1xf32> to vector<8x1xf32>
    %361 = vector.broadcast %360 : vector<8x1xf32> to vector<8x128xf32>
    %362 = arith.select %341, %359, %361 : vector<8x128xi1>, vector<8x128xf32>
    %363 = vector.extract_strided_slice %31 {offsets = [0, 17], sizes = [8, 1], strides = [1, 1]} : vector<8x128xf32> to vector<8x1xf32>
    %cst_81 = arith.constant 0.000000e+00 : f32
    %364 = vector.shape_cast %363 : vector<8x1xf32> to vector<8x1xf32>
    %365 = vector.broadcast %364 : vector<8x1xf32> to vector<8x128xf32>
    %366 = vector.broadcast %cst_81 : f32 to vector<8x128xf32>
    %367 = arith.select %341, %365, %366 : vector<8x128xi1>, vector<8x128xf32>
    %c2_i32_82 = arith.constant 2 : i32
    %368 = vector.broadcast %c2_i32_82 : i32 to vector<8x128xi32>
    %369 = arith.andi %32, %368 : vector<8x128xi32>
    %c0_i32_83 = arith.constant 0 : i32
    %370 = vector.broadcast %c0_i32_83 : i32 to vector<8x128xi32>
    %371 = arith.cmpi ne, %369, %370 : vector<8x128xi32>
    %c2_i32_84 = arith.constant 2 : i32
    %372 = tpu.dynamic_rotate %337 by %c2_i32_84 dim 1 : vector<8x128xf32>, i32 -> vector<8x128xf32>
    %c126_i32_85 = arith.constant 126 : i32
    %373 = tpu.dynamic_rotate %337 by %c126_i32_85 dim 1 : vector<8x128xf32>, i32 -> vector<8x128xf32>
    %374 = arith.select %371, %372, %373 : vector<8x128xi1>, vector<8x128xf32>
    %375 = arith.mulf %348, %337 : vector<8x128xf32>
    %376 = arith.mulf %355, %374 : vector<8x128xf32>
    %377 = arith.addf %375, %376 : vector<8x128xf32>
    %378 = arith.mulf %362, %374 : vector<8x128xf32>
    %379 = arith.mulf %367, %337 : vector<8x128xf32>
    %380 = arith.addf %378, %379 : vector<8x128xf32>
    %c64_i32_86 = arith.constant 64 : i32
    %381 = tpu.dynamic_rotate %380 by %c64_i32_86 dim 1 : vector<8x128xf32>, i32 -> vector<8x128xf32>
    %382 = arith.mulf %37, %381 : vector<8x128xf32>
    %383 = arith.addf %377, %382 : vector<8x128xf32>
    %c1_i32_87 = arith.constant 1 : i32
    %384 = vector.broadcast %c1_i32_87 : i32 to vector<8x128xi32>
    %385 = arith.andi %32, %384 : vector<8x128xi32>
    %c0_i32_88 = arith.constant 0 : i32
    %386 = vector.broadcast %c0_i32_88 : i32 to vector<8x128xi32>
    %387 = arith.cmpi ne, %385, %386 : vector<8x128xi32>
    %388 = vector.extract_strided_slice %30 {offsets = [0, 20], sizes = [8, 1], strides = [1, 1]} : vector<8x128xf32> to vector<8x1xf32>
    %389 = vector.extract_strided_slice %10 {offsets = [0, 20], sizes = [8, 1], strides = [1, 1]} : vector<8x128xf32> to vector<8x1xf32>
    %390 = vector.shape_cast %388 : vector<8x1xf32> to vector<8x1xf32>
    %391 = vector.broadcast %390 : vector<8x1xf32> to vector<8x128xf32>
    %392 = vector.shape_cast %389 : vector<8x1xf32> to vector<8x1xf32>
    %393 = vector.broadcast %392 : vector<8x1xf32> to vector<8x128xf32>
    %394 = arith.select %387, %391, %393 : vector<8x128xi1>, vector<8x128xf32>
    %395 = vector.extract_strided_slice %28 {offsets = [0, 20], sizes = [8, 1], strides = [1, 1]} : vector<8x128xf32> to vector<8x1xf32>
    %396 = vector.extract_strided_slice %24 {offsets = [0, 20], sizes = [8, 1], strides = [1, 1]} : vector<8x128xf32> to vector<8x1xf32>
    %397 = vector.shape_cast %395 : vector<8x1xf32> to vector<8x1xf32>
    %398 = vector.broadcast %397 : vector<8x1xf32> to vector<8x128xf32>
    %399 = vector.shape_cast %396 : vector<8x1xf32> to vector<8x1xf32>
    %400 = vector.broadcast %399 : vector<8x1xf32> to vector<8x128xf32>
    %401 = arith.select %387, %398, %400 : vector<8x128xi1>, vector<8x128xf32>
    %402 = vector.extract_strided_slice %29 {offsets = [0, 20], sizes = [8, 1], strides = [1, 1]} : vector<8x128xf32> to vector<8x1xf32>
    %403 = vector.extract_strided_slice %27 {offsets = [0, 20], sizes = [8, 1], strides = [1, 1]} : vector<8x128xf32> to vector<8x1xf32>
    %404 = vector.shape_cast %402 : vector<8x1xf32> to vector<8x1xf32>
    %405 = vector.broadcast %404 : vector<8x1xf32> to vector<8x128xf32>
    %406 = vector.shape_cast %403 : vector<8x1xf32> to vector<8x1xf32>
    %407 = vector.broadcast %406 : vector<8x1xf32> to vector<8x128xf32>
    %408 = arith.select %387, %405, %407 : vector<8x128xi1>, vector<8x128xf32>
    %409 = vector.extract_strided_slice %31 {offsets = [0, 20], sizes = [8, 1], strides = [1, 1]} : vector<8x128xf32> to vector<8x1xf32>
    %cst_89 = arith.constant 0.000000e+00 : f32
    %410 = vector.shape_cast %409 : vector<8x1xf32> to vector<8x1xf32>
    %411 = vector.broadcast %410 : vector<8x1xf32> to vector<8x128xf32>
    %412 = vector.broadcast %cst_89 : f32 to vector<8x128xf32>
    %413 = arith.select %387, %411, %412 : vector<8x128xi1>, vector<8x128xf32>
    %c1_i32_90 = arith.constant 1 : i32
    %414 = vector.broadcast %c1_i32_90 : i32 to vector<8x128xi32>
    %415 = arith.andi %32, %414 : vector<8x128xi32>
    %c0_i32_91 = arith.constant 0 : i32
    %416 = vector.broadcast %c0_i32_91 : i32 to vector<8x128xi32>
    %417 = arith.cmpi ne, %415, %416 : vector<8x128xi32>
    %c1_i32_92 = arith.constant 1 : i32
    %418 = tpu.dynamic_rotate %383 by %c1_i32_92 dim 1 : vector<8x128xf32>, i32 -> vector<8x128xf32>
    %c127_i32_93 = arith.constant 127 : i32
    %419 = tpu.dynamic_rotate %383 by %c127_i32_93 dim 1 : vector<8x128xf32>, i32 -> vector<8x128xf32>
    %420 = arith.select %417, %418, %419 : vector<8x128xi1>, vector<8x128xf32>
    %421 = arith.mulf %394, %383 : vector<8x128xf32>
    %422 = arith.mulf %401, %420 : vector<8x128xf32>
    %423 = arith.addf %421, %422 : vector<8x128xf32>
    %424 = arith.mulf %408, %420 : vector<8x128xf32>
    %425 = arith.mulf %413, %383 : vector<8x128xf32>
    %426 = arith.addf %424, %425 : vector<8x128xf32>
    %c64_i32_94 = arith.constant 64 : i32
    %427 = tpu.dynamic_rotate %426 by %c64_i32_94 dim 1 : vector<8x128xf32>, i32 -> vector<8x128xf32>
    %428 = arith.mulf %37, %427 : vector<8x128xf32>
    %429 = arith.addf %423, %428 : vector<8x128xf32>
    %c32_i32_95 = arith.constant 32 : i32
    %430 = vector.broadcast %c32_i32_95 : i32 to vector<8x128xi32>
    %431 = arith.andi %32, %430 : vector<8x128xi32>
    %c0_i32_96 = arith.constant 0 : i32
    %432 = vector.broadcast %c0_i32_96 : i32 to vector<8x128xi32>
    %433 = arith.cmpi ne, %431, %432 : vector<8x128xi32>
    %c32_i32_97 = arith.constant 32 : i32
    %434 = tpu.dynamic_rotate %429 by %c32_i32_97 dim 1 : vector<8x128xf32>, i32 -> vector<8x128xf32>
    %c96_i32_98 = arith.constant 96 : i32
    %435 = tpu.dynamic_rotate %429 by %c96_i32_98 dim 1 : vector<8x128xf32>, i32 -> vector<8x128xf32>
    %436 = arith.select %433, %434, %435 : vector<8x128xi1>, vector<8x128xf32>
    %c16_i32_99 = arith.constant 16 : i32
    %437 = vector.broadcast %c16_i32_99 : i32 to vector<8x128xi32>
    %438 = arith.andi %32, %437 : vector<8x128xi32>
    %c0_i32_100 = arith.constant 0 : i32
    %439 = vector.broadcast %c0_i32_100 : i32 to vector<8x128xi32>
    %440 = arith.cmpi ne, %438, %439 : vector<8x128xi32>
    %c16_i32_101 = arith.constant 16 : i32
    %441 = tpu.dynamic_rotate %436 by %c16_i32_101 dim 1 : vector<8x128xf32>, i32 -> vector<8x128xf32>
    %c112_i32_102 = arith.constant 112 : i32
    %442 = tpu.dynamic_rotate %436 by %c112_i32_102 dim 1 : vector<8x128xf32>, i32 -> vector<8x128xf32>
    %443 = arith.select %440, %441, %442 : vector<8x128xi1>, vector<8x128xf32>
    %444 = vector.extract_strided_slice %10 {offsets = [0, 23], sizes = [8, 1], strides = [1, 1]} : vector<8x128xf32> to vector<8x1xf32>
    %445 = vector.broadcast %444 : vector<8x1xf32> to vector<8x128xf32>
    %446 = arith.mulf %445, %429 : vector<8x128xf32>
    %447 = vector.extract_strided_slice %13 {offsets = [0, 23], sizes = [8, 1], strides = [1, 1]} : vector<8x128xf32> to vector<8x1xf32>
    %448 = vector.broadcast %447 : vector<8x1xf32> to vector<8x128xf32>
    %449 = arith.mulf %448, %443 : vector<8x128xf32>
    %c64_i32_103 = arith.constant 64 : i32
    %450 = tpu.dynamic_rotate %449 by %c64_i32_103 dim 1 : vector<8x128xf32>, i32 -> vector<8x128xf32>
    %451 = arith.mulf %37, %450 : vector<8x128xf32>
    %452 = arith.subf %446, %451 : vector<8x128xf32>
    %c32_i32_104 = arith.constant 32 : i32
    %453 = vector.broadcast %c32_i32_104 : i32 to vector<8x128xi32>
    %454 = arith.andi %32, %453 : vector<8x128xi32>
    %c0_i32_105 = arith.constant 0 : i32
    %455 = vector.broadcast %c0_i32_105 : i32 to vector<8x128xi32>
    %456 = arith.cmpi ne, %454, %455 : vector<8x128xi32>
    %457 = vector.extract_strided_slice %30 {offsets = [0, 24], sizes = [8, 1], strides = [1, 1]} : vector<8x128xf32> to vector<8x1xf32>
    %458 = vector.extract_strided_slice %10 {offsets = [0, 24], sizes = [8, 1], strides = [1, 1]} : vector<8x128xf32> to vector<8x1xf32>
    %459 = vector.shape_cast %457 : vector<8x1xf32> to vector<8x1xf32>
    %460 = vector.broadcast %459 : vector<8x1xf32> to vector<8x128xf32>
    %461 = vector.shape_cast %458 : vector<8x1xf32> to vector<8x1xf32>
    %462 = vector.broadcast %461 : vector<8x1xf32> to vector<8x128xf32>
    %463 = arith.select %456, %460, %462 : vector<8x128xi1>, vector<8x128xf32>
    %464 = vector.extract_strided_slice %28 {offsets = [0, 24], sizes = [8, 1], strides = [1, 1]} : vector<8x128xf32> to vector<8x1xf32>
    %465 = vector.extract_strided_slice %24 {offsets = [0, 24], sizes = [8, 1], strides = [1, 1]} : vector<8x128xf32> to vector<8x1xf32>
    %466 = vector.shape_cast %464 : vector<8x1xf32> to vector<8x1xf32>
    %467 = vector.broadcast %466 : vector<8x1xf32> to vector<8x128xf32>
    %468 = vector.shape_cast %465 : vector<8x1xf32> to vector<8x1xf32>
    %469 = vector.broadcast %468 : vector<8x1xf32> to vector<8x128xf32>
    %470 = arith.select %456, %467, %469 : vector<8x128xi1>, vector<8x128xf32>
    %471 = vector.extract_strided_slice %29 {offsets = [0, 24], sizes = [8, 1], strides = [1, 1]} : vector<8x128xf32> to vector<8x1xf32>
    %472 = vector.extract_strided_slice %27 {offsets = [0, 24], sizes = [8, 1], strides = [1, 1]} : vector<8x128xf32> to vector<8x1xf32>
    %473 = vector.shape_cast %471 : vector<8x1xf32> to vector<8x1xf32>
    %474 = vector.broadcast %473 : vector<8x1xf32> to vector<8x128xf32>
    %475 = vector.shape_cast %472 : vector<8x1xf32> to vector<8x1xf32>
    %476 = vector.broadcast %475 : vector<8x1xf32> to vector<8x128xf32>
    %477 = arith.select %456, %474, %476 : vector<8x128xi1>, vector<8x128xf32>
    %478 = vector.extract_strided_slice %31 {offsets = [0, 24], sizes = [8, 1], strides = [1, 1]} : vector<8x128xf32> to vector<8x1xf32>
    %cst_106 = arith.constant 0.000000e+00 : f32
    %479 = vector.shape_cast %478 : vector<8x1xf32> to vector<8x1xf32>
    %480 = vector.broadcast %479 : vector<8x1xf32> to vector<8x128xf32>
    %481 = vector.broadcast %cst_106 : f32 to vector<8x128xf32>
    %482 = arith.select %456, %480, %481 : vector<8x128xi1>, vector<8x128xf32>
    %c32_i32_107 = arith.constant 32 : i32
    %483 = vector.broadcast %c32_i32_107 : i32 to vector<8x128xi32>
    %484 = arith.andi %32, %483 : vector<8x128xi32>
    %c0_i32_108 = arith.constant 0 : i32
    %485 = vector.broadcast %c0_i32_108 : i32 to vector<8x128xi32>
    %486 = arith.cmpi ne, %484, %485 : vector<8x128xi32>
    %c32_i32_109 = arith.constant 32 : i32
    %487 = tpu.dynamic_rotate %452 by %c32_i32_109 dim 1 : vector<8x128xf32>, i32 -> vector<8x128xf32>
    %c96_i32_110 = arith.constant 96 : i32
    %488 = tpu.dynamic_rotate %452 by %c96_i32_110 dim 1 : vector<8x128xf32>, i32 -> vector<8x128xf32>
    %489 = arith.select %486, %487, %488 : vector<8x128xi1>, vector<8x128xf32>
    %490 = arith.mulf %463, %452 : vector<8x128xf32>
    %491 = arith.mulf %470, %489 : vector<8x128xf32>
    %492 = arith.addf %490, %491 : vector<8x128xf32>
    %493 = arith.mulf %477, %489 : vector<8x128xf32>
    %494 = arith.mulf %482, %452 : vector<8x128xf32>
    %495 = arith.addf %493, %494 : vector<8x128xf32>
    %c64_i32_111 = arith.constant 64 : i32
    %496 = tpu.dynamic_rotate %495 by %c64_i32_111 dim 1 : vector<8x128xf32>, i32 -> vector<8x128xf32>
    %497 = arith.mulf %37, %496 : vector<8x128xf32>
    %498 = arith.addf %492, %497 : vector<8x128xf32>
    %c16_i32_112 = arith.constant 16 : i32
    %499 = vector.broadcast %c16_i32_112 : i32 to vector<8x128xi32>
    %500 = arith.andi %32, %499 : vector<8x128xi32>
    %c0_i32_113 = arith.constant 0 : i32
    %501 = vector.broadcast %c0_i32_113 : i32 to vector<8x128xi32>
    %502 = arith.cmpi ne, %500, %501 : vector<8x128xi32>
    %c16_i32_114 = arith.constant 16 : i32
    %503 = tpu.dynamic_rotate %498 by %c16_i32_114 dim 1 : vector<8x128xf32>, i32 -> vector<8x128xf32>
    %c112_i32_115 = arith.constant 112 : i32
    %504 = tpu.dynamic_rotate %498 by %c112_i32_115 dim 1 : vector<8x128xf32>, i32 -> vector<8x128xf32>
    %505 = arith.select %502, %503, %504 : vector<8x128xi1>, vector<8x128xf32>
    %c8_i32_116 = arith.constant 8 : i32
    %506 = vector.broadcast %c8_i32_116 : i32 to vector<8x128xi32>
    %507 = arith.andi %32, %506 : vector<8x128xi32>
    %c0_i32_117 = arith.constant 0 : i32
    %508 = vector.broadcast %c0_i32_117 : i32 to vector<8x128xi32>
    %509 = arith.cmpi ne, %507, %508 : vector<8x128xi32>
    %c8_i32_118 = arith.constant 8 : i32
    %510 = tpu.dynamic_rotate %505 by %c8_i32_118 dim 1 : vector<8x128xf32>, i32 -> vector<8x128xf32>
    %c120_i32_119 = arith.constant 120 : i32
    %511 = tpu.dynamic_rotate %505 by %c120_i32_119 dim 1 : vector<8x128xf32>, i32 -> vector<8x128xf32>
    %512 = arith.select %509, %510, %511 : vector<8x128xi1>, vector<8x128xf32>
    %513 = vector.extract_strided_slice %10 {offsets = [0, 27], sizes = [8, 1], strides = [1, 1]} : vector<8x128xf32> to vector<8x1xf32>
    %514 = vector.broadcast %513 : vector<8x1xf32> to vector<8x128xf32>
    %515 = arith.mulf %514, %498 : vector<8x128xf32>
    %516 = vector.extract_strided_slice %13 {offsets = [0, 27], sizes = [8, 1], strides = [1, 1]} : vector<8x128xf32> to vector<8x1xf32>
    %517 = vector.broadcast %516 : vector<8x1xf32> to vector<8x128xf32>
    %518 = arith.mulf %517, %512 : vector<8x128xf32>
    %c64_i32_120 = arith.constant 64 : i32
    %519 = tpu.dynamic_rotate %518 by %c64_i32_120 dim 1 : vector<8x128xf32>, i32 -> vector<8x128xf32>
    %520 = arith.mulf %37, %519 : vector<8x128xf32>
    %521 = arith.subf %515, %520 : vector<8x128xf32>
    %c16_i32_121 = arith.constant 16 : i32
    %522 = vector.broadcast %c16_i32_121 : i32 to vector<8x128xi32>
    %523 = arith.andi %32, %522 : vector<8x128xi32>
    %c0_i32_122 = arith.constant 0 : i32
    %524 = vector.broadcast %c0_i32_122 : i32 to vector<8x128xi32>
    %525 = arith.cmpi ne, %523, %524 : vector<8x128xi32>
    %526 = vector.extract_strided_slice %30 {offsets = [0, 28], sizes = [8, 1], strides = [1, 1]} : vector<8x128xf32> to vector<8x1xf32>
    %527 = vector.extract_strided_slice %10 {offsets = [0, 28], sizes = [8, 1], strides = [1, 1]} : vector<8x128xf32> to vector<8x1xf32>
    %528 = vector.shape_cast %526 : vector<8x1xf32> to vector<8x1xf32>
    %529 = vector.broadcast %528 : vector<8x1xf32> to vector<8x128xf32>
    %530 = vector.shape_cast %527 : vector<8x1xf32> to vector<8x1xf32>
    %531 = vector.broadcast %530 : vector<8x1xf32> to vector<8x128xf32>
    %532 = arith.select %525, %529, %531 : vector<8x128xi1>, vector<8x128xf32>
    %533 = vector.extract_strided_slice %28 {offsets = [0, 28], sizes = [8, 1], strides = [1, 1]} : vector<8x128xf32> to vector<8x1xf32>
    %534 = vector.extract_strided_slice %24 {offsets = [0, 28], sizes = [8, 1], strides = [1, 1]} : vector<8x128xf32> to vector<8x1xf32>
    %535 = vector.shape_cast %533 : vector<8x1xf32> to vector<8x1xf32>
    %536 = vector.broadcast %535 : vector<8x1xf32> to vector<8x128xf32>
    %537 = vector.shape_cast %534 : vector<8x1xf32> to vector<8x1xf32>
    %538 = vector.broadcast %537 : vector<8x1xf32> to vector<8x128xf32>
    %539 = arith.select %525, %536, %538 : vector<8x128xi1>, vector<8x128xf32>
    %540 = vector.extract_strided_slice %29 {offsets = [0, 28], sizes = [8, 1], strides = [1, 1]} : vector<8x128xf32> to vector<8x1xf32>
    %541 = vector.extract_strided_slice %27 {offsets = [0, 28], sizes = [8, 1], strides = [1, 1]} : vector<8x128xf32> to vector<8x1xf32>
    %542 = vector.shape_cast %540 : vector<8x1xf32> to vector<8x1xf32>
    %543 = vector.broadcast %542 : vector<8x1xf32> to vector<8x128xf32>
    %544 = vector.shape_cast %541 : vector<8x1xf32> to vector<8x1xf32>
    %545 = vector.broadcast %544 : vector<8x1xf32> to vector<8x128xf32>
    %546 = arith.select %525, %543, %545 : vector<8x128xi1>, vector<8x128xf32>
    %547 = vector.extract_strided_slice %31 {offsets = [0, 28], sizes = [8, 1], strides = [1, 1]} : vector<8x128xf32> to vector<8x1xf32>
    %cst_123 = arith.constant 0.000000e+00 : f32
    %548 = vector.shape_cast %547 : vector<8x1xf32> to vector<8x1xf32>
    %549 = vector.broadcast %548 : vector<8x1xf32> to vector<8x128xf32>
    %550 = vector.broadcast %cst_123 : f32 to vector<8x128xf32>
    %551 = arith.select %525, %549, %550 : vector<8x128xi1>, vector<8x128xf32>
    %c16_i32_124 = arith.constant 16 : i32
    %552 = vector.broadcast %c16_i32_124 : i32 to vector<8x128xi32>
    %553 = arith.andi %32, %552 : vector<8x128xi32>
    %c0_i32_125 = arith.constant 0 : i32
    %554 = vector.broadcast %c0_i32_125 : i32 to vector<8x128xi32>
    %555 = arith.cmpi ne, %553, %554 : vector<8x128xi32>
    %c16_i32_126 = arith.constant 16 : i32
    %556 = tpu.dynamic_rotate %521 by %c16_i32_126 dim 1 : vector<8x128xf32>, i32 -> vector<8x128xf32>
    %c112_i32_127 = arith.constant 112 : i32
    %557 = tpu.dynamic_rotate %521 by %c112_i32_127 dim 1 : vector<8x128xf32>, i32 -> vector<8x128xf32>
    %558 = arith.select %555, %556, %557 : vector<8x128xi1>, vector<8x128xf32>
    %559 = arith.mulf %532, %521 : vector<8x128xf32>
    %560 = arith.mulf %539, %558 : vector<8x128xf32>
    %561 = arith.addf %559, %560 : vector<8x128xf32>
    %562 = arith.mulf %546, %558 : vector<8x128xf32>
    %563 = arith.mulf %551, %521 : vector<8x128xf32>
    %564 = arith.addf %562, %563 : vector<8x128xf32>
    %c64_i32_128 = arith.constant 64 : i32
    %565 = tpu.dynamic_rotate %564 by %c64_i32_128 dim 1 : vector<8x128xf32>, i32 -> vector<8x128xf32>
    %566 = arith.mulf %37, %565 : vector<8x128xf32>
    %567 = arith.addf %561, %566 : vector<8x128xf32>
    %c8_i32_129 = arith.constant 8 : i32
    %568 = vector.broadcast %c8_i32_129 : i32 to vector<8x128xi32>
    %569 = arith.andi %32, %568 : vector<8x128xi32>
    %c0_i32_130 = arith.constant 0 : i32
    %570 = vector.broadcast %c0_i32_130 : i32 to vector<8x128xi32>
    %571 = arith.cmpi ne, %569, %570 : vector<8x128xi32>
    %c8_i32_131 = arith.constant 8 : i32
    %572 = tpu.dynamic_rotate %567 by %c8_i32_131 dim 1 : vector<8x128xf32>, i32 -> vector<8x128xf32>
    %c120_i32_132 = arith.constant 120 : i32
    %573 = tpu.dynamic_rotate %567 by %c120_i32_132 dim 1 : vector<8x128xf32>, i32 -> vector<8x128xf32>
    %574 = arith.select %571, %572, %573 : vector<8x128xi1>, vector<8x128xf32>
    %c4_i32_133 = arith.constant 4 : i32
    %575 = vector.broadcast %c4_i32_133 : i32 to vector<8x128xi32>
    %576 = arith.andi %32, %575 : vector<8x128xi32>
    %c0_i32_134 = arith.constant 0 : i32
    %577 = vector.broadcast %c0_i32_134 : i32 to vector<8x128xi32>
    %578 = arith.cmpi ne, %576, %577 : vector<8x128xi32>
    %c4_i32_135 = arith.constant 4 : i32
    %579 = tpu.dynamic_rotate %574 by %c4_i32_135 dim 1 : vector<8x128xf32>, i32 -> vector<8x128xf32>
    %c124_i32_136 = arith.constant 124 : i32
    %580 = tpu.dynamic_rotate %574 by %c124_i32_136 dim 1 : vector<8x128xf32>, i32 -> vector<8x128xf32>
    %581 = arith.select %578, %579, %580 : vector<8x128xi1>, vector<8x128xf32>
    %582 = vector.extract_strided_slice %10 {offsets = [0, 31], sizes = [8, 1], strides = [1, 1]} : vector<8x128xf32> to vector<8x1xf32>
    %583 = vector.broadcast %582 : vector<8x1xf32> to vector<8x128xf32>
    %584 = arith.mulf %583, %567 : vector<8x128xf32>
    %585 = vector.extract_strided_slice %13 {offsets = [0, 31], sizes = [8, 1], strides = [1, 1]} : vector<8x128xf32> to vector<8x1xf32>
    %586 = vector.broadcast %585 : vector<8x1xf32> to vector<8x128xf32>
    %587 = arith.mulf %586, %581 : vector<8x128xf32>
    %c64_i32_137 = arith.constant 64 : i32
    %588 = tpu.dynamic_rotate %587 by %c64_i32_137 dim 1 : vector<8x128xf32>, i32 -> vector<8x128xf32>
    %589 = arith.mulf %37, %588 : vector<8x128xf32>
    %590 = arith.subf %584, %589 : vector<8x128xf32>
    %c8_i32_138 = arith.constant 8 : i32
    %591 = vector.broadcast %c8_i32_138 : i32 to vector<8x128xi32>
    %592 = arith.andi %32, %591 : vector<8x128xi32>
    %c0_i32_139 = arith.constant 0 : i32
    %593 = vector.broadcast %c0_i32_139 : i32 to vector<8x128xi32>
    %594 = arith.cmpi ne, %592, %593 : vector<8x128xi32>
    %595 = vector.extract_strided_slice %30 {offsets = [0, 32], sizes = [8, 1], strides = [1, 1]} : vector<8x128xf32> to vector<8x1xf32>
    %596 = vector.extract_strided_slice %10 {offsets = [0, 32], sizes = [8, 1], strides = [1, 1]} : vector<8x128xf32> to vector<8x1xf32>
    %597 = vector.shape_cast %595 : vector<8x1xf32> to vector<8x1xf32>
    %598 = vector.broadcast %597 : vector<8x1xf32> to vector<8x128xf32>
    %599 = vector.shape_cast %596 : vector<8x1xf32> to vector<8x1xf32>
    %600 = vector.broadcast %599 : vector<8x1xf32> to vector<8x128xf32>
    %601 = arith.select %594, %598, %600 : vector<8x128xi1>, vector<8x128xf32>
    %602 = vector.extract_strided_slice %28 {offsets = [0, 32], sizes = [8, 1], strides = [1, 1]} : vector<8x128xf32> to vector<8x1xf32>
    %603 = vector.extract_strided_slice %24 {offsets = [0, 32], sizes = [8, 1], strides = [1, 1]} : vector<8x128xf32> to vector<8x1xf32>
    %604 = vector.shape_cast %602 : vector<8x1xf32> to vector<8x1xf32>
    %605 = vector.broadcast %604 : vector<8x1xf32> to vector<8x128xf32>
    %606 = vector.shape_cast %603 : vector<8x1xf32> to vector<8x1xf32>
    %607 = vector.broadcast %606 : vector<8x1xf32> to vector<8x128xf32>
    %608 = arith.select %594, %605, %607 : vector<8x128xi1>, vector<8x128xf32>
    %609 = vector.extract_strided_slice %29 {offsets = [0, 32], sizes = [8, 1], strides = [1, 1]} : vector<8x128xf32> to vector<8x1xf32>
    %610 = vector.extract_strided_slice %27 {offsets = [0, 32], sizes = [8, 1], strides = [1, 1]} : vector<8x128xf32> to vector<8x1xf32>
    %611 = vector.shape_cast %609 : vector<8x1xf32> to vector<8x1xf32>
    %612 = vector.broadcast %611 : vector<8x1xf32> to vector<8x128xf32>
    %613 = vector.shape_cast %610 : vector<8x1xf32> to vector<8x1xf32>
    %614 = vector.broadcast %613 : vector<8x1xf32> to vector<8x128xf32>
    %615 = arith.select %594, %612, %614 : vector<8x128xi1>, vector<8x128xf32>
    %616 = vector.extract_strided_slice %31 {offsets = [0, 32], sizes = [8, 1], strides = [1, 1]} : vector<8x128xf32> to vector<8x1xf32>
    %cst_140 = arith.constant 0.000000e+00 : f32
    %617 = vector.shape_cast %616 : vector<8x1xf32> to vector<8x1xf32>
    %618 = vector.broadcast %617 : vector<8x1xf32> to vector<8x128xf32>
    %619 = vector.broadcast %cst_140 : f32 to vector<8x128xf32>
    %620 = arith.select %594, %618, %619 : vector<8x128xi1>, vector<8x128xf32>
    %c8_i32_141 = arith.constant 8 : i32
    %621 = vector.broadcast %c8_i32_141 : i32 to vector<8x128xi32>
    %622 = arith.andi %32, %621 : vector<8x128xi32>
    %c0_i32_142 = arith.constant 0 : i32
    %623 = vector.broadcast %c0_i32_142 : i32 to vector<8x128xi32>
    %624 = arith.cmpi ne, %622, %623 : vector<8x128xi32>
    %c8_i32_143 = arith.constant 8 : i32
    %625 = tpu.dynamic_rotate %590 by %c8_i32_143 dim 1 : vector<8x128xf32>, i32 -> vector<8x128xf32>
    %c120_i32_144 = arith.constant 120 : i32
    %626 = tpu.dynamic_rotate %590 by %c120_i32_144 dim 1 : vector<8x128xf32>, i32 -> vector<8x128xf32>
    %627 = arith.select %624, %625, %626 : vector<8x128xi1>, vector<8x128xf32>
    %628 = arith.mulf %601, %590 : vector<8x128xf32>
    %629 = arith.mulf %608, %627 : vector<8x128xf32>
    %630 = arith.addf %628, %629 : vector<8x128xf32>
    %631 = arith.mulf %615, %627 : vector<8x128xf32>
    %632 = arith.mulf %620, %590 : vector<8x128xf32>
    %633 = arith.addf %631, %632 : vector<8x128xf32>
    %c64_i32_145 = arith.constant 64 : i32
    %634 = tpu.dynamic_rotate %633 by %c64_i32_145 dim 1 : vector<8x128xf32>, i32 -> vector<8x128xf32>
    %635 = arith.mulf %37, %634 : vector<8x128xf32>
    %636 = arith.addf %630, %635 : vector<8x128xf32>
    %c4_i32_146 = arith.constant 4 : i32
    %637 = vector.broadcast %c4_i32_146 : i32 to vector<8x128xi32>
    %638 = arith.andi %32, %637 : vector<8x128xi32>
    %c0_i32_147 = arith.constant 0 : i32
    %639 = vector.broadcast %c0_i32_147 : i32 to vector<8x128xi32>
    %640 = arith.cmpi ne, %638, %639 : vector<8x128xi32>
    %c4_i32_148 = arith.constant 4 : i32
    %641 = tpu.dynamic_rotate %636 by %c4_i32_148 dim 1 : vector<8x128xf32>, i32 -> vector<8x128xf32>
    %c124_i32_149 = arith.constant 124 : i32
    %642 = tpu.dynamic_rotate %636 by %c124_i32_149 dim 1 : vector<8x128xf32>, i32 -> vector<8x128xf32>
    %643 = arith.select %640, %641, %642 : vector<8x128xi1>, vector<8x128xf32>
    %c2_i32_150 = arith.constant 2 : i32
    %644 = vector.broadcast %c2_i32_150 : i32 to vector<8x128xi32>
    %645 = arith.andi %32, %644 : vector<8x128xi32>
    %c0_i32_151 = arith.constant 0 : i32
    %646 = vector.broadcast %c0_i32_151 : i32 to vector<8x128xi32>
    %647 = arith.cmpi ne, %645, %646 : vector<8x128xi32>
    %c2_i32_152 = arith.constant 2 : i32
    %648 = tpu.dynamic_rotate %643 by %c2_i32_152 dim 1 : vector<8x128xf32>, i32 -> vector<8x128xf32>
    %c126_i32_153 = arith.constant 126 : i32
    %649 = tpu.dynamic_rotate %643 by %c126_i32_153 dim 1 : vector<8x128xf32>, i32 -> vector<8x128xf32>
    %650 = arith.select %647, %648, %649 : vector<8x128xi1>, vector<8x128xf32>
    %651 = vector.extract_strided_slice %10 {offsets = [0, 35], sizes = [8, 1], strides = [1, 1]} : vector<8x128xf32> to vector<8x1xf32>
    %652 = vector.broadcast %651 : vector<8x1xf32> to vector<8x128xf32>
    %653 = arith.mulf %652, %636 : vector<8x128xf32>
    %654 = vector.extract_strided_slice %13 {offsets = [0, 35], sizes = [8, 1], strides = [1, 1]} : vector<8x128xf32> to vector<8x1xf32>
    %655 = vector.broadcast %654 : vector<8x1xf32> to vector<8x128xf32>
    %656 = arith.mulf %655, %650 : vector<8x128xf32>
    %c64_i32_154 = arith.constant 64 : i32
    %657 = tpu.dynamic_rotate %656 by %c64_i32_154 dim 1 : vector<8x128xf32>, i32 -> vector<8x128xf32>
    %658 = arith.mulf %37, %657 : vector<8x128xf32>
    %659 = arith.subf %653, %658 : vector<8x128xf32>
    %c4_i32_155 = arith.constant 4 : i32
    %660 = vector.broadcast %c4_i32_155 : i32 to vector<8x128xi32>
    %661 = arith.andi %32, %660 : vector<8x128xi32>
    %c0_i32_156 = arith.constant 0 : i32
    %662 = vector.broadcast %c0_i32_156 : i32 to vector<8x128xi32>
    %663 = arith.cmpi ne, %661, %662 : vector<8x128xi32>
    %664 = vector.extract_strided_slice %30 {offsets = [0, 36], sizes = [8, 1], strides = [1, 1]} : vector<8x128xf32> to vector<8x1xf32>
    %665 = vector.extract_strided_slice %10 {offsets = [0, 36], sizes = [8, 1], strides = [1, 1]} : vector<8x128xf32> to vector<8x1xf32>
    %666 = vector.shape_cast %664 : vector<8x1xf32> to vector<8x1xf32>
    %667 = vector.broadcast %666 : vector<8x1xf32> to vector<8x128xf32>
    %668 = vector.shape_cast %665 : vector<8x1xf32> to vector<8x1xf32>
    %669 = vector.broadcast %668 : vector<8x1xf32> to vector<8x128xf32>
    %670 = arith.select %663, %667, %669 : vector<8x128xi1>, vector<8x128xf32>
    %671 = vector.extract_strided_slice %28 {offsets = [0, 36], sizes = [8, 1], strides = [1, 1]} : vector<8x128xf32> to vector<8x1xf32>
    %672 = vector.extract_strided_slice %24 {offsets = [0, 36], sizes = [8, 1], strides = [1, 1]} : vector<8x128xf32> to vector<8x1xf32>
    %673 = vector.shape_cast %671 : vector<8x1xf32> to vector<8x1xf32>
    %674 = vector.broadcast %673 : vector<8x1xf32> to vector<8x128xf32>
    %675 = vector.shape_cast %672 : vector<8x1xf32> to vector<8x1xf32>
    %676 = vector.broadcast %675 : vector<8x1xf32> to vector<8x128xf32>
    %677 = arith.select %663, %674, %676 : vector<8x128xi1>, vector<8x128xf32>
    %678 = vector.extract_strided_slice %29 {offsets = [0, 36], sizes = [8, 1], strides = [1, 1]} : vector<8x128xf32> to vector<8x1xf32>
    %679 = vector.extract_strided_slice %27 {offsets = [0, 36], sizes = [8, 1], strides = [1, 1]} : vector<8x128xf32> to vector<8x1xf32>
    %680 = vector.shape_cast %678 : vector<8x1xf32> to vector<8x1xf32>
    %681 = vector.broadcast %680 : vector<8x1xf32> to vector<8x128xf32>
    %682 = vector.shape_cast %679 : vector<8x1xf32> to vector<8x1xf32>
    %683 = vector.broadcast %682 : vector<8x1xf32> to vector<8x128xf32>
    %684 = arith.select %663, %681, %683 : vector<8x128xi1>, vector<8x128xf32>
    %685 = vector.extract_strided_slice %31 {offsets = [0, 36], sizes = [8, 1], strides = [1, 1]} : vector<8x128xf32> to vector<8x1xf32>
    %cst_157 = arith.constant 0.000000e+00 : f32
    %686 = vector.shape_cast %685 : vector<8x1xf32> to vector<8x1xf32>
    %687 = vector.broadcast %686 : vector<8x1xf32> to vector<8x128xf32>
    %688 = vector.broadcast %cst_157 : f32 to vector<8x128xf32>
    %689 = arith.select %663, %687, %688 : vector<8x128xi1>, vector<8x128xf32>
    %c4_i32_158 = arith.constant 4 : i32
    %690 = vector.broadcast %c4_i32_158 : i32 to vector<8x128xi32>
    %691 = arith.andi %32, %690 : vector<8x128xi32>
    %c0_i32_159 = arith.constant 0 : i32
    %692 = vector.broadcast %c0_i32_159 : i32 to vector<8x128xi32>
    %693 = arith.cmpi ne, %691, %692 : vector<8x128xi32>
    %c4_i32_160 = arith.constant 4 : i32
    %694 = tpu.dynamic_rotate %659 by %c4_i32_160 dim 1 : vector<8x128xf32>, i32 -> vector<8x128xf32>
    %c124_i32_161 = arith.constant 124 : i32
    %695 = tpu.dynamic_rotate %659 by %c124_i32_161 dim 1 : vector<8x128xf32>, i32 -> vector<8x128xf32>
    %696 = arith.select %693, %694, %695 : vector<8x128xi1>, vector<8x128xf32>
    %697 = arith.mulf %670, %659 : vector<8x128xf32>
    %698 = arith.mulf %677, %696 : vector<8x128xf32>
    %699 = arith.addf %697, %698 : vector<8x128xf32>
    %700 = arith.mulf %684, %696 : vector<8x128xf32>
    %701 = arith.mulf %689, %659 : vector<8x128xf32>
    %702 = arith.addf %700, %701 : vector<8x128xf32>
    %c64_i32_162 = arith.constant 64 : i32
    %703 = tpu.dynamic_rotate %702 by %c64_i32_162 dim 1 : vector<8x128xf32>, i32 -> vector<8x128xf32>
    %704 = arith.mulf %37, %703 : vector<8x128xf32>
    %705 = arith.addf %699, %704 : vector<8x128xf32>
    %c2_i32_163 = arith.constant 2 : i32
    %706 = vector.broadcast %c2_i32_163 : i32 to vector<8x128xi32>
    %707 = arith.andi %32, %706 : vector<8x128xi32>
    %c0_i32_164 = arith.constant 0 : i32
    %708 = vector.broadcast %c0_i32_164 : i32 to vector<8x128xi32>
    %709 = arith.cmpi ne, %707, %708 : vector<8x128xi32>
    %c2_i32_165 = arith.constant 2 : i32
    %710 = tpu.dynamic_rotate %705 by %c2_i32_165 dim 1 : vector<8x128xf32>, i32 -> vector<8x128xf32>
    %c126_i32_166 = arith.constant 126 : i32
    %711 = tpu.dynamic_rotate %705 by %c126_i32_166 dim 1 : vector<8x128xf32>, i32 -> vector<8x128xf32>
    %712 = arith.select %709, %710, %711 : vector<8x128xi1>, vector<8x128xf32>
    %c1_i32_167 = arith.constant 1 : i32
    %713 = vector.broadcast %c1_i32_167 : i32 to vector<8x128xi32>
    %714 = arith.andi %32, %713 : vector<8x128xi32>
    %c0_i32_168 = arith.constant 0 : i32
    %715 = vector.broadcast %c0_i32_168 : i32 to vector<8x128xi32>
    %716 = arith.cmpi ne, %714, %715 : vector<8x128xi32>
    %c1_i32_169 = arith.constant 1 : i32
    %717 = tpu.dynamic_rotate %712 by %c1_i32_169 dim 1 : vector<8x128xf32>, i32 -> vector<8x128xf32>
    %c127_i32_170 = arith.constant 127 : i32
    %718 = tpu.dynamic_rotate %712 by %c127_i32_170 dim 1 : vector<8x128xf32>, i32 -> vector<8x128xf32>
    %719 = arith.select %716, %717, %718 : vector<8x128xi1>, vector<8x128xf32>
    %720 = vector.extract_strided_slice %10 {offsets = [0, 39], sizes = [8, 1], strides = [1, 1]} : vector<8x128xf32> to vector<8x1xf32>
    %721 = vector.broadcast %720 : vector<8x1xf32> to vector<8x128xf32>
    %722 = arith.mulf %721, %705 : vector<8x128xf32>
    %723 = vector.extract_strided_slice %13 {offsets = [0, 39], sizes = [8, 1], strides = [1, 1]} : vector<8x128xf32> to vector<8x1xf32>
    %724 = vector.broadcast %723 : vector<8x1xf32> to vector<8x128xf32>
    %725 = arith.mulf %724, %719 : vector<8x128xf32>
    %c64_i32_171 = arith.constant 64 : i32
    %726 = tpu.dynamic_rotate %725 by %c64_i32_171 dim 1 : vector<8x128xf32>, i32 -> vector<8x128xf32>
    %727 = arith.mulf %37, %726 : vector<8x128xf32>
    %728 = arith.subf %722, %727 : vector<8x128xf32>
    %c2_i32_172 = arith.constant 2 : i32
    %729 = vector.broadcast %c2_i32_172 : i32 to vector<8x128xi32>
    %730 = arith.andi %32, %729 : vector<8x128xi32>
    %c0_i32_173 = arith.constant 0 : i32
    %731 = vector.broadcast %c0_i32_173 : i32 to vector<8x128xi32>
    %732 = arith.cmpi ne, %730, %731 : vector<8x128xi32>
    %733 = vector.extract_strided_slice %30 {offsets = [0, 40], sizes = [8, 1], strides = [1, 1]} : vector<8x128xf32> to vector<8x1xf32>
    %734 = vector.extract_strided_slice %10 {offsets = [0, 40], sizes = [8, 1], strides = [1, 1]} : vector<8x128xf32> to vector<8x1xf32>
    %735 = vector.shape_cast %733 : vector<8x1xf32> to vector<8x1xf32>
    %736 = vector.broadcast %735 : vector<8x1xf32> to vector<8x128xf32>
    %737 = vector.shape_cast %734 : vector<8x1xf32> to vector<8x1xf32>
    %738 = vector.broadcast %737 : vector<8x1xf32> to vector<8x128xf32>
    %739 = arith.select %732, %736, %738 : vector<8x128xi1>, vector<8x128xf32>
    %740 = vector.extract_strided_slice %28 {offsets = [0, 40], sizes = [8, 1], strides = [1, 1]} : vector<8x128xf32> to vector<8x1xf32>
    %741 = vector.extract_strided_slice %24 {offsets = [0, 40], sizes = [8, 1], strides = [1, 1]} : vector<8x128xf32> to vector<8x1xf32>
    %742 = vector.shape_cast %740 : vector<8x1xf32> to vector<8x1xf32>
    %743 = vector.broadcast %742 : vector<8x1xf32> to vector<8x128xf32>
    %744 = vector.shape_cast %741 : vector<8x1xf32> to vector<8x1xf32>
    %745 = vector.broadcast %744 : vector<8x1xf32> to vector<8x128xf32>
    %746 = arith.select %732, %743, %745 : vector<8x128xi1>, vector<8x128xf32>
    %747 = vector.extract_strided_slice %29 {offsets = [0, 40], sizes = [8, 1], strides = [1, 1]} : vector<8x128xf32> to vector<8x1xf32>
    %748 = vector.extract_strided_slice %27 {offsets = [0, 40], sizes = [8, 1], strides = [1, 1]} : vector<8x128xf32> to vector<8x1xf32>
    %749 = vector.shape_cast %747 : vector<8x1xf32> to vector<8x1xf32>
    %750 = vector.broadcast %749 : vector<8x1xf32> to vector<8x128xf32>
    %751 = vector.shape_cast %748 : vector<8x1xf32> to vector<8x1xf32>
    %752 = vector.broadcast %751 : vector<8x1xf32> to vector<8x128xf32>
    %753 = arith.select %732, %750, %752 : vector<8x128xi1>, vector<8x128xf32>
    %754 = vector.extract_strided_slice %31 {offsets = [0, 40], sizes = [8, 1], strides = [1, 1]} : vector<8x128xf32> to vector<8x1xf32>
    %cst_174 = arith.constant 0.000000e+00 : f32
    %755 = vector.shape_cast %754 : vector<8x1xf32> to vector<8x1xf32>
    %756 = vector.broadcast %755 : vector<8x1xf32> to vector<8x128xf32>
    %757 = vector.broadcast %cst_174 : f32 to vector<8x128xf32>
    %758 = arith.select %732, %756, %757 : vector<8x128xi1>, vector<8x128xf32>
    %c2_i32_175 = arith.constant 2 : i32
    %759 = vector.broadcast %c2_i32_175 : i32 to vector<8x128xi32>
    %760 = arith.andi %32, %759 : vector<8x128xi32>
    %c0_i32_176 = arith.constant 0 : i32
    %761 = vector.broadcast %c0_i32_176 : i32 to vector<8x128xi32>
    %762 = arith.cmpi ne, %760, %761 : vector<8x128xi32>
    %c2_i32_177 = arith.constant 2 : i32
    %763 = tpu.dynamic_rotate %728 by %c2_i32_177 dim 1 : vector<8x128xf32>, i32 -> vector<8x128xf32>
    %c126_i32_178 = arith.constant 126 : i32
    %764 = tpu.dynamic_rotate %728 by %c126_i32_178 dim 1 : vector<8x128xf32>, i32 -> vector<8x128xf32>
    %765 = arith.select %762, %763, %764 : vector<8x128xi1>, vector<8x128xf32>
    %766 = arith.mulf %739, %728 : vector<8x128xf32>
    %767 = arith.mulf %746, %765 : vector<8x128xf32>
    %768 = arith.addf %766, %767 : vector<8x128xf32>
    %769 = arith.mulf %753, %765 : vector<8x128xf32>
    %770 = arith.mulf %758, %728 : vector<8x128xf32>
    %771 = arith.addf %769, %770 : vector<8x128xf32>
    %c64_i32_179 = arith.constant 64 : i32
    %772 = tpu.dynamic_rotate %771 by %c64_i32_179 dim 1 : vector<8x128xf32>, i32 -> vector<8x128xf32>
    %773 = arith.mulf %37, %772 : vector<8x128xf32>
    %774 = arith.addf %768, %773 : vector<8x128xf32>
    %c1_i32_180 = arith.constant 1 : i32
    %775 = vector.broadcast %c1_i32_180 : i32 to vector<8x128xi32>
    %776 = arith.andi %32, %775 : vector<8x128xi32>
    %c0_i32_181 = arith.constant 0 : i32
    %777 = vector.broadcast %c0_i32_181 : i32 to vector<8x128xi32>
    %778 = arith.cmpi ne, %776, %777 : vector<8x128xi32>
    %779 = vector.extract_strided_slice %30 {offsets = [0, 43], sizes = [8, 1], strides = [1, 1]} : vector<8x128xf32> to vector<8x1xf32>
    %780 = vector.extract_strided_slice %10 {offsets = [0, 43], sizes = [8, 1], strides = [1, 1]} : vector<8x128xf32> to vector<8x1xf32>
    %781 = vector.shape_cast %779 : vector<8x1xf32> to vector<8x1xf32>
    %782 = vector.broadcast %781 : vector<8x1xf32> to vector<8x128xf32>
    %783 = vector.shape_cast %780 : vector<8x1xf32> to vector<8x1xf32>
    %784 = vector.broadcast %783 : vector<8x1xf32> to vector<8x128xf32>
    %785 = arith.select %778, %782, %784 : vector<8x128xi1>, vector<8x128xf32>
    %786 = vector.extract_strided_slice %28 {offsets = [0, 43], sizes = [8, 1], strides = [1, 1]} : vector<8x128xf32> to vector<8x1xf32>
    %787 = vector.extract_strided_slice %24 {offsets = [0, 43], sizes = [8, 1], strides = [1, 1]} : vector<8x128xf32> to vector<8x1xf32>
    %788 = vector.shape_cast %786 : vector<8x1xf32> to vector<8x1xf32>
    %789 = vector.broadcast %788 : vector<8x1xf32> to vector<8x128xf32>
    %790 = vector.shape_cast %787 : vector<8x1xf32> to vector<8x1xf32>
    %791 = vector.broadcast %790 : vector<8x1xf32> to vector<8x128xf32>
    %792 = arith.select %778, %789, %791 : vector<8x128xi1>, vector<8x128xf32>
    %793 = vector.extract_strided_slice %29 {offsets = [0, 43], sizes = [8, 1], strides = [1, 1]} : vector<8x128xf32> to vector<8x1xf32>
    %794 = vector.extract_strided_slice %27 {offsets = [0, 43], sizes = [8, 1], strides = [1, 1]} : vector<8x128xf32> to vector<8x1xf32>
    %795 = vector.shape_cast %793 : vector<8x1xf32> to vector<8x1xf32>
    %796 = vector.broadcast %795 : vector<8x1xf32> to vector<8x128xf32>
    %797 = vector.shape_cast %794 : vector<8x1xf32> to vector<8x1xf32>
    %798 = vector.broadcast %797 : vector<8x1xf32> to vector<8x128xf32>
    %799 = arith.select %778, %796, %798 : vector<8x128xi1>, vector<8x128xf32>
    %800 = vector.extract_strided_slice %31 {offsets = [0, 43], sizes = [8, 1], strides = [1, 1]} : vector<8x128xf32> to vector<8x1xf32>
    %cst_182 = arith.constant 0.000000e+00 : f32
    %801 = vector.shape_cast %800 : vector<8x1xf32> to vector<8x1xf32>
    %802 = vector.broadcast %801 : vector<8x1xf32> to vector<8x128xf32>
    %803 = vector.broadcast %cst_182 : f32 to vector<8x128xf32>
    %804 = arith.select %778, %802, %803 : vector<8x128xi1>, vector<8x128xf32>
    %c1_i32_183 = arith.constant 1 : i32
    %805 = vector.broadcast %c1_i32_183 : i32 to vector<8x128xi32>
    %806 = arith.andi %32, %805 : vector<8x128xi32>
    %c0_i32_184 = arith.constant 0 : i32
    %807 = vector.broadcast %c0_i32_184 : i32 to vector<8x128xi32>
    %808 = arith.cmpi ne, %806, %807 : vector<8x128xi32>
    %c1_i32_185 = arith.constant 1 : i32
    %809 = tpu.dynamic_rotate %774 by %c1_i32_185 dim 1 : vector<8x128xf32>, i32 -> vector<8x128xf32>
    %c127_i32_186 = arith.constant 127 : i32
    %810 = tpu.dynamic_rotate %774 by %c127_i32_186 dim 1 : vector<8x128xf32>, i32 -> vector<8x128xf32>
    %811 = arith.select %808, %809, %810 : vector<8x128xi1>, vector<8x128xf32>
    %812 = arith.mulf %785, %774 : vector<8x128xf32>
    %813 = arith.mulf %792, %811 : vector<8x128xf32>
    %814 = arith.addf %812, %813 : vector<8x128xf32>
    %815 = arith.mulf %799, %811 : vector<8x128xf32>
    %816 = arith.mulf %804, %774 : vector<8x128xf32>
    %817 = arith.addf %815, %816 : vector<8x128xf32>
    %c64_i32_187 = arith.constant 64 : i32
    %818 = tpu.dynamic_rotate %817 by %c64_i32_187 dim 1 : vector<8x128xf32>, i32 -> vector<8x128xf32>
    %819 = arith.mulf %37, %818 : vector<8x128xf32>
    %820 = arith.addf %814, %819 : vector<8x128xf32>
    %c32_i32_188 = arith.constant 32 : i32
    %821 = vector.broadcast %c32_i32_188 : i32 to vector<8x128xi32>
    %822 = arith.andi %32, %821 : vector<8x128xi32>
    %c0_i32_189 = arith.constant 0 : i32
    %823 = vector.broadcast %c0_i32_189 : i32 to vector<8x128xi32>
    %824 = arith.cmpi ne, %822, %823 : vector<8x128xi32>
    %c32_i32_190 = arith.constant 32 : i32
    %825 = tpu.dynamic_rotate %820 by %c32_i32_190 dim 1 : vector<8x128xf32>, i32 -> vector<8x128xf32>
    %c96_i32_191 = arith.constant 96 : i32
    %826 = tpu.dynamic_rotate %820 by %c96_i32_191 dim 1 : vector<8x128xf32>, i32 -> vector<8x128xf32>
    %827 = arith.select %824, %825, %826 : vector<8x128xi1>, vector<8x128xf32>
    %c16_i32_192 = arith.constant 16 : i32
    %828 = vector.broadcast %c16_i32_192 : i32 to vector<8x128xi32>
    %829 = arith.andi %32, %828 : vector<8x128xi32>
    %c0_i32_193 = arith.constant 0 : i32
    %830 = vector.broadcast %c0_i32_193 : i32 to vector<8x128xi32>
    %831 = arith.cmpi ne, %829, %830 : vector<8x128xi32>
    %c16_i32_194 = arith.constant 16 : i32
    %832 = tpu.dynamic_rotate %827 by %c16_i32_194 dim 1 : vector<8x128xf32>, i32 -> vector<8x128xf32>
    %c112_i32_195 = arith.constant 112 : i32
    %833 = tpu.dynamic_rotate %827 by %c112_i32_195 dim 1 : vector<8x128xf32>, i32 -> vector<8x128xf32>
    %834 = arith.select %831, %832, %833 : vector<8x128xi1>, vector<8x128xf32>
    %835 = vector.extract_strided_slice %10 {offsets = [0, 46], sizes = [8, 1], strides = [1, 1]} : vector<8x128xf32> to vector<8x1xf32>
    %836 = vector.broadcast %835 : vector<8x1xf32> to vector<8x128xf32>
    %837 = arith.mulf %836, %820 : vector<8x128xf32>
    %838 = vector.extract_strided_slice %13 {offsets = [0, 46], sizes = [8, 1], strides = [1, 1]} : vector<8x128xf32> to vector<8x1xf32>
    %839 = vector.broadcast %838 : vector<8x1xf32> to vector<8x128xf32>
    %840 = arith.mulf %839, %834 : vector<8x128xf32>
    %c64_i32_196 = arith.constant 64 : i32
    %841 = tpu.dynamic_rotate %840 by %c64_i32_196 dim 1 : vector<8x128xf32>, i32 -> vector<8x128xf32>
    %842 = arith.mulf %37, %841 : vector<8x128xf32>
    %843 = arith.subf %837, %842 : vector<8x128xf32>
    %c32_i32_197 = arith.constant 32 : i32
    %844 = vector.broadcast %c32_i32_197 : i32 to vector<8x128xi32>
    %845 = arith.andi %32, %844 : vector<8x128xi32>
    %c0_i32_198 = arith.constant 0 : i32
    %846 = vector.broadcast %c0_i32_198 : i32 to vector<8x128xi32>
    %847 = arith.cmpi ne, %845, %846 : vector<8x128xi32>
    %848 = vector.extract_strided_slice %30 {offsets = [0, 47], sizes = [8, 1], strides = [1, 1]} : vector<8x128xf32> to vector<8x1xf32>
    %849 = vector.extract_strided_slice %10 {offsets = [0, 47], sizes = [8, 1], strides = [1, 1]} : vector<8x128xf32> to vector<8x1xf32>
    %850 = vector.shape_cast %848 : vector<8x1xf32> to vector<8x1xf32>
    %851 = vector.broadcast %850 : vector<8x1xf32> to vector<8x128xf32>
    %852 = vector.shape_cast %849 : vector<8x1xf32> to vector<8x1xf32>
    %853 = vector.broadcast %852 : vector<8x1xf32> to vector<8x128xf32>
    %854 = arith.select %847, %851, %853 : vector<8x128xi1>, vector<8x128xf32>
    %855 = vector.extract_strided_slice %28 {offsets = [0, 47], sizes = [8, 1], strides = [1, 1]} : vector<8x128xf32> to vector<8x1xf32>
    %856 = vector.extract_strided_slice %24 {offsets = [0, 47], sizes = [8, 1], strides = [1, 1]} : vector<8x128xf32> to vector<8x1xf32>
    %857 = vector.shape_cast %855 : vector<8x1xf32> to vector<8x1xf32>
    %858 = vector.broadcast %857 : vector<8x1xf32> to vector<8x128xf32>
    %859 = vector.shape_cast %856 : vector<8x1xf32> to vector<8x1xf32>
    %860 = vector.broadcast %859 : vector<8x1xf32> to vector<8x128xf32>
    %861 = arith.select %847, %858, %860 : vector<8x128xi1>, vector<8x128xf32>
    %862 = vector.extract_strided_slice %29 {offsets = [0, 47], sizes = [8, 1], strides = [1, 1]} : vector<8x128xf32> to vector<8x1xf32>
    %863 = vector.extract_strided_slice %27 {offsets = [0, 47], sizes = [8, 1], strides = [1, 1]} : vector<8x128xf32> to vector<8x1xf32>
    %864 = vector.shape_cast %862 : vector<8x1xf32> to vector<8x1xf32>
    %865 = vector.broadcast %864 : vector<8x1xf32> to vector<8x128xf32>
    %866 = vector.shape_cast %863 : vector<8x1xf32> to vector<8x1xf32>
    %867 = vector.broadcast %866 : vector<8x1xf32> to vector<8x128xf32>
    %868 = arith.select %847, %865, %867 : vector<8x128xi1>, vector<8x128xf32>
    %869 = vector.extract_strided_slice %31 {offsets = [0, 47], sizes = [8, 1], strides = [1, 1]} : vector<8x128xf32> to vector<8x1xf32>
    %cst_199 = arith.constant 0.000000e+00 : f32
    %870 = vector.shape_cast %869 : vector<8x1xf32> to vector<8x1xf32>
    %871 = vector.broadcast %870 : vector<8x1xf32> to vector<8x128xf32>
    %872 = vector.broadcast %cst_199 : f32 to vector<8x128xf32>
    %873 = arith.select %847, %871, %872 : vector<8x128xi1>, vector<8x128xf32>
    %c32_i32_200 = arith.constant 32 : i32
    %874 = vector.broadcast %c32_i32_200 : i32 to vector<8x128xi32>
    %875 = arith.andi %32, %874 : vector<8x128xi32>
    %c0_i32_201 = arith.constant 0 : i32
    %876 = vector.broadcast %c0_i32_201 : i32 to vector<8x128xi32>
    %877 = arith.cmpi ne, %875, %876 : vector<8x128xi32>
    %c32_i32_202 = arith.constant 32 : i32
    %878 = tpu.dynamic_rotate %843 by %c32_i32_202 dim 1 : vector<8x128xf32>, i32 -> vector<8x128xf32>
    %c96_i32_203 = arith.constant 96 : i32
    %879 = tpu.dynamic_rotate %843 by %c96_i32_203 dim 1 : vector<8x128xf32>, i32 -> vector<8x128xf32>
    %880 = arith.select %877, %878, %879 : vector<8x128xi1>, vector<8x128xf32>
    %881 = arith.mulf %854, %843 : vector<8x128xf32>
    %882 = arith.mulf %861, %880 : vector<8x128xf32>
    %883 = arith.addf %881, %882 : vector<8x128xf32>
    %884 = arith.mulf %868, %880 : vector<8x128xf32>
    %885 = arith.mulf %873, %843 : vector<8x128xf32>
    %886 = arith.addf %884, %885 : vector<8x128xf32>
    %c64_i32_204 = arith.constant 64 : i32
    %887 = tpu.dynamic_rotate %886 by %c64_i32_204 dim 1 : vector<8x128xf32>, i32 -> vector<8x128xf32>
    %888 = arith.mulf %37, %887 : vector<8x128xf32>
    %889 = arith.addf %883, %888 : vector<8x128xf32>
    %c16_i32_205 = arith.constant 16 : i32
    %890 = vector.broadcast %c16_i32_205 : i32 to vector<8x128xi32>
    %891 = arith.andi %32, %890 : vector<8x128xi32>
    %c0_i32_206 = arith.constant 0 : i32
    %892 = vector.broadcast %c0_i32_206 : i32 to vector<8x128xi32>
    %893 = arith.cmpi ne, %891, %892 : vector<8x128xi32>
    %c16_i32_207 = arith.constant 16 : i32
    %894 = tpu.dynamic_rotate %889 by %c16_i32_207 dim 1 : vector<8x128xf32>, i32 -> vector<8x128xf32>
    %c112_i32_208 = arith.constant 112 : i32
    %895 = tpu.dynamic_rotate %889 by %c112_i32_208 dim 1 : vector<8x128xf32>, i32 -> vector<8x128xf32>
    %896 = arith.select %893, %894, %895 : vector<8x128xi1>, vector<8x128xf32>
    %c8_i32_209 = arith.constant 8 : i32
    %897 = vector.broadcast %c8_i32_209 : i32 to vector<8x128xi32>
    %898 = arith.andi %32, %897 : vector<8x128xi32>
    %c0_i32_210 = arith.constant 0 : i32
    %899 = vector.broadcast %c0_i32_210 : i32 to vector<8x128xi32>
    %900 = arith.cmpi ne, %898, %899 : vector<8x128xi32>
    %c8_i32_211 = arith.constant 8 : i32
    %901 = tpu.dynamic_rotate %896 by %c8_i32_211 dim 1 : vector<8x128xf32>, i32 -> vector<8x128xf32>
    %c120_i32_212 = arith.constant 120 : i32
    %902 = tpu.dynamic_rotate %896 by %c120_i32_212 dim 1 : vector<8x128xf32>, i32 -> vector<8x128xf32>
    %903 = arith.select %900, %901, %902 : vector<8x128xi1>, vector<8x128xf32>
    %904 = vector.extract_strided_slice %10 {offsets = [0, 50], sizes = [8, 1], strides = [1, 1]} : vector<8x128xf32> to vector<8x1xf32>
    %905 = vector.broadcast %904 : vector<8x1xf32> to vector<8x128xf32>
    %906 = arith.mulf %905, %889 : vector<8x128xf32>
    %907 = vector.extract_strided_slice %13 {offsets = [0, 50], sizes = [8, 1], strides = [1, 1]} : vector<8x128xf32> to vector<8x1xf32>
    %908 = vector.broadcast %907 : vector<8x1xf32> to vector<8x128xf32>
    %909 = arith.mulf %908, %903 : vector<8x128xf32>
    %c64_i32_213 = arith.constant 64 : i32
    %910 = tpu.dynamic_rotate %909 by %c64_i32_213 dim 1 : vector<8x128xf32>, i32 -> vector<8x128xf32>
    %911 = arith.mulf %37, %910 : vector<8x128xf32>
    %912 = arith.subf %906, %911 : vector<8x128xf32>
    %c16_i32_214 = arith.constant 16 : i32
    %913 = vector.broadcast %c16_i32_214 : i32 to vector<8x128xi32>
    %914 = arith.andi %32, %913 : vector<8x128xi32>
    %c0_i32_215 = arith.constant 0 : i32
    %915 = vector.broadcast %c0_i32_215 : i32 to vector<8x128xi32>
    %916 = arith.cmpi ne, %914, %915 : vector<8x128xi32>
    %917 = vector.extract_strided_slice %30 {offsets = [0, 51], sizes = [8, 1], strides = [1, 1]} : vector<8x128xf32> to vector<8x1xf32>
    %918 = vector.extract_strided_slice %10 {offsets = [0, 51], sizes = [8, 1], strides = [1, 1]} : vector<8x128xf32> to vector<8x1xf32>
    %919 = vector.shape_cast %917 : vector<8x1xf32> to vector<8x1xf32>
    %920 = vector.broadcast %919 : vector<8x1xf32> to vector<8x128xf32>
    %921 = vector.shape_cast %918 : vector<8x1xf32> to vector<8x1xf32>
    %922 = vector.broadcast %921 : vector<8x1xf32> to vector<8x128xf32>
    %923 = arith.select %916, %920, %922 : vector<8x128xi1>, vector<8x128xf32>
    %924 = vector.extract_strided_slice %28 {offsets = [0, 51], sizes = [8, 1], strides = [1, 1]} : vector<8x128xf32> to vector<8x1xf32>
    %925 = vector.extract_strided_slice %24 {offsets = [0, 51], sizes = [8, 1], strides = [1, 1]} : vector<8x128xf32> to vector<8x1xf32>
    %926 = vector.shape_cast %924 : vector<8x1xf32> to vector<8x1xf32>
    %927 = vector.broadcast %926 : vector<8x1xf32> to vector<8x128xf32>
    %928 = vector.shape_cast %925 : vector<8x1xf32> to vector<8x1xf32>
    %929 = vector.broadcast %928 : vector<8x1xf32> to vector<8x128xf32>
    %930 = arith.select %916, %927, %929 : vector<8x128xi1>, vector<8x128xf32>
    %931 = vector.extract_strided_slice %29 {offsets = [0, 51], sizes = [8, 1], strides = [1, 1]} : vector<8x128xf32> to vector<8x1xf32>
    %932 = vector.extract_strided_slice %27 {offsets = [0, 51], sizes = [8, 1], strides = [1, 1]} : vector<8x128xf32> to vector<8x1xf32>
    %933 = vector.shape_cast %931 : vector<8x1xf32> to vector<8x1xf32>
    %934 = vector.broadcast %933 : vector<8x1xf32> to vector<8x128xf32>
    %935 = vector.shape_cast %932 : vector<8x1xf32> to vector<8x1xf32>
    %936 = vector.broadcast %935 : vector<8x1xf32> to vector<8x128xf32>
    %937 = arith.select %916, %934, %936 : vector<8x128xi1>, vector<8x128xf32>
    %938 = vector.extract_strided_slice %31 {offsets = [0, 51], sizes = [8, 1], strides = [1, 1]} : vector<8x128xf32> to vector<8x1xf32>
    %cst_216 = arith.constant 0.000000e+00 : f32
    %939 = vector.shape_cast %938 : vector<8x1xf32> to vector<8x1xf32>
    %940 = vector.broadcast %939 : vector<8x1xf32> to vector<8x128xf32>
    %941 = vector.broadcast %cst_216 : f32 to vector<8x128xf32>
    %942 = arith.select %916, %940, %941 : vector<8x128xi1>, vector<8x128xf32>
    %c16_i32_217 = arith.constant 16 : i32
    %943 = vector.broadcast %c16_i32_217 : i32 to vector<8x128xi32>
    %944 = arith.andi %32, %943 : vector<8x128xi32>
    %c0_i32_218 = arith.constant 0 : i32
    %945 = vector.broadcast %c0_i32_218 : i32 to vector<8x128xi32>
    %946 = arith.cmpi ne, %944, %945 : vector<8x128xi32>
    %c16_i32_219 = arith.constant 16 : i32
    %947 = tpu.dynamic_rotate %912 by %c16_i32_219 dim 1 : vector<8x128xf32>, i32 -> vector<8x128xf32>
    %c112_i32_220 = arith.constant 112 : i32
    %948 = tpu.dynamic_rotate %912 by %c112_i32_220 dim 1 : vector<8x128xf32>, i32 -> vector<8x128xf32>
    %949 = arith.select %946, %947, %948 : vector<8x128xi1>, vector<8x128xf32>
    %950 = arith.mulf %923, %912 : vector<8x128xf32>
    %951 = arith.mulf %930, %949 : vector<8x128xf32>
    %952 = arith.addf %950, %951 : vector<8x128xf32>
    %953 = arith.mulf %937, %949 : vector<8x128xf32>
    %954 = arith.mulf %942, %912 : vector<8x128xf32>
    %955 = arith.addf %953, %954 : vector<8x128xf32>
    %c64_i32_221 = arith.constant 64 : i32
    %956 = tpu.dynamic_rotate %955 by %c64_i32_221 dim 1 : vector<8x128xf32>, i32 -> vector<8x128xf32>
    %957 = arith.mulf %37, %956 : vector<8x128xf32>
    %958 = arith.addf %952, %957 : vector<8x128xf32>
    %c8_i32_222 = arith.constant 8 : i32
    %959 = vector.broadcast %c8_i32_222 : i32 to vector<8x128xi32>
    %960 = arith.andi %32, %959 : vector<8x128xi32>
    %c0_i32_223 = arith.constant 0 : i32
    %961 = vector.broadcast %c0_i32_223 : i32 to vector<8x128xi32>
    %962 = arith.cmpi ne, %960, %961 : vector<8x128xi32>
    %c8_i32_224 = arith.constant 8 : i32
    %963 = tpu.dynamic_rotate %958 by %c8_i32_224 dim 1 : vector<8x128xf32>, i32 -> vector<8x128xf32>
    %c120_i32_225 = arith.constant 120 : i32
    %964 = tpu.dynamic_rotate %958 by %c120_i32_225 dim 1 : vector<8x128xf32>, i32 -> vector<8x128xf32>
    %965 = arith.select %962, %963, %964 : vector<8x128xi1>, vector<8x128xf32>
    %c4_i32_226 = arith.constant 4 : i32
    %966 = vector.broadcast %c4_i32_226 : i32 to vector<8x128xi32>
    %967 = arith.andi %32, %966 : vector<8x128xi32>
    %c0_i32_227 = arith.constant 0 : i32
    %968 = vector.broadcast %c0_i32_227 : i32 to vector<8x128xi32>
    %969 = arith.cmpi ne, %967, %968 : vector<8x128xi32>
    %c4_i32_228 = arith.constant 4 : i32
    %970 = tpu.dynamic_rotate %965 by %c4_i32_228 dim 1 : vector<8x128xf32>, i32 -> vector<8x128xf32>
    %c124_i32_229 = arith.constant 124 : i32
    %971 = tpu.dynamic_rotate %965 by %c124_i32_229 dim 1 : vector<8x128xf32>, i32 -> vector<8x128xf32>
    %972 = arith.select %969, %970, %971 : vector<8x128xi1>, vector<8x128xf32>
    %973 = vector.extract_strided_slice %10 {offsets = [0, 54], sizes = [8, 1], strides = [1, 1]} : vector<8x128xf32> to vector<8x1xf32>
    %974 = vector.broadcast %973 : vector<8x1xf32> to vector<8x128xf32>
    %975 = arith.mulf %974, %958 : vector<8x128xf32>
    %976 = vector.extract_strided_slice %13 {offsets = [0, 54], sizes = [8, 1], strides = [1, 1]} : vector<8x128xf32> to vector<8x1xf32>
    %977 = vector.broadcast %976 : vector<8x1xf32> to vector<8x128xf32>
    %978 = arith.mulf %977, %972 : vector<8x128xf32>
    %c64_i32_230 = arith.constant 64 : i32
    %979 = tpu.dynamic_rotate %978 by %c64_i32_230 dim 1 : vector<8x128xf32>, i32 -> vector<8x128xf32>
    %980 = arith.mulf %37, %979 : vector<8x128xf32>
    %981 = arith.subf %975, %980 : vector<8x128xf32>
    %c8_i32_231 = arith.constant 8 : i32
    %982 = vector.broadcast %c8_i32_231 : i32 to vector<8x128xi32>
    %983 = arith.andi %32, %982 : vector<8x128xi32>
    %c0_i32_232 = arith.constant 0 : i32
    %984 = vector.broadcast %c0_i32_232 : i32 to vector<8x128xi32>
    %985 = arith.cmpi ne, %983, %984 : vector<8x128xi32>
    %986 = vector.extract_strided_slice %30 {offsets = [0, 55], sizes = [8, 1], strides = [1, 1]} : vector<8x128xf32> to vector<8x1xf32>
    %987 = vector.extract_strided_slice %10 {offsets = [0, 55], sizes = [8, 1], strides = [1, 1]} : vector<8x128xf32> to vector<8x1xf32>
    %988 = vector.shape_cast %986 : vector<8x1xf32> to vector<8x1xf32>
    %989 = vector.broadcast %988 : vector<8x1xf32> to vector<8x128xf32>
    %990 = vector.shape_cast %987 : vector<8x1xf32> to vector<8x1xf32>
    %991 = vector.broadcast %990 : vector<8x1xf32> to vector<8x128xf32>
    %992 = arith.select %985, %989, %991 : vector<8x128xi1>, vector<8x128xf32>
    %993 = vector.extract_strided_slice %28 {offsets = [0, 55], sizes = [8, 1], strides = [1, 1]} : vector<8x128xf32> to vector<8x1xf32>
    %994 = vector.extract_strided_slice %24 {offsets = [0, 55], sizes = [8, 1], strides = [1, 1]} : vector<8x128xf32> to vector<8x1xf32>
    %995 = vector.shape_cast %993 : vector<8x1xf32> to vector<8x1xf32>
    %996 = vector.broadcast %995 : vector<8x1xf32> to vector<8x128xf32>
    %997 = vector.shape_cast %994 : vector<8x1xf32> to vector<8x1xf32>
    %998 = vector.broadcast %997 : vector<8x1xf32> to vector<8x128xf32>
    %999 = arith.select %985, %996, %998 : vector<8x128xi1>, vector<8x128xf32>
    %1000 = vector.extract_strided_slice %29 {offsets = [0, 55], sizes = [8, 1], strides = [1, 1]} : vector<8x128xf32> to vector<8x1xf32>
    %1001 = vector.extract_strided_slice %27 {offsets = [0, 55], sizes = [8, 1], strides = [1, 1]} : vector<8x128xf32> to vector<8x1xf32>
    %1002 = vector.shape_cast %1000 : vector<8x1xf32> to vector<8x1xf32>
    %1003 = vector.broadcast %1002 : vector<8x1xf32> to vector<8x128xf32>
    %1004 = vector.shape_cast %1001 : vector<8x1xf32> to vector<8x1xf32>
    %1005 = vector.broadcast %1004 : vector<8x1xf32> to vector<8x128xf32>
    %1006 = arith.select %985, %1003, %1005 : vector<8x128xi1>, vector<8x128xf32>
    %1007 = vector.extract_strided_slice %31 {offsets = [0, 55], sizes = [8, 1], strides = [1, 1]} : vector<8x128xf32> to vector<8x1xf32>
    %cst_233 = arith.constant 0.000000e+00 : f32
    %1008 = vector.shape_cast %1007 : vector<8x1xf32> to vector<8x1xf32>
    %1009 = vector.broadcast %1008 : vector<8x1xf32> to vector<8x128xf32>
    %1010 = vector.broadcast %cst_233 : f32 to vector<8x128xf32>
    %1011 = arith.select %985, %1009, %1010 : vector<8x128xi1>, vector<8x128xf32>
    %c8_i32_234 = arith.constant 8 : i32
    %1012 = vector.broadcast %c8_i32_234 : i32 to vector<8x128xi32>
    %1013 = arith.andi %32, %1012 : vector<8x128xi32>
    %c0_i32_235 = arith.constant 0 : i32
    %1014 = vector.broadcast %c0_i32_235 : i32 to vector<8x128xi32>
    %1015 = arith.cmpi ne, %1013, %1014 : vector<8x128xi32>
    %c8_i32_236 = arith.constant 8 : i32
    %1016 = tpu.dynamic_rotate %981 by %c8_i32_236 dim 1 : vector<8x128xf32>, i32 -> vector<8x128xf32>
    %c120_i32_237 = arith.constant 120 : i32
    %1017 = tpu.dynamic_rotate %981 by %c120_i32_237 dim 1 : vector<8x128xf32>, i32 -> vector<8x128xf32>
    %1018 = arith.select %1015, %1016, %1017 : vector<8x128xi1>, vector<8x128xf32>
    %1019 = arith.mulf %992, %981 : vector<8x128xf32>
    %1020 = arith.mulf %999, %1018 : vector<8x128xf32>
    %1021 = arith.addf %1019, %1020 : vector<8x128xf32>
    %1022 = arith.mulf %1006, %1018 : vector<8x128xf32>
    %1023 = arith.mulf %1011, %981 : vector<8x128xf32>
    %1024 = arith.addf %1022, %1023 : vector<8x128xf32>
    %c64_i32_238 = arith.constant 64 : i32
    %1025 = tpu.dynamic_rotate %1024 by %c64_i32_238 dim 1 : vector<8x128xf32>, i32 -> vector<8x128xf32>
    %1026 = arith.mulf %37, %1025 : vector<8x128xf32>
    %1027 = arith.addf %1021, %1026 : vector<8x128xf32>
    %c4_i32_239 = arith.constant 4 : i32
    %1028 = vector.broadcast %c4_i32_239 : i32 to vector<8x128xi32>
    %1029 = arith.andi %32, %1028 : vector<8x128xi32>
    %c0_i32_240 = arith.constant 0 : i32
    %1030 = vector.broadcast %c0_i32_240 : i32 to vector<8x128xi32>
    %1031 = arith.cmpi ne, %1029, %1030 : vector<8x128xi32>
    %c4_i32_241 = arith.constant 4 : i32
    %1032 = tpu.dynamic_rotate %1027 by %c4_i32_241 dim 1 : vector<8x128xf32>, i32 -> vector<8x128xf32>
    %c124_i32_242 = arith.constant 124 : i32
    %1033 = tpu.dynamic_rotate %1027 by %c124_i32_242 dim 1 : vector<8x128xf32>, i32 -> vector<8x128xf32>
    %1034 = arith.select %1031, %1032, %1033 : vector<8x128xi1>, vector<8x128xf32>
    %c2_i32_243 = arith.constant 2 : i32
    %1035 = vector.broadcast %c2_i32_243 : i32 to vector<8x128xi32>
    %1036 = arith.andi %32, %1035 : vector<8x128xi32>
    %c0_i32_244 = arith.constant 0 : i32
    %1037 = vector.broadcast %c0_i32_244 : i32 to vector<8x128xi32>
    %1038 = arith.cmpi ne, %1036, %1037 : vector<8x128xi32>
    %c2_i32_245 = arith.constant 2 : i32
    %1039 = tpu.dynamic_rotate %1034 by %c2_i32_245 dim 1 : vector<8x128xf32>, i32 -> vector<8x128xf32>
    %c126_i32_246 = arith.constant 126 : i32
    %1040 = tpu.dynamic_rotate %1034 by %c126_i32_246 dim 1 : vector<8x128xf32>, i32 -> vector<8x128xf32>
    %1041 = arith.select %1038, %1039, %1040 : vector<8x128xi1>, vector<8x128xf32>
    %1042 = vector.extract_strided_slice %10 {offsets = [0, 58], sizes = [8, 1], strides = [1, 1]} : vector<8x128xf32> to vector<8x1xf32>
    %1043 = vector.broadcast %1042 : vector<8x1xf32> to vector<8x128xf32>
    %1044 = arith.mulf %1043, %1027 : vector<8x128xf32>
    %1045 = vector.extract_strided_slice %13 {offsets = [0, 58], sizes = [8, 1], strides = [1, 1]} : vector<8x128xf32> to vector<8x1xf32>
    %1046 = vector.broadcast %1045 : vector<8x1xf32> to vector<8x128xf32>
    %1047 = arith.mulf %1046, %1041 : vector<8x128xf32>
    %c64_i32_247 = arith.constant 64 : i32
    %1048 = tpu.dynamic_rotate %1047 by %c64_i32_247 dim 1 : vector<8x128xf32>, i32 -> vector<8x128xf32>
    %1049 = arith.mulf %37, %1048 : vector<8x128xf32>
    %1050 = arith.subf %1044, %1049 : vector<8x128xf32>
    %c4_i32_248 = arith.constant 4 : i32
    %1051 = vector.broadcast %c4_i32_248 : i32 to vector<8x128xi32>
    %1052 = arith.andi %32, %1051 : vector<8x128xi32>
    %c0_i32_249 = arith.constant 0 : i32
    %1053 = vector.broadcast %c0_i32_249 : i32 to vector<8x128xi32>
    %1054 = arith.cmpi ne, %1052, %1053 : vector<8x128xi32>
    %1055 = vector.extract_strided_slice %30 {offsets = [0, 59], sizes = [8, 1], strides = [1, 1]} : vector<8x128xf32> to vector<8x1xf32>
    %1056 = vector.extract_strided_slice %10 {offsets = [0, 59], sizes = [8, 1], strides = [1, 1]} : vector<8x128xf32> to vector<8x1xf32>
    %1057 = vector.shape_cast %1055 : vector<8x1xf32> to vector<8x1xf32>
    %1058 = vector.broadcast %1057 : vector<8x1xf32> to vector<8x128xf32>
    %1059 = vector.shape_cast %1056 : vector<8x1xf32> to vector<8x1xf32>
    %1060 = vector.broadcast %1059 : vector<8x1xf32> to vector<8x128xf32>
    %1061 = arith.select %1054, %1058, %1060 : vector<8x128xi1>, vector<8x128xf32>
    %1062 = vector.extract_strided_slice %28 {offsets = [0, 59], sizes = [8, 1], strides = [1, 1]} : vector<8x128xf32> to vector<8x1xf32>
    %1063 = vector.extract_strided_slice %24 {offsets = [0, 59], sizes = [8, 1], strides = [1, 1]} : vector<8x128xf32> to vector<8x1xf32>
    %1064 = vector.shape_cast %1062 : vector<8x1xf32> to vector<8x1xf32>
    %1065 = vector.broadcast %1064 : vector<8x1xf32> to vector<8x128xf32>
    %1066 = vector.shape_cast %1063 : vector<8x1xf32> to vector<8x1xf32>
    %1067 = vector.broadcast %1066 : vector<8x1xf32> to vector<8x128xf32>
    %1068 = arith.select %1054, %1065, %1067 : vector<8x128xi1>, vector<8x128xf32>
    %1069 = vector.extract_strided_slice %29 {offsets = [0, 59], sizes = [8, 1], strides = [1, 1]} : vector<8x128xf32> to vector<8x1xf32>
    %1070 = vector.extract_strided_slice %27 {offsets = [0, 59], sizes = [8, 1], strides = [1, 1]} : vector<8x128xf32> to vector<8x1xf32>
    %1071 = vector.shape_cast %1069 : vector<8x1xf32> to vector<8x1xf32>
    %1072 = vector.broadcast %1071 : vector<8x1xf32> to vector<8x128xf32>
    %1073 = vector.shape_cast %1070 : vector<8x1xf32> to vector<8x1xf32>
    %1074 = vector.broadcast %1073 : vector<8x1xf32> to vector<8x128xf32>
    %1075 = arith.select %1054, %1072, %1074 : vector<8x128xi1>, vector<8x128xf32>
    %1076 = vector.extract_strided_slice %31 {offsets = [0, 59], sizes = [8, 1], strides = [1, 1]} : vector<8x128xf32> to vector<8x1xf32>
    %cst_250 = arith.constant 0.000000e+00 : f32
    %1077 = vector.shape_cast %1076 : vector<8x1xf32> to vector<8x1xf32>
    %1078 = vector.broadcast %1077 : vector<8x1xf32> to vector<8x128xf32>
    %1079 = vector.broadcast %cst_250 : f32 to vector<8x128xf32>
    %1080 = arith.select %1054, %1078, %1079 : vector<8x128xi1>, vector<8x128xf32>
    %c4_i32_251 = arith.constant 4 : i32
    %1081 = vector.broadcast %c4_i32_251 : i32 to vector<8x128xi32>
    %1082 = arith.andi %32, %1081 : vector<8x128xi32>
    %c0_i32_252 = arith.constant 0 : i32
    %1083 = vector.broadcast %c0_i32_252 : i32 to vector<8x128xi32>
    %1084 = arith.cmpi ne, %1082, %1083 : vector<8x128xi32>
    %c4_i32_253 = arith.constant 4 : i32
    %1085 = tpu.dynamic_rotate %1050 by %c4_i32_253 dim 1 : vector<8x128xf32>, i32 -> vector<8x128xf32>
    %c124_i32_254 = arith.constant 124 : i32
    %1086 = tpu.dynamic_rotate %1050 by %c124_i32_254 dim 1 : vector<8x128xf32>, i32 -> vector<8x128xf32>
    %1087 = arith.select %1084, %1085, %1086 : vector<8x128xi1>, vector<8x128xf32>
    %1088 = arith.mulf %1061, %1050 : vector<8x128xf32>
    %1089 = arith.mulf %1068, %1087 : vector<8x128xf32>
    %1090 = arith.addf %1088, %1089 : vector<8x128xf32>
    %1091 = arith.mulf %1075, %1087 : vector<8x128xf32>
    %1092 = arith.mulf %1080, %1050 : vector<8x128xf32>
    %1093 = arith.addf %1091, %1092 : vector<8x128xf32>
    %c64_i32_255 = arith.constant 64 : i32
    %1094 = tpu.dynamic_rotate %1093 by %c64_i32_255 dim 1 : vector<8x128xf32>, i32 -> vector<8x128xf32>
    %1095 = arith.mulf %37, %1094 : vector<8x128xf32>
    %1096 = arith.addf %1090, %1095 : vector<8x128xf32>
    %c2_i32_256 = arith.constant 2 : i32
    %1097 = vector.broadcast %c2_i32_256 : i32 to vector<8x128xi32>
    %1098 = arith.andi %32, %1097 : vector<8x128xi32>
    %c0_i32_257 = arith.constant 0 : i32
    %1099 = vector.broadcast %c0_i32_257 : i32 to vector<8x128xi32>
    %1100 = arith.cmpi ne, %1098, %1099 : vector<8x128xi32>
    %c2_i32_258 = arith.constant 2 : i32
    %1101 = tpu.dynamic_rotate %1096 by %c2_i32_258 dim 1 : vector<8x128xf32>, i32 -> vector<8x128xf32>
    %c126_i32_259 = arith.constant 126 : i32
    %1102 = tpu.dynamic_rotate %1096 by %c126_i32_259 dim 1 : vector<8x128xf32>, i32 -> vector<8x128xf32>
    %1103 = arith.select %1100, %1101, %1102 : vector<8x128xi1>, vector<8x128xf32>
    %c1_i32_260 = arith.constant 1 : i32
    %1104 = vector.broadcast %c1_i32_260 : i32 to vector<8x128xi32>
    %1105 = arith.andi %32, %1104 : vector<8x128xi32>
    %c0_i32_261 = arith.constant 0 : i32
    %1106 = vector.broadcast %c0_i32_261 : i32 to vector<8x128xi32>
    %1107 = arith.cmpi ne, %1105, %1106 : vector<8x128xi32>
    %c1_i32_262 = arith.constant 1 : i32
    %1108 = tpu.dynamic_rotate %1103 by %c1_i32_262 dim 1 : vector<8x128xf32>, i32 -> vector<8x128xf32>
    %c127_i32_263 = arith.constant 127 : i32
    %1109 = tpu.dynamic_rotate %1103 by %c127_i32_263 dim 1 : vector<8x128xf32>, i32 -> vector<8x128xf32>
    %1110 = arith.select %1107, %1108, %1109 : vector<8x128xi1>, vector<8x128xf32>
    %1111 = vector.extract_strided_slice %10 {offsets = [0, 62], sizes = [8, 1], strides = [1, 1]} : vector<8x128xf32> to vector<8x1xf32>
    %1112 = vector.broadcast %1111 : vector<8x1xf32> to vector<8x128xf32>
    %1113 = arith.mulf %1112, %1096 : vector<8x128xf32>
    %1114 = vector.extract_strided_slice %13 {offsets = [0, 62], sizes = [8, 1], strides = [1, 1]} : vector<8x128xf32> to vector<8x1xf32>
    %1115 = vector.broadcast %1114 : vector<8x1xf32> to vector<8x128xf32>
    %1116 = arith.mulf %1115, %1110 : vector<8x128xf32>
    %c64_i32_264 = arith.constant 64 : i32
    %1117 = tpu.dynamic_rotate %1116 by %c64_i32_264 dim 1 : vector<8x128xf32>, i32 -> vector<8x128xf32>
    %1118 = arith.mulf %37, %1117 : vector<8x128xf32>
    %1119 = arith.subf %1113, %1118 : vector<8x128xf32>
    %c2_i32_265 = arith.constant 2 : i32
    %1120 = vector.broadcast %c2_i32_265 : i32 to vector<8x128xi32>
    %1121 = arith.andi %32, %1120 : vector<8x128xi32>
    %c0_i32_266 = arith.constant 0 : i32
    %1122 = vector.broadcast %c0_i32_266 : i32 to vector<8x128xi32>
    %1123 = arith.cmpi ne, %1121, %1122 : vector<8x128xi32>
    %1124 = vector.extract_strided_slice %30 {offsets = [0, 63], sizes = [8, 1], strides = [1, 1]} : vector<8x128xf32> to vector<8x1xf32>
    %1125 = vector.extract_strided_slice %10 {offsets = [0, 63], sizes = [8, 1], strides = [1, 1]} : vector<8x128xf32> to vector<8x1xf32>
    %1126 = vector.shape_cast %1124 : vector<8x1xf32> to vector<8x1xf32>
    %1127 = vector.broadcast %1126 : vector<8x1xf32> to vector<8x128xf32>
    %1128 = vector.shape_cast %1125 : vector<8x1xf32> to vector<8x1xf32>
    %1129 = vector.broadcast %1128 : vector<8x1xf32> to vector<8x128xf32>
    %1130 = arith.select %1123, %1127, %1129 : vector<8x128xi1>, vector<8x128xf32>
    %1131 = vector.extract_strided_slice %28 {offsets = [0, 63], sizes = [8, 1], strides = [1, 1]} : vector<8x128xf32> to vector<8x1xf32>
    %1132 = vector.extract_strided_slice %24 {offsets = [0, 63], sizes = [8, 1], strides = [1, 1]} : vector<8x128xf32> to vector<8x1xf32>
    %1133 = vector.shape_cast %1131 : vector<8x1xf32> to vector<8x1xf32>
    %1134 = vector.broadcast %1133 : vector<8x1xf32> to vector<8x128xf32>
    %1135 = vector.shape_cast %1132 : vector<8x1xf32> to vector<8x1xf32>
    %1136 = vector.broadcast %1135 : vector<8x1xf32> to vector<8x128xf32>
    %1137 = arith.select %1123, %1134, %1136 : vector<8x128xi1>, vector<8x128xf32>
    %1138 = vector.extract_strided_slice %29 {offsets = [0, 63], sizes = [8, 1], strides = [1, 1]} : vector<8x128xf32> to vector<8x1xf32>
    %1139 = vector.extract_strided_slice %27 {offsets = [0, 63], sizes = [8, 1], strides = [1, 1]} : vector<8x128xf32> to vector<8x1xf32>
    %1140 = vector.shape_cast %1138 : vector<8x1xf32> to vector<8x1xf32>
    %1141 = vector.broadcast %1140 : vector<8x1xf32> to vector<8x128xf32>
    %1142 = vector.shape_cast %1139 : vector<8x1xf32> to vector<8x1xf32>
    %1143 = vector.broadcast %1142 : vector<8x1xf32> to vector<8x128xf32>
    %1144 = arith.select %1123, %1141, %1143 : vector<8x128xi1>, vector<8x128xf32>
    %1145 = vector.extract_strided_slice %31 {offsets = [0, 63], sizes = [8, 1], strides = [1, 1]} : vector<8x128xf32> to vector<8x1xf32>
    %cst_267 = arith.constant 0.000000e+00 : f32
    %1146 = vector.shape_cast %1145 : vector<8x1xf32> to vector<8x1xf32>
    %1147 = vector.broadcast %1146 : vector<8x1xf32> to vector<8x128xf32>
    %1148 = vector.broadcast %cst_267 : f32 to vector<8x128xf32>
    %1149 = arith.select %1123, %1147, %1148 : vector<8x128xi1>, vector<8x128xf32>
    %c2_i32_268 = arith.constant 2 : i32
    %1150 = vector.broadcast %c2_i32_268 : i32 to vector<8x128xi32>
    %1151 = arith.andi %32, %1150 : vector<8x128xi32>
    %c0_i32_269 = arith.constant 0 : i32
    %1152 = vector.broadcast %c0_i32_269 : i32 to vector<8x128xi32>
    %1153 = arith.cmpi ne, %1151, %1152 : vector<8x128xi32>
    %c2_i32_270 = arith.constant 2 : i32
    %1154 = tpu.dynamic_rotate %1119 by %c2_i32_270 dim 1 : vector<8x128xf32>, i32 -> vector<8x128xf32>
    %c126_i32_271 = arith.constant 126 : i32
    %1155 = tpu.dynamic_rotate %1119 by %c126_i32_271 dim 1 : vector<8x128xf32>, i32 -> vector<8x128xf32>
    %1156 = arith.select %1153, %1154, %1155 : vector<8x128xi1>, vector<8x128xf32>
    %1157 = arith.mulf %1130, %1119 : vector<8x128xf32>
    %1158 = arith.mulf %1137, %1156 : vector<8x128xf32>
    %1159 = arith.addf %1157, %1158 : vector<8x128xf32>
    %1160 = arith.mulf %1144, %1156 : vector<8x128xf32>
    %1161 = arith.mulf %1149, %1119 : vector<8x128xf32>
    %1162 = arith.addf %1160, %1161 : vector<8x128xf32>
    %c64_i32_272 = arith.constant 64 : i32
    %1163 = tpu.dynamic_rotate %1162 by %c64_i32_272 dim 1 : vector<8x128xf32>, i32 -> vector<8x128xf32>
    %1164 = arith.mulf %37, %1163 : vector<8x128xf32>
    %1165 = arith.addf %1159, %1164 : vector<8x128xf32>
    %c1_i32_273 = arith.constant 1 : i32
    %1166 = vector.broadcast %c1_i32_273 : i32 to vector<8x128xi32>
    %1167 = arith.andi %32, %1166 : vector<8x128xi32>
    %c0_i32_274 = arith.constant 0 : i32
    %1168 = vector.broadcast %c0_i32_274 : i32 to vector<8x128xi32>
    %1169 = arith.cmpi ne, %1167, %1168 : vector<8x128xi32>
    %1170 = vector.extract_strided_slice %30 {offsets = [0, 66], sizes = [8, 1], strides = [1, 1]} : vector<8x128xf32> to vector<8x1xf32>
    %1171 = vector.extract_strided_slice %10 {offsets = [0, 66], sizes = [8, 1], strides = [1, 1]} : vector<8x128xf32> to vector<8x1xf32>
    %1172 = vector.shape_cast %1170 : vector<8x1xf32> to vector<8x1xf32>
    %1173 = vector.broadcast %1172 : vector<8x1xf32> to vector<8x128xf32>
    %1174 = vector.shape_cast %1171 : vector<8x1xf32> to vector<8x1xf32>
    %1175 = vector.broadcast %1174 : vector<8x1xf32> to vector<8x128xf32>
    %1176 = arith.select %1169, %1173, %1175 : vector<8x128xi1>, vector<8x128xf32>
    %1177 = vector.extract_strided_slice %28 {offsets = [0, 66], sizes = [8, 1], strides = [1, 1]} : vector<8x128xf32> to vector<8x1xf32>
    %1178 = vector.extract_strided_slice %24 {offsets = [0, 66], sizes = [8, 1], strides = [1, 1]} : vector<8x128xf32> to vector<8x1xf32>
    %1179 = vector.shape_cast %1177 : vector<8x1xf32> to vector<8x1xf32>
    %1180 = vector.broadcast %1179 : vector<8x1xf32> to vector<8x128xf32>
    %1181 = vector.shape_cast %1178 : vector<8x1xf32> to vector<8x1xf32>
    %1182 = vector.broadcast %1181 : vector<8x1xf32> to vector<8x128xf32>
    %1183 = arith.select %1169, %1180, %1182 : vector<8x128xi1>, vector<8x128xf32>
    %1184 = vector.extract_strided_slice %29 {offsets = [0, 66], sizes = [8, 1], strides = [1, 1]} : vector<8x128xf32> to vector<8x1xf32>
    %1185 = vector.extract_strided_slice %27 {offsets = [0, 66], sizes = [8, 1], strides = [1, 1]} : vector<8x128xf32> to vector<8x1xf32>
    %1186 = vector.shape_cast %1184 : vector<8x1xf32> to vector<8x1xf32>
    %1187 = vector.broadcast %1186 : vector<8x1xf32> to vector<8x128xf32>
    %1188 = vector.shape_cast %1185 : vector<8x1xf32> to vector<8x1xf32>
    %1189 = vector.broadcast %1188 : vector<8x1xf32> to vector<8x128xf32>
    %1190 = arith.select %1169, %1187, %1189 : vector<8x128xi1>, vector<8x128xf32>
    %1191 = vector.extract_strided_slice %31 {offsets = [0, 66], sizes = [8, 1], strides = [1, 1]} : vector<8x128xf32> to vector<8x1xf32>
    %cst_275 = arith.constant 0.000000e+00 : f32
    %1192 = vector.shape_cast %1191 : vector<8x1xf32> to vector<8x1xf32>
    %1193 = vector.broadcast %1192 : vector<8x1xf32> to vector<8x128xf32>
    %1194 = vector.broadcast %cst_275 : f32 to vector<8x128xf32>
    %1195 = arith.select %1169, %1193, %1194 : vector<8x128xi1>, vector<8x128xf32>
    %c1_i32_276 = arith.constant 1 : i32
    %1196 = vector.broadcast %c1_i32_276 : i32 to vector<8x128xi32>
    %1197 = arith.andi %32, %1196 : vector<8x128xi32>
    %c0_i32_277 = arith.constant 0 : i32
    %1198 = vector.broadcast %c0_i32_277 : i32 to vector<8x128xi32>
    %1199 = arith.cmpi ne, %1197, %1198 : vector<8x128xi32>
    %c1_i32_278 = arith.constant 1 : i32
    %1200 = tpu.dynamic_rotate %1165 by %c1_i32_278 dim 1 : vector<8x128xf32>, i32 -> vector<8x128xf32>
    %c127_i32_279 = arith.constant 127 : i32
    %1201 = tpu.dynamic_rotate %1165 by %c127_i32_279 dim 1 : vector<8x128xf32>, i32 -> vector<8x128xf32>
    %1202 = arith.select %1199, %1200, %1201 : vector<8x128xi1>, vector<8x128xf32>
    %1203 = arith.mulf %1176, %1165 : vector<8x128xf32>
    %1204 = arith.mulf %1183, %1202 : vector<8x128xf32>
    %1205 = arith.addf %1203, %1204 : vector<8x128xf32>
    %1206 = arith.mulf %1190, %1202 : vector<8x128xf32>
    %1207 = arith.mulf %1195, %1165 : vector<8x128xf32>
    %1208 = arith.addf %1206, %1207 : vector<8x128xf32>
    %c64_i32_280 = arith.constant 64 : i32
    %1209 = tpu.dynamic_rotate %1208 by %c64_i32_280 dim 1 : vector<8x128xf32>, i32 -> vector<8x128xf32>
    %1210 = arith.mulf %37, %1209 : vector<8x128xf32>
    %1211 = arith.addf %1205, %1210 : vector<8x128xf32>
    %c0_281 = arith.constant 0 : index
    %c0_282 = arith.constant 0 : index
    %1212 = vector.load %arg5[%c0_281, %c0_282] : memref<8x128xf32, #tpu.memory_space<vmem>>, vector<8x128xf32>
    tpu.vector_store %arg5[%c0_281, %c0_282], %1211 {strides = array<i32>} : memref<8x128xf32, #tpu.memory_space<vmem>>, vector<8x128xf32>,
    return
  }
  func.func @transform_0(%arg0: i32) -> (i32, i32) {
    %c0_i32 = arith.constant 0 : i32
    %c0_i32_0 = arith.constant 0 : i32
    return %arg0, %c0_i32 : i32, i32
  }
  func.func @transform_1(%arg0: i32) -> (i32, i32) {
    %c0_i32 = arith.constant 0 : i32
    %c0_i32_0 = arith.constant 0 : i32
    %c0_i32_1 = arith.constant 0 : i32
    return %c0_i32, %c0_i32_0 : i32, i32
  }
  func.func @transform_2(%arg0: i32) -> (i32, i32) {
    %c0_i32 = arith.constant 0 : i32
    %c0_i32_0 = arith.constant 0 : i32
    %c0_i32_1 = arith.constant 0 : i32
    return %c0_i32, %c0_i32_0 : i32, i32
  }
  func.func @transform_3(%arg0: i32) -> (i32, i32) {
    %c0_i32 = arith.constant 0 : i32
    %c0_i32_0 = arith.constant 0 : i32
    return %arg0, %c0_i32 : i32, i32
  }
  func.func @transform_4(%arg0: i32) -> (i32, i32) {
    %c0_i32 = arith.constant 0 : i32
    %c0_i32_0 = arith.constant 0 : i32
    return %arg0, %c0_i32 : i32, i32
  }
}

</mosaic_0001>

<bundles_post_ra>
// kernel: qrnn_forward.1
= control target key start
LH: loop header
LB: loop body
LE: loop exit
PB: predicated region body
PF: predicated region fallthrough
CT: control target
= control target key end

     0   :  { %vm29_vm0 = vcmask 261120   ;;  %v2916_v0 = vmov 0.0|0.0   ;;  %vm2917_vm1 = vmmov 0   ;;  %v2918_v8 = vmov 0.0   ;;  %s2922_s29 = smov 127   ;;  %s2924_s30 = smov 16   ;;  %s3875_s1 = inlined_call_operand.vmem [shape: f32[32,128], index: 1, kind: input, shape index: {}]   ;;  %s3876_s0 = inlined_call_operand.vmem [shape: f32[8,32], index: 0, kind: input, shape index: {}]   ;;  %s3877_s3 = inlined_call_operand.vmem [shape: f32[8,128], index: 3, kind: input, shape index: {}, may-alias: {3,4}]   ;;  %s3878_s2 = inlined_call_operand.vmem [shape: f32[1,128], index: 2, kind: input, shape index: {}]   ;;  %s3879_s4 = inlined_call_operand.vmem [shape: f32[8,128], index: 4, kind: output, shape index: {}, may-alias: {3,4}]  }
   0x1   :  { %2724 = vmatprep.subr.bf16.mxu1 %v2916_v0  ;;  %2742 = vmatprep.subr.bf16.mxu0 %v2916_v0  ;;  %v18_v1 = vld [vmem:[%s3875_s1] sm:$0xff]  ;;  %v19_v2 = vld [vmem:[%s3875_s1 + $0x8] sm:$0xff]  ;;  %v20_v3 = vld [vmem:[%s3875_s1 + $0x10] sm:$0xff]  ;;  %v2921_v42 = vmov 0   ;;  %v1359_v43 = vlaneseq  ;;  %s2925_s5 = smov 112   ;;  %s2933_s6 = smov 64  }
   0x2   :  { %v34_v4 = vand.u32 4294901760, %v18_v1  ;;  %v37_v5 = vand.u32 4294901760, %v19_v2  ;;  %v21_v6 = vld [vmem:[%s3875_s1 + $0x18] sm:$0xff]  ;;  %v40_v7 = vand.u32 4294901760, %v20_v3  ;;  %2666 = vmatprep.mubr.msk.f32.mxu1 %vm2917_vm1, %v2918_v8  ;;  %2699 = vmatprep.mubr.msk.f32.mxu0 %vm2917_vm1, %v2918_v8  ;;  %v17_v9 = vld [vmem:[%s3876_s0] sm:$0xff]  ;;  %s2919_s1 = smov 32  }
   0x3   :  { %v1363_v10 = vld [vmem:[%s3877_s3] sm:$0xff]  ;;  %v43_v11 = vand.u32 4294901760, %v21_v6  ;;  %v31_v12 = vsel %vm29_vm0, %v17_v9, 0  ;;  %s2920_s0 = smov 96   ;;  %2842 = vset.pattern.permute.xlu0 %v2921_v42  ;;  %v3045_v47 = vand.u32 127, %v1359_v43  ;;  %s2938_s9 = smov 8  }
   0x4   :  { %1366 = vrot.lane.b32.xlu0 %v1363_v10, %s2919_s1  ;;  %v2725_v13 = vpack.c.bf16 %v37_v5, %v34_v4  ;;  %v114_v14 = vsub.f32 %v18_v1, %v34_v4  ;;  %v121_v15 = vsub.f32 %v19_v2, %v37_v5  ;;  %v128_v16 = vsub.f32 %v20_v3, %v40_v7  ;;  %v2595_v44 = vld [vmem:[%s3878_s2] ss:$0 sm:$0xff]  ;;  %s2923_s2 = smov 126   ;;  %s2941_s10 = smov 4  }
   0x5   :  { %v135_v17 = vsub.f32 %v21_v6, %v43_v11  ;;  %v102_v18 = vand.u32 4294901760, %v31_v12  ;;  %v2728_v19 = vpack.c.bf16 %v43_v11, %v40_v7  ;;  %v1364_v53 = vand.u32 32, %v3045_v47  ;;  %s2942_s11 = smov 124   ;;  %s2945_s12 = smov 2  }
   0x6   :  { %2726 = vmatpush3.bf16.msra.mxu1 %v2725_v13  ;;  %2744 = vmatpush3.bf16.msra.mxu0 %v2725_v13  ;;  %v115_v20 = vand.u32 4294901760, %v114_v14  ;;  %v122_v21 = vand.u32 4294901760, %v121_v15  ;;  %v129_v22 = vand.u32 4294901760, %v128_v16  ;;  %v2737_v40 = vpack.c.bf16 %v121_v15, %v114_v14  ;;  %s2948_s13 = smov 1  }
   0x7   :  { %2727 = vmatprep.subr.bf16.mxu1 %v2916_v0  ;;  %2745 = vmatprep.subr.bf16.mxu0 %v2916_v0  ;;  %v103_v23 = vsub.f32 %v31_v12, %v102_v18  ;;  %v136_v24 = vand.u32 4294901760, %v135_v17  ;;  %v2740_v41 = vpack.c.bf16 %v135_v17, %v128_v16  ;;  %vm3052_vm2 = vcmp.ne.s32.totalorder %v1364_v53, 0 }
   0x8   :  { %v116_v25 = vsub.f32 %v114_v14, %v115_v20  ;;  %v123_v26 = vsub.f32 %v121_v15, %v122_v21  ;;  %v130_v27 = vsub.f32 %v128_v16, %v129_v22  ;;  %1368 = vrot.lane.b32.xlu0 %v1363_v10, %s2920_s0  ;;  %v2749_v32 = vpack.c.bf16 %v122_v21, %v115_v20 }
   0x9   :  { %v104_v28 = vand.u32 4294901760, %v103_v23  ;;  %v137_v29 = vsub.f32 %v135_v17, %v136_v24  ;;  %v2752_v38 = vpack.c.bf16 %v136_v24, %v129_v22  ;;  %v2926_v4 = vmov 683565275  }
   0xa   :  { %2729 = vmatpush3.bf16.msra.mxu1 %v2728_v19  ;;  %2747 = vmatpush3.bf16.msra.mxu0 %v2728_v19  ;;  %v117_v30 = vand.u32 4294901760, %v116_v25  ;;  %v124_v31 = vand.u32 4294901760, %v123_v26  ;;  %v131_v35 = vand.u32 4294901760, %v130_v27  ;;  %v2927_v6 = vmov 2475754826  }
   0xb   :  { %v105_v33 = vsub.f32 %v103_v23, %v104_v28  ;;  %2730 = vmatprep.subr.bf16.mxu1 %v2916_v0  ;;  %2748 = vmatprep.subr.bf16.mxu0 %v2916_v0  ;;  %v138_v36 = vand.u32 4294901760, %v137_v29  ;;  %v2928_v9 = vmov 2131351028   ;;  %v2929_v12 = vmov 2102212464  }
   0xc   :  { %v2731_v34 = vpack.c.bf16 %v124_v31, %v117_v30  ;;  %v2930_v15 = vmov 920167782  }
   0xd   :  { %v106_v37 = vand.u32 4294901760, %v105_v33  ;;  %2700 = vmatmul.mubr.f32.vlgmr.msra.gmra.mrb[0].mxu0 %v104_v28  ;;  %v2734_v39 = vpack.c.bf16 %v138_v36, %v131_v35 }
   0xe   :  { %2750 = vmatpush3.bf16.msra.mxu0 %v2749_v32  ;;  %2710 = vmatprep.mubr.msk.f32.mxu0 %vm2917_vm1, %v2918_v8 }
   0xf   :  { %2667 = vmatmul.mubr.f32.vlgmr.msra.gmra.mrb[0].mxu1 %v106_v37  ;;  %2751 = vmatprep.subr.bf16.mxu0 %v2916_v0 }
  0x10   :  { %2732 = vmatpush3.bf16.msra.mxu1 %v2731_v34  ;;  %2677 = vmatprep.mubr.msk.f32.mxu1 %vm2917_vm1, %v2918_v8 }
  0x11   :  { %2733 = vmatprep.subr.bf16.mxu1 %v2916_v0 }
  0x12   :  { %2753 = vmatpush3.bf16.msra.mxu0 %v2752_v38 }
  0x13   :  { %2754 = vmatprep.subr.bf16.mxu0 %v2916_v0 }
  0x14   :  { %2735 = vmatpush3.bf16.msra.mxu1 %v2734_v39 }
  0x15   :  { %2736 = vmatprep.subr.bf16.mxu1 %v2916_v0  ;;  %2711 = vmatmul.mubr.f32.vlgmr.msra.gmra.mrb[0].mxu0 %v102_v18 }
  0x16   :  { %2756 = vmatpush3.bf16.msra.mxu0 %v2725_v13  ;;  %2721 = vmatprep.mubr.msk.f32.mxu0 %vm2917_vm1, %v2918_v8 }
  0x17   :  { %2678 = vmatmul.mubr.f32.vlgmr.msra.gmra.mrb[0].mxu1 %v102_v18  ;;  %2757 = vmatprep.subr.bf16.mxu0 %v2916_v0 }
  0x18   :  { %2738 = vmatpush3.bf16.msra.mxu1 %v2737_v40  ;;  %2688 = vmatprep.mubr.msk.f32.mxu1 %vm2917_vm1, %v2918_v8 }
  0x19   :  { %2739 = vmatprep.subr.bf16.mxu1 %v2916_v0 }
  0x1a   :  { %2759 = vmatpush3.bf16.msra.mxu0 %v2728_v19 }
  0x1c   :  { %2741 = vmatpush3.bf16.msra.mxu1 %v2740_v41 }
  0x1d   :  { %2722 = vmatmul.mubr.f32.vlgmr.msra.gmra.mrb[0].mxu0 %v102_v18  ;;  %v2931_v18 = vmov 1326507024  }
  0x1f   :  { %2689 = vmatmul.mubr.f32.vlgmr.msra.gmra.mrb[0].mxu1 %v103_v23 }
  0x76   :  { %v1367_v51 = vpop.permute.xlu0 %1366 }
  0x7a   :  { %v1369_v56 = vpop.permute.xlu0 %1368 }
  0x7b   :  { %v1370_v59 = vsel %vm3052_vm2, %v1367_v51, %v1369_v56 }
  0xf0   :  { %v514_v45 = vpop.f32.mrb[0].mxu0 }
  0xf1   :  { %v2723_v46 = vpop.f32.mrb[1].mxu0 }
  0xf2   :  { %v279_v48 = vpop.f32.mrb[0].mxu1 }
  0xf3   :  { %v2760_v49 = vadd.f32 %v2595_v44, %v279_v48  ;;  %v2690_v50 = vpop.f32.mrb[1].mxu1 }
  0xf5   :  { %v2761_v52 = vadd.f32 %v2760_v49, %v514_v45 }
  0xf7   :  { %v3048_v54 = vmul.f32 0.5, %v2761_v52  ;;  %518 = vrot.lane.b32.xlu1 %v2761_v52, %s2922_s29 }
  0xf9   :  { %v526_v55 = vand.u32 2139095040, %v3048_v54  ;;  %v523_v62 = vand.u32 2147483647, %v3048_v54  ;;  %vm525_vm10 = vcmp.lt.s32.totalorder %v3048_v54, 0 }
  0xfb   :  { %v527_v58 = vshrl.u32 %v526_v55, 23  ;;  %520 = vrot.lane.b32.xlu1 %v2761_v52, %s2923_s2  ;;  %v530_v1 = vand.u32 8388607, %v523_v62  ;;  %vm524_vm11 = vcmp.le.f32.partialorder %v523_v62, 0.7853982 }
  0xfd   :  { %v2596_v60 = vadd.s32 4294967169, %v527_v58  ;;  %v531_v20 = vor.u32 8388608, %v530_v1 }
  0xff   :  { %v533_v61 = vadd.s32 1, %v2596_v60  ;;  %1373 = vrot.lane.b32.xlu1 %v1370_v59, %s2924_s30  ;;  %v571_v34 = vshll.u32 %v531_v20, 8 }
 0x101   :  { %vm534_vm3 = vcmp.gt.s32.totalorder %v533_v61, 0 }
 0x102   :  { %v535_v63 = vsel %vm534_vm3, %v533_v61, 0  ;;  %vm615_vm3 = vweird.f32 %v3048_v54 }
 0x103   :  { %v537_v0 = vand.u32 31, %v535_v63  ;;  %1375 = vrot.lane.b32.xlu1 %v1370_v59, %s2925_s5  ;;  %v536_v3 = vshrl.u32 %v535_v63, 5 }
 0x105   :  { %v538_v2 = vsub.s32 32, %v537_v0  ;;  %v540_v5 = vshll.u32 %v2926_v4, %v537_v0  ;;  %v543_v7 = vshll.u32 %v2927_v6, %v537_v0  ;;  %v546_v11 = vshll.u32 %v2928_v9, %v537_v0 }
 0x106   :  { %v549_v14 = vshll.u32 %v2929_v12, %v537_v0  ;;  %v552_v17 = vshll.u32 %v2930_v15, %v537_v0  ;;  %vm555_vm4 = vcmp.lt.s32.totalorder %v536_v3, 1  ;;  %vm558_vm5 = vcmp.lt.s32.totalorder %v536_v3, 4 }
 0x107   :  { %v541_v8 = vshrl.u32 %v2927_v6, %v538_v2  ;;  %v544_v10 = vshrl.u32 %v2928_v9, %v538_v2  ;;  %v547_v13 = vshrl.u32 %v2929_v12, %v538_v2  ;;  %v550_v16 = vshrl.u32 %v2930_v15, %v538_v2 }
 0x108   :  { %v553_v19 = vshrl.u32 %v2931_v18, %v538_v2  ;;  %v539_v29 = vshrl.u32 %v2926_v4, %v538_v2  ;;  %vm557_vm6 = vcmp.lt.s32.totalorder %v536_v3, 3  ;;  %vm556_vm7 = vcmp.lt.s32.totalorder %v536_v3, 2 }
 0x109   :  { %v542_v21 = vor.u32 %v541_v8, %v540_v5  ;;  %v545_v22 = vor.u32 %v544_v10, %v543_v7  ;;  %v548_v23 = vor.u32 %v547_v13, %v546_v11  ;;  %v551_v24 = vor.u32 %v550_v16, %v549_v14 }
 0x10a   :  { %v554_v25 = vor.u32 %v553_v19, %v552_v17 }
 0x10b   :  { %v560_v26 = vsel %vm558_vm5, %v548_v23, 2102212464  ;;  %v563_v27 = vsel %vm555_vm4, %v542_v21, %v545_v22  ;;  %v567_v28 = vsel %vm555_vm4, %v545_v22, %v548_v23  ;;  %v564_v30 = vsel %vm558_vm5, %v551_v24, 920167782 }
 0x10c   :  { %v568_v31 = vsel %vm558_vm5, %v554_v25, 1326507024  ;;  %v565_v32 = vsel %vm557_vm6, %v548_v23, %v564_v30  ;;  %v559_v35 = vsel %vm555_vm4, %v539_v29, %v542_v21  ;;  %v561_v36 = vsel %vm557_vm6, %v545_v22, %v560_v26 }
 0x10d   :  { %v569_v33 = vsel %vm557_vm6, %v551_v24, %v568_v31  ;;  %v566_v37 = vsel %vm556_vm7, %v563_v27, %v565_v32  ;;  %v562_v43 = vsel %vm556_vm7, %v559_v35, %v561_v36  ;;  %v2932_v35 = vmov 1  }
 0x10e   :  { %v570_v38 = vsel %vm556_vm7, %v567_v28, %v569_v33  ;;  %v3078_v41 = vmul.u32.u64.low %v571_v34, %v566_v37  ;;  %v3079_v42 = vmul.u32.u64.high %v571_v34, %v566_v37, %v3078_v41  ;;  %v578_v45 = vmul.u32 %v571_v34, %v562_v43  ;;  %2844 = vset.pattern.permute.xlu1 %v2932_v35 }
 0x10f   :  { %v3075_v39 = vmul.u32.u64.low %v571_v34, %v570_v38  ;;  %v3076_v40 = vmul.u32.u64.high %v571_v34, %v570_v38, %v3075_v39 }
 0x110   :  { %v581_v44 = vadd.s32 1, %v3079_v42 }
 0x111   :  { %vm580_vm8 = vc.u32 %v3076_v40, %v3078_v41  ;;  %v579_v60 = vadd.s32 %v3078_v41, %v3076_v40 }
 0x112   :  { %v582_v46 = vsel %vm580_vm8, %v581_v44, %v3079_v42 }
 0x113   :  { %v583_v48 = vadd.s32 %v582_v46, %v578_v45 }
 0x115   :  { %v584_v49 = vadd.s32 536870912, %v583_v48 }
 0x117   :  { %v585_v50 = vshrl.u32 %v584_v49, 30 }
 0x119   :  { %v586_v51 = vshll.u32 %v585_v50, 30  ;;  %v609_v13 = vsub.s32 4, %v585_v50 }
 0x11b   :  { %v587_v52 = vsub.s32 %v583_v48, %v586_v51  ;;  %v610_v17 = vsel %vm525_vm10, %v609_v13, %v585_v50 }
 0x11c   :  { %v612_v20 = vsel %vm524_vm11, 0, %v610_v17 }
 0x11d   :  { %v589_v53 = vsub.s32 0, %v587_v52  ;;  %v719_v21 = vadd.s32 3, %v612_v20  ;;  %v616_v22 = vand.u32 3, %v612_v20 }
 0x11f   :  { %v2597_v55 = vmin.u32 %v589_v53, %v587_v52  ;;  %v720_v23 = vand.u32 3, %v719_v21  ;;  %vm621_vm12 = vcmp.eq.s32.totalorder %v616_v22, 2  ;;  %vm618_vm14 = vcmp.eq.s32.totalorder %v616_v22, 0 }
 0x120   :  { %vm617_vm0 = vcmp.lt.s32.totalorder %v616_v22, 2 }
 0x121   :  { %v591_v56 = vclz %v2597_v55  ;;  %vm725_vm13 = vcmp.eq.s32.totalorder %v720_v23, 2  ;;  %vm722_vm15 = vcmp.eq.s32.totalorder %v720_v23, 0  ;;  %vm721_vm1 = vcmp.lt.s32.totalorder %v720_v23, 2 }
 0x123   :  { %v2598_v58 = vadd.s32 4294967294, %v591_v56 }
 0x125   :  { %vm2599_vm9 = vcmp.lt.s32.totalorder %v2598_v58, 0 }
 0x126   :  { %v594_v59 = vsel %vm2599_vm9, 0, %v2598_v58 }
 0x127   :  { %v595_v61 = vsub.s32 32, %v594_v59  ;;  %v599_v63 = vsub.s32 4294967266, %v594_v59  ;;  %v596_v0 = vshll.u32 %v587_v52, %v594_v59 }
 0x129   :  { %v597_v1 = vshrl.u32 %v579_v60, %v595_v61  ;;  %v600_v2 = vadd.s32 127, %v599_v63 }
 0x12b   :  { %v598_v3 = vor.u32 %v597_v1, %v596_v0  ;;  %v601_v5 = vshll.u32 %v600_v2, 23 }
 0x12d   :  { %v602_v7 = vor.u32 4788187, %v601_v5  ;;  %v605_v10 = vcvt.s32.f32 %v598_v3 }
 0x12f   :  { %v603_v8 = vand.u32 2147483647, %v602_v7 }
 0x131   :  { %v606_v11 = vmul.f32 %v605_v10, %v603_v8 }
 0x133   :  { %v607_v14 = vxor.u32 2147483648, %v606_v11 }
 0x135   :  { %v608_v16 = vsel %vm525_vm10, %v607_v14, %v606_v11 }
 0x136   :  { %v611_v19 = vsel %vm524_vm11, %v3048_v54, %v608_v16 }
 0x137   :  { %2899 = vcosq.f32 %v611_v19 }
 0x138   :  { %2901 = vsinq.f32 %v611_v19 }
 0x141   :  { %v2900_v24 = vpop.eup %2899 }
 0x142   :  { %v2902_v25 = vpop.eup %2901  ;;  %v622_v26 = vxor.u32 2147483648, %v2900_v24 }
 0x143   :  { %v619_v27 = vxor.u32 2147483648, %v2902_v25 }
 0x144   :  { %v623_v28 = vsel %vm621_vm12, %v622_v26, %v2902_v25  ;;  %v727_v62 = vsel %vm725_vm13, %v622_v26, %v2902_v25 }
 0x145   :  { %v620_v29 = vsel %vm618_vm14, %v2900_v24, %v619_v27  ;;  %v724_v30 = vsel %vm722_vm15, %v2900_v24, %v619_v27 }
 0x146   :  { %v624_v31 = vsel %vm617_vm0, %v620_v29, %v623_v28  ;;  %v728_v32 = vsel %vm721_vm1, %v724_v30, %v727_v62 }
 0x147   :  { %v3090_v33 = vsel %vm615_vm3, nan, %v624_v31  ;;  %v3092_v34 = vsel %vm615_vm3, nan, %v728_v32 }
 0x148   :  { %1386 = vperm.xlu0 %2842, %v3092_v34  }
 0x14c   :  { %1380 = vperm.xlu0 %2842, %v3090_v33  }
 0x150   :  { %2843 = vset.pattern.permute.xlu0 %v2932_v35 }
 0x169   :  { %v3096_v36 = vpop.permute.xlu1 %518 }
 0x16a   :  { %v730_v37 = vand.u32 2147483647, %v3096_v36  ;;  %v733_v38 = vand.u32 2139095040, %v3096_v36 }
 0x16c   :  { %v734_v54 = vshrl.u32 %v733_v38, 23  ;;  %v737_v39 = vand.u32 8388607, %v730_v37 }
 0x16d   :  { %v3102_v40 = vpop.permute.xlu1 %520 }
 0x16e   :  { %v2604_v41 = vadd.s32 4294967169, %v734_v54  ;;  %v937_v42 = vand.u32 2147483647, %v3102_v40  ;;  %v940_v43 = vand.u32 2139095040, %v3102_v40  ;;  %v3108_v44 = vadd.f32 %v3102_v40, %v3096_v36 }
 0x16f   :  { %v738_v46 = vor.u32 8388608, %v737_v39 }
 0x170   :  { %v740_v45 = vadd.s32 1, %v2604_v41  ;;  %v941_v48 = vshrl.u32 %v940_v43, 23  ;;  %v944_v49 = vand.u32 8388607, %v937_v42  ;;  %v1148_v50 = vand.u32 2139095040, %v3108_v44 }
 0x171   :  { %v3113_v56 = vshll.u32 %v738_v46, 8 }
 0x172   :  { %vm741_vm4 = vcmp.gt.s32.totalorder %v740_v45, 0  ;;  %v2612_v52 = vadd.s32 4294967169, %v941_v48  ;;  %v945_v58 = vor.u32 8388608, %v944_v49  ;;  %v1149_v59 = vshrl.u32 %v1148_v50, 23 }
 0x173   :  { %v742_v51 = vsel %vm741_vm4, %v740_v45, 0 }
 0x174   :  { %v743_v53 = vshrl.u32 %v742_v51, 5  ;;  %v744_v55 = vand.u32 31, %v742_v51  ;;  %v947_v0 = vadd.s32 1, %v2612_v52  ;;  %v3135_v54 = vshll.u32 %v945_v58, 8 }
 0x175   :  { %v2620_v49 = vadd.s32 4294967169, %v1149_v59 }
 0x176   :  { %v745_v60 = vsub.s32 32, %v744_v55  ;;  %v747_v61 = vshll.u32 %v2926_v4, %v744_v55  ;;  %v750_v63 = vshll.u32 %v2927_v6, %v744_v55  ;;  %v753_v1 = vshll.u32 %v2928_v9, %v744_v55 }
 0x177   :  { %v756_v2 = vshll.u32 %v2929_v12, %v744_v55  ;;  %v759_v3 = vshll.u32 %v2930_v15, %v744_v55  ;;  %vm762_vm5 = vcmp.lt.s32.totalorder %v743_v53, 1  ;;  %vm763_vm6 = vcmp.lt.s32.totalorder %v743_v53, 2 }
 0x178   :  { %v748_v5 = vshrl.u32 %v2927_v6, %v745_v60  ;;  %v751_v7 = vshrl.u32 %v2928_v9, %v745_v60  ;;  %v754_v8 = vshrl.u32 %v2929_v12, %v745_v60  ;;  %v746_v10 = vshrl.u32 %v2926_v4, %v745_v60 }
 0x179   :  { %v757_v11 = vshrl.u32 %v2930_v15, %v745_v60  ;;  %v760_v13 = vshrl.u32 %v2931_v18, %v745_v60  ;;  %vm764_vm7 = vcmp.lt.s32.totalorder %v743_v53, 3  ;;  %vm948_vm8 = vcmp.gt.s32.totalorder %v947_v0, 0 }
 0x17a   :  { %v749_v14 = vor.u32 %v748_v5, %v747_v61  ;;  %v752_v16 = vor.u32 %v751_v7, %v750_v63  ;;  %v755_v17 = vor.u32 %v754_v8, %v753_v1  ;;  %vm765_vm9 = vcmp.lt.s32.totalorder %v743_v53, 4 }
 0x17b   :  { %v758_v19 = vor.u32 %v757_v11, %v756_v2  ;;  %v761_v20 = vor.u32 %v760_v13, %v759_v3  ;;  %v949_v21 = vsel %vm948_vm8, %v947_v0, 0  ;;  %v1155_v7 = vadd.s32 1, %v2620_v49 }
 0x17c   :  { %v766_v22 = vsel %vm762_vm5, %v746_v10, %v749_v14  ;;  %v767_v23 = vsel %vm765_vm9, %v755_v17, 2102212464  ;;  %v770_v24 = vsel %vm762_vm5, %v749_v14, %v752_v16  ;;  %v774_v25 = vsel %vm762_vm5, %v752_v16, %v755_v17 }
 0x17d   :  { %v768_v26 = vsel %vm764_vm7, %v752_v16, %v767_v23  ;;  %v771_v27 = vsel %vm765_vm9, %v758_v19, 920167782  ;;  %v775_v28 = vsel %vm765_vm9, %v761_v20, 1326507024  ;;  %v950_v62 = vshrl.u32 %v949_v21, 5 }
 0x17e   :  { %v769_v29 = vsel %vm763_vm6, %v766_v22, %v768_v26  ;;  %v772_v30 = vsel %vm764_vm7, %v755_v17, %v771_v27  ;;  %v776_v31 = vsel %vm764_vm7, %v758_v19, %v775_v28  ;;  %v951_v32 = vand.u32 31, %v949_v21 }
 0x17f   :  { %v773_v35 = vsel %vm763_vm6, %v770_v24, %v772_v30  ;;  %v777_v38 = vsel %vm763_vm6, %v774_v25, %v776_v31  ;;  %v785_v46 = vmul.u32 %v3113_v56, %v769_v29  ;;  %vm969_vm10 = vcmp.lt.s32.totalorder %v950_v62, 1 }
 0x180   :  { %v3138_v39 = vmul.u32.u64.low %v3113_v56, %v777_v38  ;;  %v3139_v41 = vmul.u32.u64.high %v3113_v56, %v777_v38, %v3138_v39  ;;  %v3142_v43 = vmul.u32.u64.low %v3113_v56, %v773_v35  ;;  %v3143_v45 = vmul.u32.u64.high %v3113_v56, %v773_v35, %v3142_v43 }
 0x181   :  { %v952_v48 = vsub.s32 32, %v951_v32  ;;  %v954_v50 = vshll.u32 %v2926_v4, %v951_v32  ;;  %v957_v51 = vshll.u32 %v2927_v6, %v951_v32  ;;  %v960_v52 = vshll.u32 %v2928_v9, %v951_v32 }
 0x182   :  { %v963_v53 = vshll.u32 %v2929_v12, %v951_v32  ;;  %v966_v61 = vshll.u32 %v2930_v15, %v951_v32  ;;  %vm787_vm11 = vc.u32 %v3139_v41, %v3142_v43  ;;  %v788_v56 = vadd.s32 1, %v3143_v45 }
 0x183   :  { %v955_v55 = vshrl.u32 %v2927_v6, %v952_v48  ;;  %v958_v58 = vshrl.u32 %v2928_v9, %v952_v48  ;;  %v961_v60 = vshrl.u32 %v2929_v12, %v952_v48  ;;  %v964_v59 = vshrl.u32 %v2930_v15, %v952_v48 }
 0x184   :  { %vm970_vm12 = vcmp.lt.s32.totalorder %v950_v62, 2  ;;  %v967_v2 = vshrl.u32 %v2931_v18, %v952_v48  ;;  %v789_v3 = vsel %vm787_vm11, %v788_v56, %v3143_v45  ;;  %vm972_vm13 = vcmp.lt.s32.totalorder %v950_v62, 4 }
 0x185   :  { %v956_v63 = vor.u32 %v955_v55, %v954_v50  ;;  %v959_v0 = vor.u32 %v958_v58, %v957_v51  ;;  %v962_v1 = vor.u32 %v961_v60, %v960_v52  ;;  %v965_v5 = vor.u32 %v964_v59, %v963_v53 }
 0x186   :  { %v790_v8 = vadd.s32 %v789_v3, %v785_v46  ;;  %v953_v10 = vshrl.u32 %v2926_v4, %v952_v48  ;;  %v968_v11 = vor.u32 %v967_v2, %v966_v61  ;;  %vm971_vm14 = vcmp.lt.s32.totalorder %v950_v62, 3 }
 0x187   :  { %v974_v13 = vsel %vm972_vm13, %v962_v1, 2102212464  ;;  %v977_v14 = vsel %vm969_vm10, %v956_v63, %v959_v0  ;;  %v978_v16 = vsel %vm972_vm13, %v965_v5, 920167782  ;;  %v981_v17 = vsel %vm969_vm10, %v959_v0, %v962_v1 }
 0x188   :  { %v791_v19 = vadd.s32 536870912, %v790_v8  ;;  %v973_v20 = vsel %vm969_vm10, %v953_v10, %v956_v63  ;;  %v979_v21 = vsel %vm971_vm14, %v962_v1, %v978_v16  ;;  %v982_v22 = vsel %vm972_vm13, %v968_v11, 1326507024 }
 0x189   :  { %v975_v23 = vsel %vm971_vm14, %v959_v0, %v974_v13  ;;  %v980_v24 = vsel %vm970_vm12, %v977_v14, %v979_v21  ;;  %v983_v25 = vsel %vm971_vm14, %v965_v5, %v982_v22  ;;  %vm1156_vm15 = vcmp.gt.s32.totalorder %v1155_v7, 0 }
 0x18a   :  { %v3166_v26 = vshrl.u32 %v791_v19, 30  ;;  %v984_v27 = vsel %vm970_vm12, %v981_v17, %v983_v25  ;;  %v3170_v28 = vmul.u32.u64.low %v3135_v54, %v980_v24  ;;  %v3171_v29 = vmul.u32.u64.high %v3135_v54, %v980_v24, %v3170_v28 }
 0x18b   :  { %v3175_v30 = vmul.u32.u64.low %v3135_v54, %v984_v27  ;;  %v3176_v31 = vmul.u32.u64.high %v3135_v54, %v984_v27, %v3175_v30  ;;  %v1157_v32 = vsel %vm1156_vm15, %v1155_v7, 0  ;;  %v976_v38 = vsel %vm970_vm12, %v973_v20, %v975_v23 }
 0x18c   :  { %v793_v35 = vshll.u32 %v3166_v26, 30  ;;  %v995_v45 = vadd.s32 1, %v3171_v29  ;;  %v1145_v46 = vand.u32 2147483647, %v3108_v44  ;;  %v1159_v48 = vand.u32 31, %v1157_v32 }
 0x18d   :  { %v992_v49 = vmul.u32 %v3135_v54, %v976_v38  ;;  %vm994_vm0 = vc.u32 %v3176_v31, %v3170_v28  ;;  %v786_v56 = vadd.s32 %v3142_v43, %v3139_v41  ;;  %v1158_v5 = vshrl.u32 %v1157_v32, 5 }
 0x18e   :  { %v794_v39 = vsub.s32 %v790_v8, %v793_v35  ;;  %v996_v51 = vsel %vm994_vm0, %v995_v45, %v3171_v29  ;;  %v1152_v62 = vand.u32 8388607, %v1145_v46  ;;  %v1160_v55 = vsub.s32 32, %v1159_v48 }
 0x18f   :  { %v997_v52 = vadd.s32 %v996_v51, %v992_v49  ;;  %v1162_v7 = vshll.u32 %v2926_v4, %v1159_v48  ;;  %v1168_v8 = vshll.u32 %v2928_v9, %v1159_v48  ;;  %v1165_v43 = vshll.u32 %v2927_v6, %v1159_v48 }
 0x190   :  { %v796_v50 = vsub.s32 0, %v794_v39  ;;  %v1153_v59 = vor.u32 8388608, %v1152_v62  ;;  %v1169_v63 = vshrl.u32 %v2929_v12, %v1160_v55  ;;  %v1163_v1 = vshrl.u32 %v2927_v6, %v1160_v55 }
 0x191   :  { %v998_v58 = vadd.s32 536870912, %v997_v52  ;;  %v1166_v2 = vshrl.u32 %v2928_v9, %v1160_v55  ;;  %v1172_v3 = vshrl.u32 %v2930_v15, %v1160_v55  ;;  %v1171_v11 = vshll.u32 %v2929_v12, %v1159_v48 }
 0x192   :  { %v2605_v53 = vmin.u32 %v796_v50, %v794_v39  ;;  %v1170_v16 = vor.u32 %v1169_v63, %v1168_v8  ;;  %v1175_v17 = vshrl.u32 %v2931_v18, %v1160_v55  ;;  %v1164_v20 = vor.u32 %v1163_v1, %v1162_v7 }
 0x193   :  { %v3188_v61 = vshrl.u32 %v998_v58, 30  ;;  %v1167_v21 = vor.u32 %v1166_v2, %v1165_v43  ;;  %v1173_v22 = vor.u32 %v1172_v3, %v1171_v11  ;;  %v1174_v25 = vshll.u32 %v2930_v15, %v1159_v48 }
 0x194   :  { %v798_v60 = vclz %v2605_v53  ;;  %v1161_v6 = vshrl.u32 %v2926_v4, %v1160_v55  ;;  %vm1177_vm3 = vcmp.lt.s32.totalorder %v1158_v5, 1  ;;  %vm1180_vm4 = vcmp.lt.s32.totalorder %v1158_v5, 4 }
 0x195   :  { %v1000_v0 = vshll.u32 %v3188_v61, 30  ;;  %v1176_v30 = vor.u32 %v1175_v17, %v1174_v25  ;;  %v1182_v18 = vsel %vm1180_vm4, %v1170_v16, 2102212464  ;;  %v1185_v35 = vsel %vm1177_vm3, %v1164_v20, %v1167_v21 }
 0x196   :  { %v2606_v54 = vadd.s32 4294967294, %v798_v60  ;;  %v1186_v38 = vsel %vm1180_vm4, %v1173_v22, 920167782  ;;  %vm1178_vm5 = vcmp.lt.s32.totalorder %v1158_v5, 2  ;;  %vm1179_vm6 = vcmp.lt.s32.totalorder %v1158_v5, 3 }
 0x197   :  { %v3199_v41 = vsub.s32 %v997_v52, %v1000_v0  ;;  %v1181_v15 = vsel %vm1177_vm3, %v1161_v6, %v1164_v20  ;;  %v1183_v49 = vsel %vm1179_vm6, %v1167_v21, %v1182_v18  ;;  %v1187_v50 = vsel %vm1179_vm6, %v1170_v16, %v1186_v38 }
 0x198   :  { %vm2607_vm1 = vcmp.lt.s32.totalorder %v2606_v54, 0  ;;  %v1188_v52 = vsel %vm1178_vm5, %v1185_v35, %v1187_v50  ;;  %v1189_v53 = vsel %vm1177_vm3, %v1167_v21, %v1170_v16  ;;  %v1190_v62 = vsel %vm1180_vm4, %v1176_v30, 1326507024 }
 0x199   :  { %v801_v10 = vsel %vm2607_vm1, 0, %v2606_v54  ;;  %v1003_v19 = vsub.s32 0, %v3199_v41  ;;  %v1191_v55 = vsel %vm1179_vm6, %v1173_v22, %v1190_v62  ;;  %v816_v54 = vsub.s32 4, %v3166_v26 }
 0x19a   :  { %v802_v13 = vsub.s32 32, %v801_v10  ;;  %v806_v14 = vsub.s32 4294967266, %v801_v10  ;;  %v803_v23 = vshll.u32 %v794_v39, %v801_v10  ;;  %v1193_v39 = vshll.u32 %v1153_v59, 8 }
 0x19b   :  { %v2613_v27 = vmin.u32 %v1003_v19, %v3199_v41  ;;  %v1192_v63 = vsel %vm1178_vm5, %v1189_v53, %v1191_v55  ;;  %vm732_vm8 = vcmp.lt.s32.totalorder %v3096_v36, 0  ;;  %v993_v0 = vadd.s32 %v3170_v28, %v3176_v31 }
 0x19c   :  { %v804_v24 = vshrl.u32 %v786_v56, %v802_v13  ;;  %v807_v9 = vadd.s32 127, %v806_v14  ;;  %v3215_v58 = vmul.u32.u64.low %v1193_v39, %v1188_v52  ;;  %v3216_v60 = vmul.u32.u64.high %v1193_v39, %v1188_v52, %v3215_v58 }
 0x19d   :  { %v1005_v32 = vclz %v2613_v27  ;;  %v1184_v7 = vsel %vm1178_vm5, %v1181_v15, %v1183_v49  ;;  %v3225_v8 = vmul.u32.u64.low %v1193_v39, %v1192_v63  ;;  %v3226_v10 = vmul.u32.u64.high %v1193_v39, %v1192_v63, %v3225_v8 }
 0x19e   :  { %v805_v12 = vor.u32 %v804_v24, %v803_v23  ;;  %v808_v29 = vshll.u32 %v807_v9, 23  ;;  %v1203_v14 = vadd.s32 1, %v3216_v60  ;;  %vm731_vm9 = vcmp.le.f32.partialorder %v730_v37, 0.7853982 }
 0x19f   :  { %v2614_v4 = vadd.s32 4294967294, %v1005_v32  ;;  %v817_v28 = vsel %vm732_vm8, %v816_v54, %v3166_v26  ;;  %v1200_v19 = vmul.u32 %v1193_v39, %v1184_v7  ;;  %vm1202_vm10 = vc.u32 %v3226_v10, %v3215_v58 }
 0x1a0   :  { %v809_v45 = vor.u32 4788187, %v808_v29  ;;  %v812_v48 = vcvt.s32.f32 %v805_v12  ;;  %v1204_v21 = vsel %vm1202_vm10, %v1203_v14, %v3216_v60  ;;  %v1023_v12 = vsub.s32 4, %v3188_v61 }
 0x1a1   :  { %vm2615_vm7 = vcmp.lt.s32.totalorder %v2614_v4, 0  ;;  %v1205_v22 = vadd.s32 %v1204_v21, %v1200_v19  ;;  %vm939_vm11 = vcmp.lt.s32.totalorder %v3102_v40, 0  ;;  %vm3244_vm12 = vcmp.le.f32.partialorder %v937_v42, 0.7853982 }
 0x1a2   :  { %v810_v51 = vand.u32 2147483647, %v809_v45  ;;  %v1008_v59 = vsel %vm2615_vm7, 0, %v2614_v4  ;;  %vm822_vm4 = vweird.f32 %v3096_v36 }
 0x1a3   :  { %v1009_v1 = vsub.s32 32, %v1008_v59  ;;  %v1013_v2 = vsub.s32 4294967266, %v1008_v59  ;;  %v1010_v43 = vshll.u32 %v3199_v41, %v1008_v59  ;;  %v819_v41 = vsel %vm731_vm9, 0, %v817_v28 }
 0x1a4   :  { %v813_v56 = vmul.f32 %v812_v48, %v810_v51  ;;  %v926_v24 = vadd.s32 3, %v819_v41  ;;  %v1206_v9 = vadd.s32 536870912, %v1205_v22  ;;  %v823_v25 = vand.u32 3, %v819_v41 }
 0x1a5   :  { %v1011_v11 = vshrl.u32 %v993_v0, %v1009_v1  ;;  %v1014_v13 = vadd.s32 127, %v1013_v2  ;;  %v1024_v48 = vsel %vm939_vm11, %v1023_v12, %v3188_v61 }
 0x1a6   :  { %v814_v3 = vxor.u32 2147483648, %v813_v56  ;;  %v3237_v27 = vshrl.u32 %v1206_v9, 30  ;;  %v927_v29 = vand.u32 3, %v926_v24  ;;  %vm824_vm13 = vcmp.lt.s32.totalorder %v823_v25, 2 }
 0x1a7   :  { %v1012_v17 = vor.u32 %v1011_v11, %v1010_v43  ;;  %v1015_v5 = vshll.u32 %v1014_v13, 23  ;;  %vm825_vm14 = vcmp.eq.s32.totalorder %v823_v25, 0  ;;  %vm828_vm15 = vcmp.eq.s32.totalorder %v823_v25, 2 }
 0x1a8   :  { %v815_v16 = vsel %vm732_vm8, %v814_v3, %v813_v56  ;;  %v1208_v30 = vshll.u32 %v3237_v27, 30  ;;  %vm932_vm0 = vcmp.eq.s32.totalorder %v927_v29, 2  ;;  %vm928_vm1 = vcmp.lt.s32.totalorder %v927_v29, 2 }
 0x1a9   :  { %v818_v31 = vsel %vm731_vm9, %v3096_v36, %v815_v16  ;;  %v1016_v20 = vor.u32 4788187, %v1015_v5  ;;  %v1019_v37 = vcvt.s32.f32 %v1012_v17  ;;  %vm929_vm3 = vcmp.eq.s32.totalorder %v927_v29, 0  ;;  %v1374_v16 = vpop.permute.xlu1 %1373 }
 0x1aa   :  { %2903 = vcosq.f32 %v818_v31  ;;  %v1209_v39 = vsub.s32 %v1205_v22, %v1208_v30  ;;  %v1026_v53 = vsel %vm3244_vm12, 0, %v1024_v48  ;;  %v1352_v36 = vsub.f32 0.0, %v3092_v34 }
 0x1ab   :  { %2905 = vsinq.f32 %v818_v31  ;;  %v1017_v23 = vand.u32 2147483647, %v1016_v20  ;;  %v1133_v63 = vadd.s32 3, %v1026_v53  ;;  %v1030_v1 = vand.u32 3, %v1026_v53 }
 0x1ac   :  { %v1211_v42 = vsub.s32 0, %v1209_v39  ;;  %v1201_v11 = vadd.s32 %v3215_v58, %v3226_v10  ;;  %v1371_v31 = vand.u32 16, %v3045_v47  ;;  %vm1029_vm8 = vweird.f32 %v3102_v40 }
 0x1ad   :  { %v1020_v26 = vmul.f32 %v1019_v37, %v1017_v23  ;;  %v1134_v3 = vand.u32 3, %v1133_v63  ;;  %vm1032_vm6 = vcmp.eq.s32.totalorder %v1030_v1, 0  ;;  %vm1035_vm7 = vcmp.eq.s32.totalorder %v1030_v1, 2  ;;  %v1376_v25 = vpop.permute.xlu1 %1375 }
 0x1ae   :  { %v2621_v62 = vmin.u32 %v1211_v42, %v1209_v39  ;;  %vm1031_vm9 = vcmp.lt.s32.totalorder %v1030_v1, 2 }
 0x1af   :  { %v1021_v6 = vxor.u32 2147483648, %v1020_v26  ;;  %vm1136_vm10 = vcmp.eq.s32.totalorder %v1134_v3, 0 }
 0x1b0   :  { %v1213_v54 = vclz %v2621_v62 }
 0x1b1   :  { %v1022_v32 = vsel %vm939_vm11, %v1021_v6, %v1020_v26  ;;  %vm1139_vm11 = vcmp.eq.s32.totalorder %v1134_v3, 2 }
 0x1b2   :  { %v1025_v38 = vsel %vm3244_vm12, %v3102_v40, %v1022_v32  ;;  %v2622_v0 = vadd.s32 4294967294, %v1213_v54  ;;  %vm3272_vm12 = vcmp.ne.s32.totalorder %v1371_v31, 0 }
 0x1b3   :  { %2907 = vcosq.f32 %v1025_v38  ;;  %v1377_v30 = vsel %vm3272_vm12, %v1374_v16, %v1376_v25 }
 0x1b4   :  { %v2904_v35 = vpop.eup %2903  ;;  %2909 = vsinq.f32 %v1025_v38  ;;  %vm2623_vm5 = vcmp.lt.s32.totalorder %v2622_v0, 0 }
 0x1b5   :  { %v2906_v45 = vpop.eup %2905  ;;  %v829_v15 = vxor.u32 2147483648, %v2904_v35  ;;  %v1216_v7 = vsel %vm2623_vm5, 0, %v2622_v0 }
 0x1b6   :  { %v826_v4 = vxor.u32 2147483648, %v2906_v45  ;;  %v1217_v13 = vsub.s32 32, %v1216_v7  ;;  %v1221_v14 = vsub.s32 4294967266, %v1216_v7  ;;  %v1218_v5 = vshll.u32 %v1209_v39, %v1216_v7 }
 0x1b7   :  { %v830_v49 = vsel %vm828_vm15, %v829_v15, %v2906_v45  ;;  %v934_v50 = vsel %vm932_vm0, %v829_v15, %v2906_v45  ;;  %vm1146_vm15 = vcmp.le.f32.partialorder %v1145_v46, 0.7853982 }
 0x1b8   :  { %v827_v51 = vsel %vm825_vm14, %v2904_v35, %v826_v4  ;;  %v931_v52 = vsel %vm929_vm3, %v2904_v35, %v826_v4  ;;  %v1219_v19 = vshrl.u32 %v1201_v11, %v1217_v13  ;;  %v1222_v41 = vadd.s32 127, %v1221_v14 }
 0x1b9   :  { %v831_v61 = vsel %vm824_vm13, %v827_v51, %v830_v49  ;;  %v935_v55 = vsel %vm928_vm1, %v931_v52, %v934_v50  ;;  %vm1135_vm13 = vcmp.lt.s32.totalorder %v1134_v3, 2  ;;  %v1231_v35 = vsub.s32 4, %v3237_v27 }
 0x1ba   :  { %v3257_v60 = vsel %vm822_vm4, nan, %v831_v61  ;;  %v936_v56 = vsel %vm822_vm4, nan, %v935_v55  ;;  %v1220_v58 = vor.u32 %v1219_v19, %v1218_v5  ;;  %v1223_v10 = vshll.u32 %v1222_v41, 23 }
 0x1bb   :  { %v3260_v59 = vmul.f32 %v936_v56, %v3092_v34  ;;  %vm1147_vm14 = vcmp.lt.s32.totalorder %v3108_v44, 0  ;;  %v2934_v3 = vmov -1.0   ;;  %v3311_v16 = vmul.f32 %v3257_v60, %v3092_v34 }
 0x1bc   :  { %v1224_v24 = vor.u32 4788187, %v1223_v10  ;;  %v1227_v29 = vcvt.s32.f32 %v1220_v58  ;;  %v1232_v48 = vsel %vm1147_vm14, %v1231_v35, %v3237_v27  ;;  %v2935_v5 = vmov 4  }
 0x1bd   :  { %1417 = vperm.xlu0 %2843, %v3260_v59   ;;  %v2908_v2 = vpop.eup %2907  ;;  %v1234_v40 = vsel %vm1146_vm15, 0, %v1232_v48 }
 0x1be   :  { %v2910_v8 = vpop.eup %2909  ;;  %v1036_v43 = vxor.u32 2147483648, %v2908_v2  ;;  %v1225_v12 = vand.u32 2147483647, %v1224_v24  ;;  %v1341_v49 = vadd.s32 3, %v1234_v40  ;;  %v1238_v50 = vand.u32 3, %v1234_v40 }
 0x1bf   :  { %v1033_v28 = vxor.u32 2147483648, %v2910_v8 }
 0x1c0   :  { %v1037_v17 = vsel %vm1035_vm7, %v1036_v43, %v2910_v8  ;;  %v1141_v37 = vsel %vm1139_vm11, %v1036_v43, %v2910_v8  ;;  %v1228_v32 = vmul.f32 %v1227_v29, %v1225_v12  ;;  %v1342_v51 = vand.u32 3, %v1341_v49 }
 0x1c1   :  { %v1034_v20 = vsel %vm1032_vm6, %v2908_v2, %v1033_v28  ;;  %v1138_v23 = vsel %vm1136_vm10, %v2908_v2, %v1033_v28  ;;  %vm1243_vm0 = vcmp.eq.s32.totalorder %v1238_v50, 2  ;;  %vm1240_vm3 = vcmp.eq.s32.totalorder %v1238_v50, 0 }
 0x1c2   :  { %v1038_v21 = vsel %vm1031_vm9, %v1034_v20, %v1037_v17  ;;  %v1142_v6 = vsel %vm1135_vm13, %v1138_v23, %v1141_v37  ;;  %v1229_v45 = vxor.u32 2147483648, %v1228_v32  ;;  %vm1347_vm1 = vcmp.eq.s32.totalorder %v1342_v51, 2 }
 0x1c3   :  { %v1039_v22 = vsel %vm1029_vm8, nan, %v1038_v21  ;;  %v1143_v39 = vsel %vm1029_vm8, nan, %v1142_v6  ;;  %vm1344_vm4 = vcmp.eq.s32.totalorder %v1342_v51, 0  ;;  %vm1239_vm5 = vcmp.lt.s32.totalorder %v1238_v50, 2 }
 0x1c4   :  { %v3270_v9 = vmul.f32 %v1352_v36, %v1039_v22  ;;  %v1230_v15 = vsel %vm1147_vm14, %v1229_v45, %v1228_v32  ;;  %v3286_v4 = vmul.f32 %v1352_v36, %v1143_v39  ;;  %vm1343_vm6 = vcmp.lt.s32.totalorder %v1342_v51, 2 }
 0x1c5   :  { %v1233_v42 = vsel %vm1146_vm15, %v3108_v44, %v1230_v15  ;;  %vm1237_vm7 = vweird.f32 %v3108_v44  ;;  %vm1361_vm8 = vcmp.ge.s32.totalorder %v3045_v47, 64  ;;  %v2915_v44 = vld [vmem:[%s3877_s3] sm:$0xff]  ;;  %v2936_v39 = vmov 5   ;;  %s2937_s3 = smov 120  }
 0x1c6   :  { %2911 = vcosq.f32 %v1233_v42  ;;  %v3296_v7 = vsel %vm1361_vm8, 1.0, %v2934_v3 }
 0x1c7   :  { %v1387_v18 = vpop.permute.xlu0 %1386  ;;  %2913 = vsinq.f32 %v1233_v42  ;;  %v1452_v42 = vand.u32 8, %v3045_v47 }
 0x1c8   :  { %v1389_v38 = vmul.f32 %v1387_v18, %v1377_v30 }
 0x1c9   :  { %vm3337_vm9 = vcmp.ne.s32.totalorder %v1452_v42, 0 }
 0x1ca   :  { %1390 = vrot.lane.b32.xlu1 %v1389_v38, %s2933_s6 }
 0x1cb   :  { %v1381_v36 = vpop.permute.xlu0 %1380 }
 0x1cc   :  { %v1383_v43 = vmul.f32 %v2915_v44, %v1381_v36 }
 0x1ce   :  { %1422 = vperm.xlu1 %2844, %v3286_v4  }
 0x1d0   :  { %v2912_v52 = vpop.eup %2911 }
 0x1d1   :  { %v2914_v53 = vpop.eup %2913  ;;  %v1244_v62 = vxor.u32 2147483648, %v2912_v52 }
 0x1d2   :  { %v1241_v61 = vxor.u32 2147483648, %v2914_v53 }
 0x1d3   :  { %v1245_v46 = vsel %vm1243_vm0, %v1244_v62, %v2914_v53  ;;  %v1349_v27 = vsel %vm1347_vm1, %v1244_v62, %v2914_v53 }
 0x1d4   :  { %v1242_v55 = vsel %vm1240_vm3, %v2912_v52, %v1241_v61  ;;  %v1346_v56 = vsel %vm1344_vm4, %v2912_v52, %v1241_v61 }
 0x1d5   :  { %v1246_v54 = vsel %vm1239_vm5, %v1242_v55, %v1245_v46  ;;  %v1350_v63 = vsel %vm1343_vm6, %v1346_v56, %v1349_v27 }
 0x1d6   :  { %v1247_v0 = vsel %vm1237_vm7, nan, %v1246_v54  ;;  %v1351_v1 = vsel %vm1237_vm7, nan, %v1350_v63 }
 0x1d7   :  { %v3292_v2 = vmul.f32 %v1351_v1, %v3090_v33  ;;  %v3305_v14 = vmul.f32 %v1247_v0, %v3090_v33  ;;  %v2939_v0 = vmov 8  }
 0x1d9   :  { %1428 = vperm.xlu1 %2844, %v3292_v2  }
 0x23c   :  { %v1391_v8 = vpop.permute.xlu1 %1390  ;;  %v1418_v31 = vpop.permute.xlu0 %1417 }
 0x23d   :  { %v1392_v11 = vmul.f32 %v1391_v8, %v3296_v7 }
 0x23f   :  { %v1393_v13 = vsub.f32 %v1383_v43, %v1392_v11 }
 0x241   :  { %1432 = vrot.lane.b32.xlu0 %v1393_v13, %s2919_s1  ;;  %1434 = vrot.lane.b32.xlu1 %v1393_v13, %s2920_s0 }
 0x245   :  { %1400 = vperm.xlu1 %2844, %v3090_v33   ;;  %1396 = vperm.xlu0 %2843, %v3305_v14  }
 0x249   :  { %1411 = vperm.xlu1 %2844, %v3270_v9   ;;  %1406 = vperm.xlu0 %2843, %v3311_v16  }
 0x24d   :  { %v1423_v28 = vpop.permute.xlu1 %1422  ;;  %2845 = vset.pattern.permute.xlu1 %v2935_v5  ;;  %2846 = vset.pattern.permute.xlu0 %v2935_v5 }
 0x24e   :  { %v1425_v21 = vsel %vm3052_vm2, %v1418_v31, %v1423_v28  ;;  %v2940_v28 = vmov 9  }
 0x258   :  { %v1429_v17 = vpop.permute.xlu1 %1428 }
 0x259   :  { %v1431_v19 = vsel %vm3052_vm2, %v1429_v17, 0.0 }
 0x25a   :  { %v1441_v58 = vmul.f32 %v1431_v19, %v1393_v13 }
 0x2b3   :  { %v1433_v41 = vpop.permute.xlu0 %1432  ;;  %v1435_v20 = vpop.permute.xlu1 %1434 }
 0x2b4   :  { %v1436_v60 = vsel %vm3052_vm2, %v1433_v41, %v1435_v20 }
 0x2b5   :  { %v1440_v10 = vmul.f32 %v1436_v60, %v1425_v21 }
 0x2b7   :  { %v1442_v22 = vadd.f32 %v1441_v58, %v1440_v10 }
 0x2b9   :  { %1443 = vrot.lane.b32.xlu0 %v1442_v22, %s2933_s6 }
 0x2c4   :  { %v1401_v23 = vpop.permute.xlu1 %1400  ;;  %v1397_v37 = vpop.permute.xlu0 %1396 }
 0x2c5   :  { %v1403_v12 = vsel %vm3052_vm2, %v1397_v37, %v1401_v23 }
 0x2c6   :  { %v1437_v30 = vmul.f32 %v1403_v12, %v1393_v13 }
 0x2c8   :  { %v1412_v24 = vpop.permute.xlu1 %1411  ;;  %v1407_v25 = vpop.permute.xlu0 %1406 }
 0x2c9   :  { %v1414_v6 = vsel %vm3052_vm2, %v1407_v25, %v1412_v24 }
 0x2ca   :  { %v1438_v29 = vmul.f32 %v1436_v60, %v1414_v6  ;;  %v1525_v6 = vand.u32 4, %v3045_v47 }
 0x2cc   :  { %v1439_v32 = vadd.f32 %v1438_v29, %v1437_v30  ;;  %vm3375_vm10 = vcmp.ne.s32.totalorder %v1525_v6, 0 }
 0x32b   :  { %v1444_v18 = vpop.permute.xlu0 %1443 }
 0x32c   :  { %v1445_v35 = vmul.f32 %v1444_v18, %v3296_v7 }
 0x32e   :  { %v1446_v38 = vadd.f32 %v1445_v35, %v1439_v32 }
 0x330   :  { %1449 = vrot.lane.b32.xlu0 %v1446_v38, %s2925_s5  ;;  %1447 = vrot.lane.b32.xlu1 %v1446_v38, %s2924_s30 }
 0x334   :  { %1465 = vperm.xlu1 %2845, %v3092_v34  }
 0x338   :  { %2847 = vset.pattern.permute.xlu1 %v2936_v39 }
 0x3a2   :  { %v1450_v45 = vpop.permute.xlu0 %1449  ;;  %v1448_v15 = vpop.permute.xlu1 %1447 }
 0x3a3   :  { %v1451_v48 = vsel %vm3272_vm12, %v1448_v15, %v1450_v45 }
 0x3a4   :  { %1456 = vrot.lane.b32.xlu1 %v1451_v48, %s2937_s3  ;;  %1454 = vrot.lane.b32.xlu0 %v1451_v48, %s2938_s9 }
 0x3a8   :  { %1460 = vperm.xlu0 %2846, %v3090_v33  }
 0x3ac   :  { %2848 = vset.pattern.permute.xlu0 %v2936_v39 }
 0x3ad   :  { %1496 = vperm.xlu0 %2848, %v3286_v4  }
 0x3b3   :  { %v1466_v40 = vpop.permute.xlu1 %1465 }
 0x416   :  { %v1455_v50 = vpop.permute.xlu0 %1454  ;;  %v1457_v51 = vpop.permute.xlu1 %1456 }
 0x417   :  { %v1458_v52 = vsel %vm3337_vm9, %v1455_v50, %v1457_v51  ;;  %v2943_v51 = vmov 12  }
 0x418   :  { %v1468_v53 = vmul.f32 %v1466_v40, %v1458_v52 }
 0x41a   :  { %1469 = vrot.lane.b32.xlu1 %v1468_v53, %s2933_s6 }
 0x41e   :  { %1492 = vperm.xlu1 %2847, %v3260_v59  }
 0x422   :  { %1501 = vperm.xlu1 %2847, %v3292_v2  }
 0x427   :  { %v1461_v62 = vpop.permute.xlu0 %1460 }
 0x428   :  { %v1463_v46 = vmul.f32 %v1461_v62, %v1446_v38 }
 0x42c   :  { %v1497_v54 = vpop.permute.xlu0 %1496 }
 0x48c   :  { %v1470_v61 = vpop.permute.xlu1 %1469 }
 0x48d   :  { %v1471_v27 = vmul.f32 %v1470_v61, %v3296_v7 }
 0x48f   :  { %v1472_v55 = vsub.f32 %v1463_v46, %v1471_v27 }
 0x491   :  { %1507 = vrot.lane.b32.xlu0 %v1472_v55, %s2925_s5  ;;  %1505 = vrot.lane.b32.xlu1 %v1472_v55, %s2924_s30 }
 0x495   :  { %1478 = vperm.xlu0 %2848, %v3090_v33   ;;  %1474 = vperm.xlu1 %2847, %v3305_v14  }
 0x499   :  { %1487 = vperm.xlu0 %2848, %v3270_v9   ;;  %1483 = vperm.xlu1 %2847, %v3311_v16  }
 0x49d   :  { %v1493_v56 = vpop.permute.xlu1 %1492  ;;  %2849 = vset.pattern.permute.xlu0 %v2939_v0  ;;  %2851 = vset.pattern.permute.xlu1 %v2940_v28 }
 0x49e   :  { %v1499_v8 = vsel %vm3272_vm12, %v1493_v56, %v1497_v54 }
 0x4a1   :  { %v1502_v63 = vpop.permute.xlu1 %1501 }
 0x4a2   :  { %v1504_v1 = vsel %vm3272_vm12, %v1502_v63, 0.0 }
 0x4a3   :  { %v1514_v43 = vmul.f32 %v1504_v1, %v1472_v55 }
 0x503   :  { %v1508_v3 = vpop.permute.xlu0 %1507  ;;  %v1506_v36 = vpop.permute.xlu1 %1505 }
 0x504   :  { %v1509_v44 = vsel %vm3272_vm12, %v1506_v36, %v1508_v3 }
 0x505   :  { %v1513_v11 = vmul.f32 %v1509_v44, %v1499_v8 }
 0x507   :  { %v1515_v13 = vadd.f32 %v1514_v43, %v1513_v11 }
 0x509   :  { %1516 = vrot.lane.b32.xlu1 %v1515_v13, %s2933_s6 }
 0x514   :  { %v1479_v31 = vpop.permute.xlu0 %1478  ;;  %v1475_v17 = vpop.permute.xlu1 %1474 }
 0x515   :  { %v1481_v20 = vsel %vm3272_vm12, %v1475_v17, %v1479_v31  ;;  %v2944_v31 = vmov 13  }
 0x516   :  { %v1510_v60 = vmul.f32 %v1481_v20, %v1472_v55 }
 0x518   :  { %v1488_v5 = vpop.permute.xlu0 %1487  ;;  %v1484_v19 = vpop.permute.xlu1 %1483 }
 0x519   :  { %v1490_v41 = vsel %vm3272_vm12, %v1484_v19, %v1488_v5 }
 0x51a   :  { %v1511_v21 = vmul.f32 %v1509_v44, %v1490_v41  ;;  %v1598_v41 = vand.u32 2, %v3045_v47 }
 0x51c   :  { %v1512_v10 = vadd.f32 %v1511_v21, %v1510_v60  ;;  %vm3413_vm11 = vcmp.ne.s32.totalorder %v1598_v41, 0 }
 0x57b   :  { %v1517_v58 = vpop.permute.xlu1 %1516 }
 0x57c   :  { %v1518_v22 = vmul.f32 %v1517_v58, %v3296_v7 }
 0x57e   :  { %v1519_v23 = vadd.f32 %v1518_v22, %v1512_v10 }
 0x580   :  { %1522 = vrot.lane.b32.xlu1 %v1519_v23, %s2937_s3  ;;  %1520 = vrot.lane.b32.xlu0 %v1519_v23, %s2938_s9 }
 0x584   :  { %1538 = vperm.xlu0 %2849, %v3092_v34  }
 0x588   :  { %1533 = vperm.xlu0 %2849, %v3090_v33  }
 0x58c   :  { %2850 = vset.pattern.permute.xlu0 %v2940_v28 }
 0x58d   :  { %1565 = vperm.xlu0 %2850, %v3260_v59  }
 0x5f2   :  { %v1523_v37 = vpop.permute.xlu1 %1522  ;;  %v1521_v24 = vpop.permute.xlu0 %1520 }
 0x5f3   :  { %v1524_v25 = vsel %vm3337_vm9, %v1521_v24, %v1523_v37 }
 0x5f4   :  { %1527 = vrot.lane.b32.xlu1 %v1524_v25, %s2941_s10 }
 0x5f8   :  { %1529 = vrot.lane.b32.xlu1 %v1524_v25, %s2942_s11 }
 0x603   :  { %v1539_v18 = vpop.permute.xlu0 %1538 }
 0x607   :  { %v1534_v38 = vpop.permute.xlu0 %1533 }
 0x608   :  { %v1536_v45 = vmul.f32 %v1534_v38, %v1519_v23 }
 0x60c   :  { %v1566_v40 = vpop.permute.xlu0 %1565 }
 0x666   :  { %v1528_v12 = vpop.permute.xlu1 %1527 }
 0x66a   :  { %v1530_v30 = vpop.permute.xlu1 %1529 }
 0x66b   :  { %v1531_v32 = vsel %vm3375_vm10, %v1528_v12, %v1530_v30 }
 0x66c   :  { %v1541_v35 = vmul.f32 %v1539_v18, %v1531_v32  ;;  %v2946_v32 = vmov 16  }
 0x66e   :  { %1542 = vrot.lane.b32.xlu1 %v1541_v35, %s2933_s6 }
 0x672   :  { %1569 = vperm.xlu1 %2851, %v3286_v4  }
 0x676   :  { %1574 = vperm.xlu1 %2851, %v3292_v2  }
 0x6e0   :  { %v1543_v39 = vpop.permute.xlu1 %1542 }
 0x6e1   :  { %v1544_v15 = vmul.f32 %v1543_v39, %v3296_v7 }
 0x6e3   :  { %v1545_v48 = vsub.f32 %v1536_v45, %v1544_v15 }
 0x6e5   :  { %1580 = vrot.lane.b32.xlu1 %v1545_v48, %s2937_s3  ;;  %1578 = vrot.lane.b32.xlu0 %v1545_v48, %s2938_s9 }
 0x6e9   :  { %1551 = vperm.xlu1 %2851, %v3090_v33   ;;  %1547 = vperm.xlu0 %2850, %v3305_v14  }
 0x6ed   :  { %1560 = vperm.xlu1 %2851, %v3270_v9   ;;  %1556 = vperm.xlu0 %2850, %v3311_v16  }
 0x6f1   :  { %v1570_v42 = vpop.permute.xlu1 %1569  ;;  %2852 = vset.pattern.permute.xlu1 %v2943_v51  ;;  %2853 = vset.pattern.permute.xlu0 %v2943_v51 }
 0x6f2   :  { %v1572_v61 = vsel %vm3337_vm9, %v1566_v40, %v1570_v42 }
 0x6f5   :  { %v1575_v50 = vpop.permute.xlu1 %1574 }
 0x6f6   :  { %v1577_v52 = vsel %vm3337_vm9, %v1575_v50, 0.0  ;;  %v2947_v50 = vmov 17  }
 0x6f7   :  { %v1587_v27 = vmul.f32 %v1577_v52, %v1545_v48 }
 0x757   :  { %v1581_v53 = vpop.permute.xlu1 %1580  ;;  %v1579_v62 = vpop.permute.xlu0 %1578 }
 0x758   :  { %v1582_v46 = vsel %vm3337_vm9, %v1579_v62, %v1581_v53 }
 0x759   :  { %v1586_v55 = vmul.f32 %v1582_v46, %v1572_v61 }
 0x75b   :  { %v1588_v56 = vadd.f32 %v1587_v27, %v1586_v55 }
 0x75d   :  { %1589 = vrot.lane.b32.xlu0 %v1588_v56, %s2933_s6 }
 0x768   :  { %v1552_v54 = vpop.permute.xlu1 %1551  ;;  %v1548_v63 = vpop.permute.xlu0 %1547 }
 0x769   :  { %v1554_v36 = vsel %vm3337_vm9, %v1548_v63, %v1552_v54 }
 0x76a   :  { %v1583_v44 = vmul.f32 %v1554_v36, %v1545_v48 }
 0x76c   :  { %v1561_v0 = vpop.permute.xlu1 %1560  ;;  %v1557_v1 = vpop.permute.xlu0 %1556 }
 0x76d   :  { %v1563_v3 = vsel %vm3337_vm9, %v1557_v1, %v1561_v0 }
 0x76e   :  { %v1584_v8 = vmul.f32 %v1582_v46, %v1563_v3 }
 0x770   :  { %v1585_v11 = vadd.f32 %v1584_v8, %v1583_v44  ;;  %v1671_v8 = vand.u32 1, %v3045_v47 }
 0x772   :  { %vm3451_vm13 = vcmp.ne.s32.totalorder %v1671_v8, 0 }
 0x7cf   :  { %v1590_v43 = vpop.permute.xlu0 %1589 }
 0x7d0   :  { %v1591_v13 = vmul.f32 %v1590_v43, %v3296_v7 }
 0x7d2   :  { %v1592_v28 = vadd.f32 %v1591_v13, %v1585_v11 }
 0x7d4   :  { %1595 = vrot.lane.b32.xlu0 %v1592_v28, %s2942_s11  ;;  %1593 = vrot.lane.b32.xlu1 %v1592_v28, %s2941_s10 }
 0x7d8   :  { %1611 = vperm.xlu1 %2852, %v3092_v34  }
 0x7dc   :  { %2854 = vset.pattern.permute.xlu1 %v2944_v31 }
 0x846   :  { %v1596_v17 = vpop.permute.xlu0 %1595  ;;  %v1594_v5 = vpop.permute.xlu1 %1593 }
 0x847   :  { %v1597_v19 = vsel %vm3375_vm10, %v1594_v5, %v1596_v17 }
 0x848   :  { %1602 = vrot.lane.b32.xlu1 %v1597_v19, %s2923_s2  ;;  %1600 = vrot.lane.b32.xlu0 %v1597_v19, %s2945_s12 }
 0x84c   :  { %1606 = vperm.xlu0 %2853, %v3090_v33  }
 0x850   :  { %2855 = vset.pattern.permute.xlu0 %v2944_v31 }
 0x851   :  { %1642 = vperm.xlu0 %2855, %v3286_v4  }
 0x857   :  { %v1612_v20 = vpop.permute.xlu1 %1611 }
 0x8ba   :  { %v1601_v60 = vpop.permute.xlu0 %1600  ;;  %v1603_v58 = vpop.permute.xlu1 %1602 }
 0x8bb   :  { %v1604_v10 = vsel %vm3413_vm11, %v1601_v60, %v1603_v58 }
 0x8bc   :  { %v1614_v22 = vmul.f32 %v1612_v20, %v1604_v10  ;;  %v2949_v20 = vmov 20  }
 0x8be   :  { %1615 = vrot.lane.b32.xlu1 %v1614_v22, %s2933_s6 }
 0x8c2   :  { %1638 = vperm.xlu1 %2854, %v3260_v59  }
 0x8c6   :  { %1647 = vperm.xlu1 %2854, %v3292_v2  }
 0x8cb   :  { %v1607_v23 = vpop.permute.xlu0 %1606 }
 0x8cc   :  { %v1609_v24 = vmul.f32 %v1607_v23, %v1592_v28 }
 0x8d0   :  { %v1643_v30 = vpop.permute.xlu0 %1642 }
 0x930   :  { %v1616_v37 = vpop.permute.xlu1 %1615 }
 0x931   :  { %v1617_v25 = vmul.f32 %v1616_v37, %v3296_v7 }
 0x933   :  { %v1618_v6 = vsub.f32 %v1609_v24, %v1617_v25 }
 0x935   :  { %1653 = vrot.lane.b32.xlu0 %v1618_v6, %s2942_s11  ;;  %1651 = vrot.lane.b32.xlu1 %v1618_v6, %s2941_s10 }
 0x939   :  { %1624 = vperm.xlu0 %2855, %v3090_v33   ;;  %1620 = vperm.xlu1 %2854, %v3305_v14  }
 0x93d   :  { %1633 = vperm.xlu0 %2855, %v3270_v9   ;;  %1629 = vperm.xlu1 %2854, %v3311_v16  }
 0x941   :  { %v1639_v12 = vpop.permute.xlu1 %1638  ;;  %2856 = vset.pattern.permute.xlu0 %v2946_v32  ;;  %2858 = vset.pattern.permute.xlu1 %v2947_v50 }
 0x942   :  { %v1645_v45 = vsel %vm3375_vm10, %v1639_v12, %v1643_v30 }
 0x945   :  { %v1648_v18 = vpop.permute.xlu1 %1647 }
 0x946   :  { %v1650_v35 = vsel %vm3375_vm10, %v1648_v18, 0.0 }
 0x947   :  { %v1660_v48 = vmul.f32 %v1650_v35, %v1618_v6 }
 0x9a7   :  { %v1654_v38 = vpop.permute.xlu0 %1653  ;;  %v1652_v39 = vpop.permute.xlu1 %1651 }
 0x9a8   :  { %v1655_v15 = vsel %vm3375_vm10, %v1652_v39, %v1654_v38 }
 0x9a9   :  { %v1659_v42 = vmul.f32 %v1655_v15, %v1645_v45 }
 0x9ab   :  { %v1661_v40 = vadd.f32 %v1660_v48, %v1659_v42 }
 0x9ad   :  { %1662 = vrot.lane.b32.xlu1 %v1661_v40, %s2933_s6 }
 0x9b8   :  { %v1625_v51 = vpop.permute.xlu0 %1624  ;;  %v1621_v52 = vpop.permute.xlu1 %1620 }
 0x9b9   :  { %v1627_v46 = vsel %vm3375_vm10, %v1621_v52, %v1625_v51 }
 0x9ba   :  { %v1656_v55 = vmul.f32 %v1627_v46, %v1618_v6 }
 0x9bc   :  { %v1634_v53 = vpop.permute.xlu0 %1633  ;;  %v1630_v62 = vpop.permute.xlu1 %1629 }
 0x9bd   :  { %v1636_v61 = vsel %vm3375_vm10, %v1630_v62, %v1634_v53 }
 0x9be   :  { %v1657_v27 = vmul.f32 %v1655_v15, %v1636_v61  ;;  %v2950_v61 = vmov 23  }
 0x9c0   :  { %v1658_v54 = vadd.f32 %v1657_v27, %v1656_v55 }
 0xa1f   :  { %v1663_v56 = vpop.permute.xlu1 %1662 }
 0xa20   :  { %v1664_v63 = vmul.f32 %v1663_v56, %v3296_v7 }
 0xa22   :  { %v1665_v0 = vadd.f32 %v1664_v63, %v1658_v54 }
 0xa24   :  { %1668 = vrot.lane.b32.xlu1 %v1665_v0, %s2923_s2  ;;  %1666 = vrot.lane.b32.xlu0 %v1665_v0, %s2945_s12 }
 0xa28   :  { %1684 = vperm.xlu0 %2856, %v3092_v34  }
 0xa2c   :  { %1679 = vperm.xlu0 %2856, %v3090_v33  }
 0xa30   :  { %2857 = vset.pattern.permute.xlu0 %v2947_v50 }
 0xa31   :  { %1711 = vperm.xlu0 %2857, %v3260_v59  }
 0xa96   :  { %v1669_v1 = vpop.permute.xlu1 %1668  ;;  %v1667_v3 = vpop.permute.xlu0 %1666 }
 0xa97   :  { %v1670_v36 = vsel %vm3413_vm11, %v1667_v3, %v1669_v1  ;;  %v2951_v3 = vmov 24  }
 0xa98   :  { %1673 = vrot.lane.b32.xlu1 %v1670_v36, %s2948_s13 }
 0xa9c   :  { %1675 = vrot.lane.b32.xlu1 %v1670_v36, %s2922_s29 }
 0xaa7   :  { %v1685_v13 = vpop.permute.xlu0 %1684 }
 0xaab   :  { %v1680_v17 = vpop.permute.xlu0 %1679 }
 0xaac   :  { %v1682_v47 = vmul.f32 %v1680_v17, %v1665_v0 }
 0xab0   :  { %v1712_v58 = vpop.permute.xlu0 %1711 }
 0xb0a   :  { %v1674_v44 = vpop.permute.xlu1 %1673 }
 0xb0e   :  { %v1676_v11 = vpop.permute.xlu1 %1675 }
 0xb0f   :  { %v1677_v28 = vsel %vm3451_vm13, %v1674_v44, %v1676_v11 }
 0xb10   :  { %v1687_v31 = vmul.f32 %v1685_v13, %v1677_v28 }
 0xb12   :  { %1688 = vrot.lane.b32.xlu1 %v1687_v31, %s2933_s6 }
 0xb16   :  { %1715 = vperm.xlu1 %2858, %v3286_v4  }
 0xb1a   :  { %1720 = vperm.xlu1 %2858, %v3292_v2  }
 0xb84   :  { %v1689_v5 = vpop.permute.xlu1 %1688 }
 0xb85   :  { %v1690_v19 = vmul.f32 %v1689_v5, %v3296_v7 }
 0xb87   :  { %v1691_v41 = vsub.f32 %v1682_v47, %v1690_v19 }
 0xb89   :  { %1726 = vrot.lane.b32.xlu1 %v1691_v41, %s2923_s2  ;;  %1724 = vrot.lane.b32.xlu0 %v1691_v41, %s2945_s12 }
 0xb8d   :  { %1697 = vperm.xlu1 %2858, %v3090_v33   ;;  %1693 = vperm.xlu0 %2857, %v3305_v14  }
 0xb91   :  { %1706 = vperm.xlu1 %2858, %v3270_v9   ;;  %1702 = vperm.xlu0 %2857, %v3311_v16  }
 0xb95   :  { %2859 = vset.pattern.permute.xlu1 %v2949_v20  ;;  %2860 = vset.pattern.permute.xlu0 %v2949_v20  ;;  %v1716_v60 = vpop.permute.xlu1 %1715 }
 0xb96   :  { %1758 = vperm.xlu1 %2859, %v3260_v59   ;;  %v1718_v24 = vsel %vm3413_vm11, %v1712_v58, %v1716_v60 }
 0xb99   :  { %v1721_v10 = vpop.permute.xlu1 %1720 }
 0xb9a   :  { %1767 = vperm.xlu1 %2859, %v3292_v2   ;;  %v1723_v22 = vsel %vm3413_vm11, %v1721_v10, 0.0 }
 0xb9b   :  { %v1733_v6 = vmul.f32 %v1723_v22, %v1691_v41 }
 0xbfb   :  { %v1727_v23 = vpop.permute.xlu1 %1726  ;;  %v1725_v37 = vpop.permute.xlu0 %1724 }
 0xbfc   :  { %v1728_v25 = vsel %vm3413_vm11, %v1725_v37, %v1727_v23 }
 0xbfd   :  { %v1732_v12 = vmul.f32 %v1728_v25, %v1718_v24 }
 0xbff   :  { %v1734_v30 = vadd.f32 %v1733_v6, %v1732_v12 }
 0xc01   :  { %1735 = vrot.lane.b32.xlu0 %v1734_v30, %s2933_s6 }
 0xc05   :  { %1762 = vperm.xlu0 %2860, %v3286_v4  }
 0xc0c   :  { %v1698_v18 = vpop.permute.xlu1 %1697  ;;  %v1694_v32 = vpop.permute.xlu0 %1693 }
 0xc0d   :  { %v1700_v45 = vsel %vm3413_vm11, %v1694_v32, %v1698_v18 }
 0xc0e   :  { %v1729_v48 = vmul.f32 %v1700_v45, %v1691_v41 }
 0xc10   :  { %v1707_v35 = vpop.permute.xlu1 %1706  ;;  %v1703_v38 = vpop.permute.xlu0 %1702 }
 0xc11   :  { %v1709_v39 = vsel %vm3413_vm11, %v1703_v38, %v1707_v35 }
 0xc12   :  { %v1730_v15 = vmul.f32 %v1728_v25, %v1709_v39  ;;  %v2952_v39 = vmov 27  }
 0xc14   :  { %v1731_v40 = vadd.f32 %v1730_v15, %v1729_v48 }
 0xc15   :  { %v1759_v52 = vpop.permute.xlu1 %1758 }
 0xc19   :  { %v1768_v53 = vpop.permute.xlu1 %1767 }
 0xc1a   :  { %v1770_v55 = vsel %vm3451_vm13, %v1768_v53, 0.0 }
 0xc73   :  { %v1736_v42 = vpop.permute.xlu0 %1735 }
 0xc74   :  { %v1737_v50 = vmul.f32 %v1736_v42, %v3296_v7 }
 0xc76   :  { %v1738_v51 = vadd.f32 %v1737_v50, %v1731_v40 }
 0xc78   :  { %1773 = vrot.lane.b32.xlu0 %v1738_v51, %s2922_s29  ;;  %1771 = vrot.lane.b32.xlu1 %v1738_v51, %s2948_s13  ;;  %v1780_v63 = vmul.f32 %v1770_v55, %v1738_v51 }
 0xc7c   :  { %1744 = vperm.xlu0 %2860, %v3090_v33   ;;  %1740 = vperm.xlu1 %2859, %v3305_v14  }
 0xc80   :  { %1753 = vperm.xlu0 %2860, %v3270_v9   ;;  %1749 = vperm.xlu1 %2859, %v3311_v16  }
 0xc84   :  { %v1763_v62 = vpop.permute.xlu0 %1762  ;;  %2861 = vset.pattern.permute.xlu0 %v2950_v61  ;;  %2863 = vset.pattern.permute.xlu1 %v2951_v3 }
 0xc85   :  { %v1765_v56 = vsel %vm3451_vm13, %v1759_v52, %v1763_v62 }
 0xcea   :  { %v1772_v46 = vpop.permute.xlu1 %1771  ;;  %v1774_v27 = vpop.permute.xlu0 %1773 }
 0xceb   :  { %v1775_v54 = vsel %vm3451_vm13, %v1772_v46, %v1774_v27 }
 0xcec   :  { %v1779_v0 = vmul.f32 %v1775_v54, %v1765_v56 }
 0xcee   :  { %v1781_v1 = vadd.f32 %v1780_v63, %v1779_v0 }
 0xcf0   :  { %1782 = vrot.lane.b32.xlu1 %v1781_v1, %s2933_s6 }
 0xcfb   :  { %v1741_v36 = vpop.permute.xlu1 %1740  ;;  %v1745_v8 = vpop.permute.xlu0 %1744 }
 0xcfc   :  { %v1747_v28 = vsel %vm3451_vm13, %v1741_v36, %v1745_v8  ;;  %v2953_v36 = vmov 28  }
 0xcfd   :  { %v1776_v17 = vmul.f32 %v1747_v28, %v1738_v51 }
 0xcff   :  { %v1750_v44 = vpop.permute.xlu1 %1749  ;;  %v1754_v11 = vpop.permute.xlu0 %1753 }
 0xd00   :  { %v1756_v13 = vsel %vm3451_vm13, %v1750_v44, %v1754_v11 }
 0xd01   :  { %v1777_v31 = vmul.f32 %v1775_v54, %v1756_v13 }
 0xd03   :  { %v1778_v47 = vadd.f32 %v1777_v31, %v1776_v17 }
 0xd62   :  { %v1783_v5 = vpop.permute.xlu1 %1782 }
 0xd63   :  { %v1784_v19 = vmul.f32 %v1783_v5, %v3296_v7 }
 0xd65   :  { %v1785_v41 = vadd.f32 %v1784_v19, %v1778_v47 }
 0xd67   :  { %1788 = vrot.lane.b32.xlu1 %v1785_v41, %s2920_s0  ;;  %1786 = vrot.lane.b32.xlu0 %v1785_v41, %s2919_s1 }
 0xd6b   :  { %1802 = vperm.xlu0 %2861, %v3092_v34  }
 0xd6f   :  { %1797 = vperm.xlu0 %2861, %v3090_v33  }
 0xd73   :  { %2862 = vset.pattern.permute.xlu0 %v2951_v3 }
 0xd74   :  { %1829 = vperm.xlu0 %2862, %v3260_v59  }
 0xdd9   :  { %v1789_v20 = vpop.permute.xlu1 %1788  ;;  %v1787_v60 = vpop.permute.xlu0 %1786 }
 0xdda   :  { %v1790_v58 = vsel %vm3052_vm2, %v1787_v60, %v1789_v20 }
 0xddb   :  { %1791 = vrot.lane.b32.xlu1 %v1790_v58, %s2924_s30 }
 0xddf   :  { %1793 = vrot.lane.b32.xlu1 %v1790_v58, %s2925_s5 }
 0xdea   :  { %v1803_v23 = vpop.permute.xlu0 %1802 }
 0xdee   :  { %v1798_v25 = vpop.permute.xlu0 %1797 }
 0xdef   :  { %v1800_v12 = vmul.f32 %v1798_v25, %v1785_v41 }
 0xdf3   :  { %v1830_v35 = vpop.permute.xlu0 %1829 }
 0xe4d   :  { %v1792_v10 = vpop.permute.xlu1 %1791 }
 0xe51   :  { %v1794_v22 = vpop.permute.xlu1 %1793 }
 0xe52   :  { %v1795_v37 = vsel %vm3272_vm12, %v1792_v10, %v1794_v22 }
 0xe53   :  { %v1805_v24 = vmul.f32 %v1803_v23, %v1795_v37  ;;  %v2954_v23 = vmov 31  }
 0xe55   :  { %1806 = vrot.lane.b32.xlu1 %v1805_v24, %s2933_s6 }
 0xe59   :  { %1833 = vperm.xlu1 %2863, %v3286_v4  }
 0xe5d   :  { %1838 = vperm.xlu1 %2863, %v3292_v2  }
 0xec7   :  { %v1807_v6 = vpop.permute.xlu1 %1806 }
 0xec8   :  { %v1808_v30 = vmul.f32 %v1807_v6, %v3296_v7 }
 0xeca   :  { %v1809_v18 = vsub.f32 %v1800_v12, %v1808_v30 }
 0xecc   :  { %1844 = vrot.lane.b32.xlu1 %v1809_v18, %s2920_s0  ;;  %1842 = vrot.lane.b32.xlu0 %v1809_v18, %s2919_s1 }
 0xed0   :  { %1815 = vperm.xlu1 %2863, %v3090_v33   ;;  %1811 = vperm.xlu0 %2862, %v3305_v14  }
 0xed4   :  { %1824 = vperm.xlu1 %2863, %v3270_v9   ;;  %1820 = vperm.xlu0 %2862, %v3311_v16  }
 0xed8   :  { %v1834_v32 = vpop.permute.xlu1 %1833  ;;  %2864 = vset.pattern.permute.xlu1 %v2952_v39  ;;  %2865 = vset.pattern.permute.xlu0 %v2952_v39 }
 0xed9   :  { %v1836_v42 = vsel %vm3052_vm2, %v1830_v35, %v1834_v32  ;;  %v2955_v35 = vmov 32  }
 0xedc   :  { %v1839_v38 = vpop.permute.xlu1 %1838 }
 0xedd   :  { %v1841_v45 = vsel %vm3052_vm2, %v1839_v38, 0.0 }
 0xede   :  { %v1851_v50 = vmul.f32 %v1841_v45, %v1809_v18 }
 0xf3e   :  { %v1845_v15 = vpop.permute.xlu1 %1844  ;;  %v1843_v48 = vpop.permute.xlu0 %1842 }
 0xf3f   :  { %v1846_v40 = vsel %vm3052_vm2, %v1843_v48, %v1845_v15 }
 0xf40   :  { %v1850_v51 = vmul.f32 %v1846_v40, %v1836_v42 }
 0xf42   :  { %v1852_v52 = vadd.f32 %v1851_v50, %v1850_v51 }
 0xf44   :  { %1853 = vrot.lane.b32.xlu0 %v1852_v52, %s2933_s6 }
 0xf4f   :  { %v1816_v53 = vpop.permute.xlu1 %1815  ;;  %v1812_v62 = vpop.permute.xlu0 %1811 }
 0xf50   :  { %v1818_v55 = vsel %vm3052_vm2, %v1812_v62, %v1816_v53 }
 0xf51   :  { %v1847_v54 = vmul.f32 %v1818_v55, %v1809_v18 }
 0xf53   :  { %v1825_v61 = vpop.permute.xlu1 %1824  ;;  %v1821_v46 = vpop.permute.xlu0 %1820 }
 0xf54   :  { %v1827_v27 = vsel %vm3052_vm2, %v1821_v46, %v1825_v61 }
 0xf55   :  { %v1848_v56 = vmul.f32 %v1846_v40, %v1827_v27 }
 0xf57   :  { %v1849_v0 = vadd.f32 %v1848_v56, %v1847_v54 }
 0xfb6   :  { %v1854_v63 = vpop.permute.xlu0 %1853 }
 0xfb7   :  { %v1855_v1 = vmul.f32 %v1854_v63, %v3296_v7 }
 0xfb9   :  { %v1856_v3 = vadd.f32 %v1855_v1, %v1849_v0 }
 0xfbb   :  { %1859 = vrot.lane.b32.xlu0 %v1856_v3, %s2925_s5  ;;  %1857 = vrot.lane.b32.xlu1 %v1856_v3, %s2924_s30 }
 0xfbf   :  { %1873 = vperm.xlu1 %2864, %v3092_v34  }
 0xfc3   :  { %2866 = vset.pattern.permute.xlu1 %v2953_v36 }
0x102d   :  { %v1860_v8 = vpop.permute.xlu0 %1859  ;;  %v1858_v44 = vpop.permute.xlu1 %1857 }
0x102e   :  { %v1861_v11 = vsel %vm3272_vm12, %v1858_v44, %v1860_v8 }
0x102f   :  { %1864 = vrot.lane.b32.xlu1 %v1861_v11, %s2937_s3  ;;  %1862 = vrot.lane.b32.xlu0 %v1861_v11, %s2938_s9 }
0x1033   :  { %1868 = vperm.xlu0 %2865, %v3090_v33  }
0x1037   :  { %2867 = vset.pattern.permute.xlu0 %v2953_v36 }
0x1038   :  { %1904 = vperm.xlu0 %2867, %v3286_v4  }
0x103e   :  { %v1874_v13 = vpop.permute.xlu1 %1873 }
0x10a1   :  { %v1863_v28 = vpop.permute.xlu0 %1862  ;;  %v1865_v31 = vpop.permute.xlu1 %1864 }
0x10a2   :  { %v1866_v17 = vsel %vm3337_vm9, %v1863_v28, %v1865_v31  ;;  %v2956_v31 = vmov 35  }
0x10a3   :  { %v1876_v5 = vmul.f32 %v1874_v13, %v1866_v17 }
0x10a5   :  { %1877 = vrot.lane.b32.xlu1 %v1876_v5, %s2933_s6 }
0x10a9   :  { %1900 = vperm.xlu1 %2866, %v3260_v59  }
0x10ad   :  { %1909 = vperm.xlu1 %2866, %v3292_v2  }
0x10b2   :  { %v1869_v47 = vpop.permute.xlu0 %1868 }
0x10b3   :  { %v1871_v41 = vmul.f32 %v1869_v47, %v1856_v3 }
0x10b7   :  { %v1905_v10 = vpop.permute.xlu0 %1904 }
0x1117   :  { %v1878_v19 = vpop.permute.xlu1 %1877 }
0x1118   :  { %v1879_v20 = vmul.f32 %v1878_v19, %v3296_v7 }
0x111a   :  { %v1880_v60 = vsub.f32 %v1871_v41, %v1879_v20 }
0x111c   :  { %1915 = vrot.lane.b32.xlu0 %v1880_v60, %s2925_s5  ;;  %1913 = vrot.lane.b32.xlu1 %v1880_v60, %s2924_s30 }
0x1120   :  { %1886 = vperm.xlu0 %2867, %v3090_v33   ;;  %1882 = vperm.xlu1 %2866, %v3305_v14  }
0x1124   :  { %1895 = vperm.xlu0 %2867, %v3270_v9   ;;  %1891 = vperm.xlu1 %2866, %v3311_v16  }
0x1128   :  { %v1901_v58 = vpop.permute.xlu1 %1900  ;;  %2868 = vset.pattern.permute.xlu0 %v2954_v23  ;;  %2870 = vset.pattern.permute.xlu1 %v2955_v35 }
0x1129   :  { %v1907_v6 = vsel %vm3272_vm12, %v1901_v58, %v1905_v10 }
0x112c   :  { %v1910_v22 = vpop.permute.xlu1 %1909 }
0x112d   :  { %v1912_v37 = vsel %vm3272_vm12, %v1910_v22, 0.0 }
0x112e   :  { %v1922_v30 = vmul.f32 %v1912_v37, %v1880_v60 }
0x118e   :  { %v1916_v24 = vpop.permute.xlu0 %1915  ;;  %v1914_v25 = vpop.permute.xlu1 %1913 }
0x118f   :  { %v1917_v12 = vsel %vm3272_vm12, %v1914_v25, %v1916_v24 }
0x1190   :  { %v1921_v18 = vmul.f32 %v1917_v12, %v1907_v6 }
0x1192   :  { %v1923_v32 = vadd.f32 %v1922_v30, %v1921_v18 }
0x1194   :  { %1924 = vrot.lane.b32.xlu1 %v1923_v32, %s2933_s6 }
0x119f   :  { %v1887_v38 = vpop.permute.xlu0 %1886  ;;  %v1883_v39 = vpop.permute.xlu1 %1882 }
0x11a0   :  { %v1889_v42 = vsel %vm3272_vm12, %v1883_v39, %v1887_v38  ;;  %v2957_v38 = vmov 36  }
0x11a1   :  { %v1918_v50 = vmul.f32 %v1889_v42, %v1880_v60 }
0x11a3   :  { %v1896_v45 = vpop.permute.xlu0 %1895  ;;  %v1892_v15 = vpop.permute.xlu1 %1891 }
0x11a4   :  { %v1898_v48 = vsel %vm3272_vm12, %v1892_v15, %v1896_v45 }
0x11a5   :  { %v1919_v40 = vmul.f32 %v1917_v12, %v1898_v48 }
0x11a7   :  { %v1920_v52 = vadd.f32 %v1919_v40, %v1918_v50 }
0x1206   :  { %v1925_v51 = vpop.permute.xlu1 %1924 }
0x1207   :  { %v1926_v53 = vmul.f32 %v1925_v51, %v3296_v7 }
0x1209   :  { %v1927_v62 = vadd.f32 %v1926_v53, %v1920_v52 }
0x120b   :  { %1930 = vrot.lane.b32.xlu1 %v1927_v62, %s2937_s3  ;;  %1928 = vrot.lane.b32.xlu0 %v1927_v62, %s2938_s9 }
0x120f   :  { %1944 = vperm.xlu0 %2868, %v3092_v34  }
0x1213   :  { %1939 = vperm.xlu0 %2868, %v3090_v33  }
0x1217   :  { %2869 = vset.pattern.permute.xlu0 %v2955_v35 }
0x1218   :  { %1971 = vperm.xlu0 %2869, %v3260_v59  }
0x127d   :  { %v1931_v61 = vpop.permute.xlu1 %1930  ;;  %v1929_v46 = vpop.permute.xlu0 %1928 }
0x127e   :  { %v1932_v27 = vsel %vm3337_vm9, %v1929_v46, %v1931_v61 }
0x127f   :  { %1933 = vrot.lane.b32.xlu1 %v1932_v27, %s2941_s10 }
0x1283   :  { %1935 = vrot.lane.b32.xlu1 %v1932_v27, %s2942_s11 }
0x128e   :  { %v1945_v54 = vpop.permute.xlu0 %1944 }
0x1292   :  { %v1940_v1 = vpop.permute.xlu0 %1939 }
0x1293   :  { %v1942_v36 = vmul.f32 %v1940_v1, %v1927_v62 }
0x1297   :  { %v1972_v13 = vpop.permute.xlu0 %1971 }
0x12f1   :  { %v1934_v55 = vpop.permute.xlu1 %1933 }
0x12f5   :  { %v1936_v56 = vpop.permute.xlu1 %1935 }
0x12f6   :  { %v1937_v63 = vsel %vm3375_vm10, %v1934_v55, %v1936_v56 }
0x12f7   :  { %v1947_v0 = vmul.f32 %v1945_v54, %v1937_v63  ;;  %v2958_v54 = vmov 39  }
0x12f9   :  { %1948 = vrot.lane.b32.xlu1 %v1947_v0, %s2933_s6 }
0x12fd   :  { %1975 = vperm.xlu1 %2870, %v3286_v4  }
0x1301   :  { %1980 = vperm.xlu1 %2870, %v3292_v2  }
0x136b   :  { %v1949_v3 = vpop.permute.xlu1 %1948 }
0x136c   :  { %v1950_v8 = vmul.f32 %v1949_v3, %v3296_v7 }
0x136e   :  { %v1951_v44 = vsub.f32 %v1942_v36, %v1950_v8 }
0x1370   :  { %1986 = vrot.lane.b32.xlu1 %v1951_v44, %s2937_s3  ;;  %1984 = vrot.lane.b32.xlu0 %v1951_v44, %s2938_s9 }
0x1374   :  { %1957 = vperm.xlu1 %2870, %v3090_v33   ;;  %1953 = vperm.xlu0 %2869, %v3305_v14  }
0x1378   :  { %1966 = vperm.xlu1 %2870, %v3270_v9   ;;  %1962 = vperm.xlu0 %2869, %v3311_v16  }
0x137c   :  { %v1976_v11 = vpop.permute.xlu1 %1975  ;;  %2871 = vset.pattern.permute.xlu1 %v2956_v31  ;;  %2872 = vset.pattern.permute.xlu0 %v2956_v31 }
0x137d   :  { %v1978_v19 = vsel %vm3337_vm9, %v1972_v13, %v1976_v11  ;;  %v2959_v13 = vmov 40  }
0x1380   :  { %v1981_v28 = vpop.permute.xlu1 %1980 }
0x1381   :  { %v1983_v17 = vsel %vm3337_vm9, %v1981_v28, 0.0 }
0x1382   :  { %v1993_v20 = vmul.f32 %v1983_v17, %v1951_v44 }
0x13e2   :  { %v1987_v5 = vpop.permute.xlu1 %1986  ;;  %v1985_v47 = vpop.permute.xlu0 %1984 }
0x13e3   :  { %v1988_v41 = vsel %vm3337_vm9, %v1985_v47, %v1987_v5 }
0x13e4   :  { %v1992_v60 = vmul.f32 %v1988_v41, %v1978_v19 }
0x13e6   :  { %v1994_v58 = vadd.f32 %v1993_v20, %v1992_v60 }
0x13e8   :  { %1995 = vrot.lane.b32.xlu0 %v1994_v58, %s2933_s6 }
0x13f3   :  { %v1958_v10 = vpop.permute.xlu1 %1957  ;;  %v1954_v22 = vpop.permute.xlu0 %1953 }
0x13f4   :  { %v1960_v25 = vsel %vm3337_vm9, %v1954_v22, %v1958_v10 }
0x13f5   :  { %v1989_v12 = vmul.f32 %v1960_v25, %v1951_v44 }
0x13f7   :  { %v1967_v23 = vpop.permute.xlu1 %1966  ;;  %v1963_v37 = vpop.permute.xlu0 %1962 }
0x13f8   :  { %v1969_v24 = vsel %vm3337_vm9, %v1963_v37, %v1967_v23 }
0x13f9   :  { %v1990_v6 = vmul.f32 %v1988_v41, %v1969_v24 }
0x13fb   :  { %v1991_v18 = vadd.f32 %v1990_v6, %v1989_v12 }
0x145a   :  { %v1996_v30 = vpop.permute.xlu0 %1995 }
0x145b   :  { %v1997_v32 = vmul.f32 %v1996_v30, %v3296_v7 }
0x145d   :  { %v1998_v35 = vadd.f32 %v1997_v32, %v1991_v18 }
0x145f   :  { %2001 = vrot.lane.b32.xlu0 %v1998_v35, %s2942_s11  ;;  %1999 = vrot.lane.b32.xlu1 %v1998_v35, %s2941_s10 }
0x1463   :  { %2015 = vperm.xlu1 %2871, %v3092_v34  }
0x1467   :  { %2873 = vset.pattern.permute.xlu1 %v2957_v38 }
0x14d1   :  { %v2002_v39 = vpop.permute.xlu0 %2001  ;;  %v2000_v45 = vpop.permute.xlu1 %1999 }
0x14d2   :  { %v2003_v15 = vsel %vm3375_vm10, %v2000_v45, %v2002_v39 }
0x14d3   :  { %2006 = vrot.lane.b32.xlu1 %v2003_v15, %s2923_s2  ;;  %2004 = vrot.lane.b32.xlu0 %v2003_v15, %s2945_s12  ;;  %v2960_v15 = vmov 43  }
0x14d7   :  { %2010 = vperm.xlu0 %2872, %v3090_v33  }
0x14db   :  { %2874 = vset.pattern.permute.xlu0 %v2957_v38 }
0x14dc   :  { %2046 = vperm.xlu0 %2874, %v3286_v4  }
0x14e2   :  { %v2016_v48 = vpop.permute.xlu1 %2015 }
0x1545   :  { %v2005_v42 = vpop.permute.xlu0 %2004  ;;  %v2007_v40 = vpop.permute.xlu1 %2006 }
0x1546   :  { %v2008_v50 = vsel %vm3413_vm11, %v2005_v42, %v2007_v40 }
0x1547   :  { %v2018_v51 = vmul.f32 %v2016_v48, %v2008_v50 }
0x1549   :  { %2019 = vrot.lane.b32.xlu1 %v2018_v51, %s2933_s6 }
0x154d   :  { %2042 = vperm.xlu1 %2873, %v3260_v59  }
0x1551   :  { %2051 = vperm.xlu1 %2873, %v3292_v2  }
0x1556   :  { %v2011_v52 = vpop.permute.xlu0 %2010 }
0x1557   :  { %v2013_v62 = vmul.f32 %v2011_v52, %v1998_v35 }
0x155b   :  { %v2047_v55 = vpop.permute.xlu0 %2046 }
0x15bb   :  { %v2020_v53 = vpop.permute.xlu1 %2019 }
0x15bc   :  { %v2021_v61 = vmul.f32 %v2020_v53, %v3296_v7 }
0x15be   :  { %v2022_v46 = vsub.f32 %v2013_v62, %v2021_v61 }
0x15c0   :  { %2057 = vrot.lane.b32.xlu0 %v2022_v46, %s2942_s11  ;;  %2055 = vrot.lane.b32.xlu1 %v2022_v46, %s2941_s10 }
0x15c4   :  { %2028 = vperm.xlu0 %2874, %v3090_v33   ;;  %2024 = vperm.xlu1 %2873, %v3305_v14  }
0x15c8   :  { %2037 = vperm.xlu0 %2874, %v3270_v9   ;;  %2033 = vperm.xlu1 %2873, %v3311_v16  }
0x15cc   :  { %v2043_v27 = vpop.permute.xlu1 %2042  ;;  %2875 = vset.pattern.permute.xlu0 %v2958_v54  ;;  %2877 = vset.pattern.permute.xlu1 %v2959_v13 }
0x15cd   :  { %v2049_v3 = vsel %vm3375_vm10, %v2043_v27, %v2047_v55 }
0x15d0   :  { %v2052_v56 = vpop.permute.xlu1 %2051 }
0x15d1   :  { %v2054_v63 = vsel %vm3375_vm10, %v2052_v56, 0.0 }
0x15d2   :  { %v2064_v8 = vmul.f32 %v2054_v63, %v2022_v46 }
0x1632   :  { %v2058_v0 = vpop.permute.xlu0 %2057  ;;  %v2056_v1 = vpop.permute.xlu1 %2055 }
0x1633   :  { %v2059_v36 = vsel %vm3375_vm10, %v2056_v1, %v2058_v0 }
0x1634   :  { %v2063_v44 = vmul.f32 %v2059_v36, %v2049_v3 }
0x1636   :  { %v2065_v11 = vadd.f32 %v2064_v8, %v2063_v44 }
0x1638   :  { %2066 = vrot.lane.b32.xlu1 %v2065_v11, %s2933_s6 }
0x1643   :  { %v2029_v28 = vpop.permute.xlu0 %2028  ;;  %v2025_v31 = vpop.permute.xlu1 %2024 }
0x1644   :  { %v2031_v19 = vsel %vm3375_vm10, %v2025_v31, %v2029_v28 }
0x1645   :  { %v2060_v20 = vmul.f32 %v2031_v19, %v2022_v46 }
0x1647   :  { %v2038_v17 = vpop.permute.xlu0 %2037  ;;  %v2034_v5 = vpop.permute.xlu1 %2033 }
0x1648   :  { %v2040_v47 = vsel %vm3375_vm10, %v2034_v5, %v2038_v17  ;;  %v2961_v5 = vmov 46  }
0x1649   :  { %v2061_v41 = vmul.f32 %v2059_v36, %v2040_v47 }
0x164b   :  { %v2062_v58 = vadd.f32 %v2061_v41, %v2060_v20 }
0x16aa   :  { %v2067_v60 = vpop.permute.xlu1 %2066 }
0x16ab   :  { %v2068_v10 = vmul.f32 %v2067_v60, %v3296_v7 }
0x16ad   :  { %v2069_v22 = vadd.f32 %v2068_v10, %v2062_v58 }
0x16af   :  { %2072 = vrot.lane.b32.xlu1 %v2069_v22, %s2923_s2  ;;  %2070 = vrot.lane.b32.xlu0 %v2069_v22, %s2945_s12 }
0x16b3   :  { %2086 = vperm.xlu0 %2875, %v3092_v34  }
0x16b7   :  { %2081 = vperm.xlu0 %2875, %v3090_v33  }
0x16bb   :  { %2876 = vset.pattern.permute.xlu0 %v2959_v13 }
0x16bc   :  { %2113 = vperm.xlu0 %2876, %v3260_v59  }
0x1721   :  { %v2073_v23 = vpop.permute.xlu1 %2072  ;;  %v2071_v37 = vpop.permute.xlu0 %2070 }
0x1722   :  { %v2074_v24 = vsel %vm3413_vm11, %v2071_v37, %v2073_v23  ;;  %v2962_v23 = vmov 47  }
0x1723   :  { %2075 = vrot.lane.b32.xlu1 %v2074_v24, %s2948_s13 }
0x1727   :  { %2077 = vrot.lane.b32.xlu1 %v2074_v24, %s2922_s29 }
0x1732   :  { %v2087_v12 = vpop.permute.xlu0 %2086 }
0x1736   :  { %v2082_v32 = vpop.permute.xlu0 %2081 }
0x1737   :  { %v2084_v38 = vmul.f32 %v2082_v32, %v2069_v22 }
0x173b   :  { %v2114_v42 = vpop.permute.xlu0 %2113 }
0x1795   :  { %v2076_v25 = vpop.permute.xlu1 %2075 }
0x1799   :  { %v2078_v6 = vpop.permute.xlu1 %2077 }
0x179a   :  { %v2079_v30 = vsel %vm3451_vm13, %v2076_v25, %v2078_v6 }
0x179b   :  { %v2089_v18 = vmul.f32 %v2087_v12, %v2079_v30 }
0x179d   :  { %2090 = vrot.lane.b32.xlu1 %v2089_v18, %s2933_s6 }
0x17a1   :  { %2117 = vperm.xlu1 %2877, %v3286_v4  }
0x17a5   :  { %2122 = vperm.xlu1 %2877, %v3292_v2  }
0x180f   :  { %v2091_v35 = vpop.permute.xlu1 %2090 }
0x1810   :  { %v2092_v39 = vmul.f32 %v2091_v35, %v3296_v7 }
0x1812   :  { %v2093_v45 = vsub.f32 %v2084_v38, %v2092_v39 }
0x1814   :  { %2128 = vrot.lane.b32.xlu1 %v2093_v45, %s2923_s2  ;;  %2126 = vrot.lane.b32.xlu0 %v2093_v45, %s2945_s12 }
0x1818   :  { %2099 = vperm.xlu1 %2877, %v3090_v33   ;;  %2095 = vperm.xlu0 %2876, %v3305_v14  }
0x181c   :  { %2108 = vperm.xlu1 %2877, %v3270_v9   ;;  %2104 = vperm.xlu0 %2876, %v3311_v16  }
0x1820   :  { %2878 = vset.pattern.permute.xlu1 %v2960_v15  ;;  %2879 = vset.pattern.permute.xlu0 %v2960_v15  ;;  %v2118_v48 = vpop.permute.xlu1 %2117 }
0x1821   :  { %2160 = vperm.xlu1 %2878, %v3260_v59   ;;  %v2120_v53 = vsel %vm3413_vm11, %v2114_v42, %v2118_v48 }
0x1824   :  { %v2123_v40 = vpop.permute.xlu1 %2122 }
0x1825   :  { %2169 = vperm.xlu1 %2878, %v3292_v2   ;;  %v2125_v50 = vsel %vm3413_vm11, %v2123_v40, 0.0 }
0x1826   :  { %v2135_v61 = vmul.f32 %v2125_v50, %v2093_v45 }
0x1886   :  { %v2129_v51 = vpop.permute.xlu1 %2128  ;;  %v2127_v52 = vpop.permute.xlu0 %2126 }
0x1887   :  { %v2130_v62 = vsel %vm3413_vm11, %v2127_v52, %v2129_v51 }
0x1888   :  { %v2134_v46 = vmul.f32 %v2130_v62, %v2120_v53 }
0x188a   :  { %v2136_v27 = vadd.f32 %v2135_v61, %v2134_v46 }
0x188c   :  { %2137 = vrot.lane.b32.xlu0 %v2136_v27, %s2933_s6 }
0x1890   :  { %2164 = vperm.xlu0 %2879, %v3286_v4  }
0x1897   :  { %v2100_v55 = vpop.permute.xlu1 %2099  ;;  %v2096_v56 = vpop.permute.xlu0 %2095 }
0x1898   :  { %v2102_v1 = vsel %vm3413_vm11, %v2096_v56, %v2100_v55 }
0x1899   :  { %v2131_v36 = vmul.f32 %v2102_v1, %v2093_v45 }
0x189b   :  { %v2109_v54 = vpop.permute.xlu1 %2108  ;;  %v2105_v63 = vpop.permute.xlu0 %2104 }
0x189c   :  { %v2111_v0 = vsel %vm3413_vm11, %v2105_v63, %v2109_v54 }
0x189d   :  { %v2132_v3 = vmul.f32 %v2130_v62, %v2111_v0  ;;  %v2963_v0 = vmov 50  }
0x189f   :  { %v2133_v44 = vadd.f32 %v2132_v3, %v2131_v36 }
0x18a0   :  { %v2161_v28 = vpop.permute.xlu1 %2160 }
0x18a4   :  { %v2170_v31 = vpop.permute.xlu1 %2169 }
0x18a5   :  { %v2172_v41 = vsel %vm3451_vm13, %v2170_v31, 0.0 }
0x18fe   :  { %v2138_v8 = vpop.permute.xlu0 %2137 }
0x18ff   :  { %v2139_v11 = vmul.f32 %v2138_v8, %v3296_v7 }
0x1901   :  { %v2140_v13 = vadd.f32 %v2139_v11, %v2133_v44 }
0x1903   :  { %2175 = vrot.lane.b32.xlu0 %v2140_v13, %s2922_s29  ;;  %2173 = vrot.lane.b32.xlu1 %v2140_v13, %s2948_s13  ;;  %v2182_v58 = vmul.f32 %v2172_v41, %v2140_v13 }
0x1907   :  { %2146 = vperm.xlu0 %2879, %v3090_v33   ;;  %2142 = vperm.xlu1 %2878, %v3305_v14  }
0x190b   :  { %2155 = vperm.xlu0 %2879, %v3270_v9   ;;  %2151 = vperm.xlu1 %2878, %v3311_v16  }
0x190f   :  { %v2165_v17 = vpop.permute.xlu0 %2164  ;;  %2880 = vset.pattern.permute.xlu0 %v2961_v5  ;;  %2882 = vset.pattern.permute.xlu1 %v2962_v23 }
0x1910   :  { %v2167_v20 = vsel %vm3451_vm13, %v2161_v28, %v2165_v17 }
0x1975   :  { %v2174_v47 = vpop.permute.xlu1 %2173  ;;  %v2176_v19 = vpop.permute.xlu0 %2175 }
0x1976   :  { %v2177_v60 = vsel %vm3451_vm13, %v2174_v47, %v2176_v19 }
0x1977   :  { %v2181_v10 = vmul.f32 %v2177_v60, %v2167_v20 }
0x1979   :  { %v2183_v22 = vadd.f32 %v2182_v58, %v2181_v10 }
0x197b   :  { %2184 = vrot.lane.b32.xlu1 %v2183_v22, %s2933_s6 }
0x1986   :  { %v2143_v37 = vpop.permute.xlu1 %2142  ;;  %v2147_v24 = vpop.permute.xlu0 %2146 }
0x1987   :  { %v2149_v30 = vsel %vm3451_vm13, %v2143_v37, %v2147_v24  ;;  %v2964_v37 = vmov 51  }
0x1988   :  { %v2178_v32 = vmul.f32 %v2149_v30, %v2140_v13 }
0x198a   :  { %v2152_v25 = vpop.permute.xlu1 %2151  ;;  %v2156_v6 = vpop.permute.xlu0 %2155 }
0x198b   :  { %v2158_v12 = vsel %vm3451_vm13, %v2152_v25, %v2156_v6 }
0x198c   :  { %v2179_v18 = vmul.f32 %v2177_v60, %v2158_v12 }
0x198e   :  { %v2180_v38 = vadd.f32 %v2179_v18, %v2178_v32 }
0x19ed   :  { %v2185_v35 = vpop.permute.xlu1 %2184 }
0x19ee   :  { %v2186_v39 = vmul.f32 %v2185_v35, %v3296_v7 }
0x19f0   :  { %v2187_v45 = vadd.f32 %v2186_v39, %v2180_v38 }
0x19f2   :  { %2190 = vrot.lane.b32.xlu1 %v2187_v45, %s2920_s0  ;;  %2188 = vrot.lane.b32.xlu0 %v2187_v45, %s2919_s1 }
0x19f6   :  { %2204 = vperm.xlu0 %2880, %v3092_v34  }
0x19fa   :  { %2199 = vperm.xlu0 %2880, %v3090_v33  }
0x19fe   :  { %2881 = vset.pattern.permute.xlu0 %v2962_v23 }
0x19ff   :  { %2231 = vperm.xlu0 %2881, %v3260_v59  }
0x1a64   :  { %v2191_v15 = vpop.permute.xlu1 %2190  ;;  %v2189_v48 = vpop.permute.xlu0 %2188 }
0x1a65   :  { %v2192_v42 = vsel %vm3052_vm2, %v2189_v48, %v2191_v15 }
0x1a66   :  { %2193 = vrot.lane.b32.xlu1 %v2192_v42, %s2924_s30 }
0x1a6a   :  { %2195 = vrot.lane.b32.xlu1 %v2192_v42, %s2925_s5 }
0x1a75   :  { %v2205_v51 = vpop.permute.xlu0 %2204 }
0x1a79   :  { %v2200_v62 = vpop.permute.xlu0 %2199 }
0x1a7a   :  { %v2202_v46 = vmul.f32 %v2200_v62, %v2187_v45 }
0x1a7e   :  { %v2232_v54 = vpop.permute.xlu0 %2231 }
0x1ad8   :  { %v2194_v40 = vpop.permute.xlu1 %2193 }
0x1adc   :  { %v2196_v50 = vpop.permute.xlu1 %2195 }
0x1add   :  { %v2197_v52 = vsel %vm3272_vm12, %v2194_v40, %v2196_v50  ;;  %v2965_v50 = vmov 54  }
0x1ade   :  { %v2207_v53 = vmul.f32 %v2205_v51, %v2197_v52 }
0x1ae0   :  { %2208 = vrot.lane.b32.xlu1 %v2207_v53, %s2933_s6 }
0x1ae4   :  { %2235 = vperm.xlu1 %2882, %v3286_v4  }
0x1ae8   :  { %2240 = vperm.xlu1 %2882, %v3292_v2  }
0x1b52   :  { %v2209_v61 = vpop.permute.xlu1 %2208 }
0x1b53   :  { %v2210_v27 = vmul.f32 %v2209_v61, %v3296_v7 }
0x1b55   :  { %v2211_v55 = vsub.f32 %v2202_v46, %v2210_v27 }
0x1b57   :  { %2246 = vrot.lane.b32.xlu1 %v2211_v55, %s2920_s0  ;;  %2244 = vrot.lane.b32.xlu0 %v2211_v55, %s2919_s1 }
0x1b5b   :  { %2217 = vperm.xlu1 %2882, %v3090_v33   ;;  %2213 = vperm.xlu0 %2881, %v3305_v14  }
0x1b5f   :  { %2226 = vperm.xlu1 %2882, %v3270_v9   ;;  %2222 = vperm.xlu0 %2881, %v3311_v16  }
0x1b63   :  { %v2236_v56 = vpop.permute.xlu1 %2235  ;;  %2883 = vset.pattern.permute.xlu1 %v2963_v0  ;;  %2884 = vset.pattern.permute.xlu0 %v2963_v0 }
0x1b64   :  { %v2238_v8 = vsel %vm3052_vm2, %v2232_v54, %v2236_v56  ;;  %v2966_v56 = vmov 55  }
0x1b67   :  { %v2241_v63 = vpop.permute.xlu1 %2240 }
0x1b68   :  { %v2243_v1 = vsel %vm3052_vm2, %v2241_v63, 0.0 }
0x1b69   :  { %v2253_v11 = vmul.f32 %v2243_v1, %v2211_v55 }
0x1bc9   :  { %v2247_v3 = vpop.permute.xlu1 %2246  ;;  %v2245_v36 = vpop.permute.xlu0 %2244 }
0x1bca   :  { %v2248_v44 = vsel %vm3052_vm2, %v2245_v36, %v2247_v3 }
0x1bcb   :  { %v2252_v13 = vmul.f32 %v2248_v44, %v2238_v8 }
0x1bcd   :  { %v2254_v28 = vadd.f32 %v2253_v11, %v2252_v13 }
0x1bcf   :  { %2255 = vrot.lane.b32.xlu0 %v2254_v28, %s2933_s6 }
0x1bda   :  { %v2218_v31 = vpop.permute.xlu1 %2217  ;;  %v2214_v17 = vpop.permute.xlu0 %2213 }
0x1bdb   :  { %v2220_v41 = vsel %vm3052_vm2, %v2214_v17, %v2218_v31 }
0x1bdc   :  { %v2249_v60 = vmul.f32 %v2220_v41, %v2211_v55 }
0x1bde   :  { %v2227_v5 = vpop.permute.xlu1 %2226  ;;  %v2223_v47 = vpop.permute.xlu0 %2222 }
0x1bdf   :  { %v2229_v19 = vsel %vm3052_vm2, %v2223_v47, %v2227_v5 }
0x1be0   :  { %v2250_v20 = vmul.f32 %v2248_v44, %v2229_v19 }
0x1be2   :  { %v2251_v10 = vadd.f32 %v2250_v20, %v2249_v60 }
0x1c41   :  { %v2256_v58 = vpop.permute.xlu0 %2255 }
0x1c42   :  { %v2257_v22 = vmul.f32 %v2256_v58, %v3296_v7 }
0x1c44   :  { %v2258_v23 = vadd.f32 %v2257_v22, %v2251_v10 }
0x1c46   :  { %2261 = vrot.lane.b32.xlu0 %v2258_v23, %s2925_s5  ;;  %2259 = vrot.lane.b32.xlu1 %v2258_v23, %s2924_s30 }
0x1c4a   :  { %2275 = vperm.xlu1 %2883, %v3092_v34  }
0x1c4e   :  { %2885 = vset.pattern.permute.xlu1 %v2964_v37 }
0x1cb8   :  { %v2262_v24 = vpop.permute.xlu0 %2261  ;;  %v2260_v25 = vpop.permute.xlu1 %2259 }
0x1cb9   :  { %v2263_v57 = vsel %vm3272_vm12, %v2260_v25, %v2262_v24 }
0x1cba   :  { %2266 = vrot.lane.b32.xlu1 %v2263_v57, %s2937_s3  ;;  %2264 = vrot.lane.b32.xlu0 %v2263_v57, %s2938_s9 }
0x1cbe   :  { %2270 = vperm.xlu0 %2884, %v3090_v33  }
0x1cc2   :  { %2886 = vset.pattern.permute.xlu0 %v2964_v37 }
0x1cc3   :  { %2306 = vperm.xlu0 %2886, %v3286_v4  }
0x1cc9   :  { %v2276_v6 = vpop.permute.xlu1 %2275 }
0x1d2c   :  { %v2265_v12 = vpop.permute.xlu0 %2264  ;;  %v2267_v30 = vpop.permute.xlu1 %2266 }
0x1d2d   :  { %v2268_v18 = vsel %vm3337_vm9, %v2265_v12, %v2267_v30 }
0x1d2e   :  { %v2278_v32 = vmul.f32 %v2276_v6, %v2268_v18  ;;  %v2967_v6 = vmov 58  }
0x1d30   :  { %2279 = vrot.lane.b32.xlu1 %v2278_v32, %s2933_s6 }
0x1d34   :  { %2302 = vperm.xlu1 %2885, %v3260_v59  }
0x1d38   :  { %2311 = vperm.xlu1 %2885, %v3292_v2  }
0x1d3d   :  { %v2271_v35 = vpop.permute.xlu0 %2270 }
0x1d3e   :  { %v2273_v39 = vmul.f32 %v2271_v35, %v2258_v23 }
0x1d42   :  { %v2307_v42 = vpop.permute.xlu0 %2306 }
0x1da2   :  { %v2280_v38 = vpop.permute.xlu1 %2279 }
0x1da3   :  { %v2281_v45 = vmul.f32 %v2280_v38, %v3296_v7 }
0x1da5   :  { %v2282_v15 = vsub.f32 %v2273_v39, %v2281_v45 }
0x1da7   :  { %2317 = vrot.lane.b32.xlu0 %v2282_v15, %s2925_s5  ;;  %2315 = vrot.lane.b32.xlu1 %v2282_v15, %s2924_s30 }
0x1dab   :  { %2288 = vperm.xlu0 %2886, %v3090_v33   ;;  %2284 = vperm.xlu1 %2885, %v3305_v14  }
0x1daf   :  { %2297 = vperm.xlu0 %2886, %v3270_v9   ;;  %2293 = vperm.xlu1 %2885, %v3311_v16  }
0x1db3   :  { %v2303_v48 = vpop.permute.xlu1 %2302  ;;  %2887 = vset.pattern.permute.xlu0 %v2965_v50  ;;  %2889 = vset.pattern.permute.xlu1 %v2966_v56 }
0x1db4   :  { %v2309_v62 = vsel %vm3272_vm12, %v2303_v48, %v2307_v42 }
0x1db7   :  { %v2312_v40 = vpop.permute.xlu1 %2311 }
0x1db8   :  { %v2314_v51 = vsel %vm3272_vm12, %v2312_v40, 0.0 }
0x1db9   :  { %v2324_v46 = vmul.f32 %v2314_v51, %v2282_v15 }
0x1e19   :  { %v2318_v52 = vpop.permute.xlu0 %2317  ;;  %v2316_v53 = vpop.permute.xlu1 %2315 }
0x1e1a   :  { %v2319_v61 = vsel %vm3272_vm12, %v2316_v53, %v2318_v52 }
0x1e1b   :  { %v2323_v27 = vmul.f32 %v2319_v61, %v2309_v62 }
0x1e1d   :  { %v2325_v55 = vadd.f32 %v2324_v46, %v2323_v27 }
0x1e1f   :  { %2326 = vrot.lane.b32.xlu1 %v2325_v55, %s2933_s6  ;;  %v2968_v55 = vmov 59  }
0x1e2a   :  { %v2289_v54 = vpop.permute.xlu0 %2288  ;;  %v2285_v63 = vpop.permute.xlu1 %2284 }
0x1e2b   :  { %v2291_v36 = vsel %vm3272_vm12, %v2285_v63, %v2289_v54 }
0x1e2c   :  { %v2320_v44 = vmul.f32 %v2291_v36, %v2282_v15 }
0x1e2e   :  { %v2298_v0 = vpop.permute.xlu0 %2297  ;;  %v2294_v1 = vpop.permute.xlu1 %2293 }
0x1e2f   :  { %v2300_v3 = vsel %vm3272_vm12, %v2294_v1, %v2298_v0 }
0x1e30   :  { %v2321_v8 = vmul.f32 %v2319_v61, %v2300_v3 }
0x1e32   :  { %v2322_v13 = vadd.f32 %v2321_v8, %v2320_v44 }
0x1e91   :  { %v2327_v11 = vpop.permute.xlu1 %2326 }
0x1e92   :  { %v2328_v28 = vmul.f32 %v2327_v11, %v3296_v7 }
0x1e94   :  { %v2329_v31 = vadd.f32 %v2328_v28, %v2322_v13 }
0x1e96   :  { %2332 = vrot.lane.b32.xlu1 %v2329_v31, %s2937_s3  ;;  %2330 = vrot.lane.b32.xlu0 %v2329_v31, %s2938_s9 }
0x1e9a   :  { %2346 = vperm.xlu0 %2887, %v3092_v34  }
0x1e9e   :  { %2341 = vperm.xlu0 %2887, %v3090_v33  }
0x1ea2   :  { %2888 = vset.pattern.permute.xlu0 %v2966_v56 }
0x1ea3   :  { %2373 = vperm.xlu0 %2888, %v3260_v59  }
0x1f08   :  { %v2333_v26 = vpop.permute.xlu1 %2332  ;;  %v2331_v17 = vpop.permute.xlu0 %2330 }
0x1f09   :  { %v2334_v5 = vsel %vm3337_vm9, %v2331_v17, %v2333_v26 }
0x1f0a   :  { %2335 = vrot.lane.b32.xlu1 %v2334_v5, %s2941_s10 }
0x1f0e   :  { %2337 = vrot.lane.b32.xlu1 %v2334_v5, %s2942_s11  ;;  %v2969_v5 = vmov 62  }
0x1f19   :  { %v2347_v41 = vpop.permute.xlu0 %2346 }
0x1f1d   :  { %v2342_v58 = vpop.permute.xlu0 %2341 }
0x1f1e   :  { %v2344_v22 = vmul.f32 %v2342_v58, %v2329_v31 }
0x1f22   :  { %v2374_v25 = vpop.permute.xlu0 %2373 }
0x1f7c   :  { %v2336_v47 = vpop.permute.xlu1 %2335 }
0x1f80   :  { %v2338_v19 = vpop.permute.xlu1 %2337 }
0x1f81   :  { %v2339_v20 = vsel %vm3375_vm10, %v2336_v47, %v2338_v19 }
0x1f82   :  { %v2349_v60 = vmul.f32 %v2347_v41, %v2339_v20 }
0x1f84   :  { %2350 = vrot.lane.b32.xlu1 %v2349_v60, %s2933_s6 }
0x1f88   :  { %2377 = vperm.xlu1 %2889, %v3286_v4  }
0x1f8c   :  { %2382 = vperm.xlu1 %2889, %v3292_v2  }
0x1ff6   :  { %v2351_v10 = vpop.permute.xlu1 %2350 }
0x1ff7   :  { %v2352_v23 = vmul.f32 %v2351_v10, %v3296_v7 }
0x1ff9   :  { %v2353_v37 = vsub.f32 %v2344_v22, %v2352_v23  ;;  %v2970_v23 = vmov 63  }
0x1ffb   :  { %2388 = vrot.lane.b32.xlu1 %v2353_v37, %s2937_s3  ;;  %2386 = vrot.lane.b32.xlu0 %v2353_v37, %s2938_s9 }
0x1fff   :  { %2359 = vperm.xlu1 %2889, %v3090_v33   ;;  %2355 = vperm.xlu0 %2888, %v3305_v14  }
0x2003   :  { %2368 = vperm.xlu1 %2889, %v3270_v9   ;;  %2364 = vperm.xlu0 %2888, %v3311_v16  }
0x2007   :  { %v2378_v24 = vpop.permute.xlu1 %2377  ;;  %2890 = vset.pattern.permute.xlu1 %v2967_v6  ;;  %2891 = vset.pattern.permute.xlu0 %v2967_v6 }
0x2008   :  { %v2380_v32 = vsel %vm3337_vm9, %v2374_v25, %v2378_v24 }
0x200b   :  { %v2383_v57 = vpop.permute.xlu1 %2382 }
0x200c   :  { %v2385_v12 = vsel %vm3337_vm9, %v2383_v57, 0.0 }
0x200d   :  { %v2395_v38 = vmul.f32 %v2385_v12, %v2353_v37 }
0x206d   :  { %v2389_v30 = vpop.permute.xlu1 %2388  ;;  %v2387_v18 = vpop.permute.xlu0 %2386 }
0x206e   :  { %v2390_v35 = vsel %vm3337_vm9, %v2387_v18, %v2389_v30 }
0x206f   :  { %v2394_v39 = vmul.f32 %v2390_v35, %v2380_v32 }
0x2071   :  { %v2396_v45 = vadd.f32 %v2395_v38, %v2394_v39 }
0x2073   :  { %2397 = vrot.lane.b32.xlu0 %v2396_v45, %s2933_s6 }
0x207e   :  { %v2360_v15 = vpop.permute.xlu1 %2359  ;;  %v2356_v48 = vpop.permute.xlu0 %2355 }
0x207f   :  { %v2362_v51 = vsel %vm3337_vm9, %v2356_v48, %v2360_v15 }
0x2080   :  { %v2391_v53 = vmul.f32 %v2362_v51, %v2353_v37 }
0x2082   :  { %v2369_v42 = vpop.permute.xlu1 %2368  ;;  %v2365_v40 = vpop.permute.xlu0 %2364 }
0x2083   :  { %v2371_v50 = vsel %vm3337_vm9, %v2365_v40, %v2369_v42 }
0x2084   :  { %v2392_v52 = vmul.f32 %v2390_v35, %v2371_v50 }
0x2086   :  { %v2393_v61 = vadd.f32 %v2392_v52, %v2391_v53 }
0x20e5   :  { %v2398_v62 = vpop.permute.xlu0 %2397 }
0x20e6   :  { %v2399_v46 = vmul.f32 %v2398_v62, %v3296_v7 }
0x20e8   :  { %v2400_v27 = vadd.f32 %v2399_v46, %v2393_v61  ;;  %v2971_v46 = vmov 66  }
0x20ea   :  { %2403 = vrot.lane.b32.xlu0 %v2400_v27, %s2942_s11  ;;  %2401 = vrot.lane.b32.xlu1 %v2400_v27, %s2941_s10 }
0x20ee   :  { %2417 = vperm.xlu1 %2890, %v3092_v34  }
0x20f2   :  { %2892 = vset.pattern.permute.xlu1 %v2968_v55 }
0x215c   :  { %v2404_v56 = vpop.permute.xlu0 %2403  ;;  %v2402_v54 = vpop.permute.xlu1 %2401 }
0x215d   :  { %v2405_v49 = vsel %vm3375_vm10, %v2402_v54, %v2404_v56 }
0x215e   :  { %2408 = vrot.lane.b32.xlu1 %v2405_v49, %s2923_s2  ;;  %2406 = vrot.lane.b32.xlu0 %v2405_v49, %s2945_s12 }
0x2162   :  { %2412 = vperm.xlu0 %2891, %v3090_v33  }
0x2166   :  { %2893 = vset.pattern.permute.xlu0 %v2968_v55 }
0x2167   :  { %2448 = vperm.xlu0 %2893, %v3286_v4  }
0x216d   :  { %v2418_v63 = vpop.permute.xlu1 %2417 }
0x21d0   :  { %v2407_v0 = vpop.permute.xlu0 %2406  ;;  %v2409_v1 = vpop.permute.xlu1 %2408 }
0x21d1   :  { %v2410_v3 = vsel %vm3413_vm11, %v2407_v0, %v2409_v1 }
0x21d2   :  { %v2420_v36 = vmul.f32 %v2418_v63, %v2410_v3 }
0x21d4   :  { %2421 = vrot.lane.b32.xlu1 %v2420_v36, %s2933_s6 }
0x21d8   :  { %2444 = vperm.xlu1 %2892, %v3260_v59  }
0x21dc   :  { %2453 = vperm.xlu1 %2892, %v3292_v2  }
0x21e1   :  { %v2413_v8 = vpop.permute.xlu0 %2412 }
0x21e2   :  { %v2415_v11 = vmul.f32 %v2413_v8, %v2400_v27 }
0x21e6   :  { %v2449_v26 = vpop.permute.xlu0 %2448 }
0x2246   :  { %v2422_v44 = vpop.permute.xlu1 %2421 }
0x2247   :  { %v2423_v13 = vmul.f32 %v2422_v44, %v3296_v7 }
0x2249   :  { %v2424_v28 = vsub.f32 %v2415_v11, %v2423_v13 }
0x224b   :  { %2459 = vrot.lane.b32.xlu0 %v2424_v28, %s2942_s11  ;;  %2457 = vrot.lane.b32.xlu1 %v2424_v28, %s2941_s10 }
0x224f   :  { %2430 = vperm.xlu0 %2893, %v3090_v33   ;;  %2426 = vperm.xlu1 %2892, %v3305_v14  }
0x2253   :  { %2439 = vperm.xlu0 %2893, %v3270_v9   ;;  %2435 = vperm.xlu1 %2892, %v3311_v16  }
0x2257   :  { %v2445_v31 = vpop.permute.xlu1 %2444  ;;  %2894 = vset.pattern.permute.xlu0 %v2969_v5  ;;  %2896 = vset.pattern.permute.xlu1 %v2970_v23 }
0x2258   :  { %v2451_v20 = vsel %vm3375_vm10, %v2445_v31, %v2449_v26 }
0x225b   :  { %v2454_v17 = vpop.permute.xlu1 %2453 }
0x225c   :  { %v2456_v47 = vsel %vm3375_vm10, %v2454_v17, 0.0 }
0x225d   :  { %v2466_v58 = vmul.f32 %v2456_v47, %v2424_v28 }
0x22bd   :  { %v2460_v19 = vpop.permute.xlu0 %2459  ;;  %v2458_v41 = vpop.permute.xlu1 %2457 }
0x22be   :  { %v2461_v60 = vsel %vm3375_vm10, %v2458_v41, %v2460_v19 }
0x22bf   :  { %v2465_v10 = vmul.f32 %v2461_v60, %v2451_v20 }
0x22c1   :  { %v2467_v22 = vadd.f32 %v2466_v58, %v2465_v10 }
0x22c3   :  { %2468 = vrot.lane.b32.xlu1 %v2467_v22, %s2933_s6 }
0x22ce   :  { %v2431_v37 = vpop.permute.xlu0 %2430  ;;  %v2427_v24 = vpop.permute.xlu1 %2426 }
0x22cf   :  { %v2433_v12 = vsel %vm3375_vm10, %v2427_v24, %v2431_v37 }
0x22d0   :  { %v2462_v18 = vmul.f32 %v2433_v12, %v2424_v28 }
0x22d2   :  { %v2440_v25 = vpop.permute.xlu0 %2439  ;;  %v2436_v57 = vpop.permute.xlu1 %2435 }
0x22d3   :  { %v2442_v6 = vsel %vm3375_vm10, %v2436_v57, %v2440_v25 }
0x22d4   :  { %v2463_v30 = vmul.f32 %v2461_v60, %v2442_v6 }
0x22d6   :  { %v2464_v35 = vadd.f32 %v2463_v30, %v2462_v18 }
0x2335   :  { %v2469_v32 = vpop.permute.xlu1 %2468 }
0x2336   :  { %v2470_v38 = vmul.f32 %v2469_v32, %v3296_v7 }
0x2338   :  { %v2471_v39 = vadd.f32 %v2470_v38, %v2464_v35 }
0x233a   :  { %2474 = vrot.lane.b32.xlu1 %v2471_v39, %s2923_s2  ;;  %2472 = vrot.lane.b32.xlu0 %v2471_v39, %s2945_s12 }
0x233e   :  { %2488 = vperm.xlu0 %2894, %v3092_v34  }
0x2342   :  { %2483 = vperm.xlu0 %2894, %v3090_v33  }
0x2346   :  { %2895 = vset.pattern.permute.xlu0 %v2970_v23 }
0x2347   :  { %2515 = vperm.xlu0 %2895, %v3260_v59  }
0x23ac   :  { %v2475_v29 = vpop.permute.xlu1 %2474  ;;  %v2473_v45 = vpop.permute.xlu0 %2472 }
0x23ad   :  { %v2476_v15 = vsel %vm3413_vm11, %v2473_v45, %v2475_v29 }
0x23ae   :  { %2477 = vrot.lane.b32.xlu1 %v2476_v15, %s2948_s13 }
0x23b2   :  { %2479 = vrot.lane.b32.xlu1 %v2476_v15, %s2922_s29 }
0x23bd   :  { %v2489_v40 = vpop.permute.xlu0 %2488 }
0x23c1   :  { %v2484_v51 = vpop.permute.xlu0 %2483 }
0x23c2   :  { %v2486_v53 = vmul.f32 %v2484_v51, %v2471_v39 }
0x23c6   :  { %v2516_v55 = vpop.permute.xlu0 %2515 }
0x2420   :  { %v2478_v48 = vpop.permute.xlu1 %2477 }
0x2424   :  { %v2480_v42 = vpop.permute.xlu1 %2479 }
0x2425   :  { %v2481_v34 = vsel %vm3451_vm13, %v2478_v48, %v2480_v42 }
0x2426   :  { %v2491_v50 = vmul.f32 %v2489_v40, %v2481_v34 }
0x2428   :  { %2492 = vrot.lane.b32.xlu1 %v2491_v50, %s2933_s6 }
0x242c   :  { %2519 = vperm.xlu1 %2896, %v3286_v4  }
0x2430   :  { %2524 = vperm.xlu1 %2896, %v3292_v2  }
0x249a   :  { %v2493_v52 = vpop.permute.xlu1 %2492 }
0x249b   :  { %v2494_v62 = vmul.f32 %v2493_v52, %v3296_v7 }
0x249d   :  { %v2495_v61 = vsub.f32 %v2486_v53, %v2494_v62 }
0x249f   :  { %2530 = vrot.lane.b32.xlu1 %v2495_v61, %s2923_s2  ;;  %2528 = vrot.lane.b32.xlu0 %v2495_v61, %s2945_s12 }
0x24a3   :  { %2501 = vperm.xlu1 %2896, %v3090_v33   ;;  %2497 = vperm.xlu0 %2895, %v3305_v14  }
0x24a7   :  { %2510 = vperm.xlu1 %2896, %v3270_v9   ;;  %2506 = vperm.xlu0 %2895, %v3311_v16  }
0x24ab   :  { %2897 = vset.pattern.permute.xlu1 %v2971_v46  ;;  %2898 = vset.pattern.permute.xlu0 %v2971_v46  ;;  %v2520_v27 = vpop.permute.xlu1 %2519 }
0x24ac   :  { %2562 = vperm.xlu1 %2897, %v3260_v59   ;;  %v2522_v0 = vsel %vm3413_vm11, %v2516_v55, %v2520_v27 }
0x24af   :  { %v2525_v56 = vpop.permute.xlu1 %2524 }
0x24b0   :  { %2571 = vperm.xlu1 %2897, %v3292_v2   ;;  %v2527_v54 = vsel %vm3413_vm11, %v2525_v56, 0.0 }
0x24b1   :  { %v2537_v3 = vmul.f32 %v2527_v54, %v2495_v61 }
0x2511   :  { %v2531_v49 = vpop.permute.xlu1 %2530  ;;  %v2529_v63 = vpop.permute.xlu0 %2528 }
0x2512   :  { %v2532_v1 = vsel %vm3413_vm11, %v2529_v63, %v2531_v49 }
0x2513   :  { %v2536_v36 = vmul.f32 %v2532_v1, %v2522_v0 }
0x2515   :  { %v2538_v8 = vadd.f32 %v2537_v3, %v2536_v36 }
0x2517   :  { %2539 = vrot.lane.b32.xlu0 %v2538_v8, %s2933_s6 }
0x251b   :  { %2566 = vperm.xlu0 %2898, %v3286_v4  }
0x2522   :  { %v2502_v59 = vpop.permute.xlu1 %2501  ;;  %v2498_v2 = vpop.permute.xlu0 %2497 }
0x2523   :  { %v2504_v28 = vsel %vm3413_vm11, %v2498_v2, %v2502_v59 }
0x2524   :  { %v2533_v26 = vmul.f32 %v2504_v28, %v2495_v61 }
0x2526   :  { %v2511_v44 = vpop.permute.xlu1 %2510  ;;  %v2507_v11 = vpop.permute.xlu0 %2506 }
0x2527   :  { %v2513_v13 = vsel %vm3413_vm11, %v2507_v11, %v2511_v44 }
0x2528   :  { %v2534_v31 = vmul.f32 %v2532_v1, %v2513_v13 }
0x252a   :  { %v2535_v5 = vadd.f32 %v2534_v31, %v2533_v26 }
0x252b   :  { %v2563_v4 = vpop.permute.xlu1 %2562 }
0x252f   :  { %v2572_v21 = vpop.permute.xlu1 %2571 }
0x2530   :  { %v2574_v58 = vsel %vm3451_vm13, %v2572_v21, 0.0 }
0x2589   :  { %v2540_v17 = vpop.permute.xlu0 %2539 }
0x258a   :  { %v2541_v47 = vmul.f32 %v2540_v17, %v3296_v7 }
0x258c   :  { %v2542_v19 = vadd.f32 %v2541_v47, %v2535_v5 }
0x258e   :  { %2577 = vrot.lane.b32.xlu0 %v2542_v19, %s2922_s29  ;;  %2575 = vrot.lane.b32.xlu1 %v2542_v19, %s2948_s13  ;;  %v2584_v22 = vmul.f32 %v2574_v58, %v2542_v19 }
0x2592   :  { %2548 = vperm.xlu0 %2898, %v3090_v33   ;;  %2544 = vperm.xlu1 %2897, %v3305_v14  }
0x2596   :  { %2557 = vperm.xlu0 %2898, %v3270_v9   ;;  %2553 = vperm.xlu1 %2897, %v3311_v16  }
0x259a   :  { %v2567_v41 = vpop.permute.xlu0 %2566 }
0x259b   :  { %v2569_v10 = vsel %vm3451_vm13, %v2563_v4, %v2567_v41 }
0x2600   :  { %v2576_v20 = vpop.permute.xlu1 %2575  ;;  %v2578_v60 = vpop.permute.xlu0 %2577 }
0x2601   :  { %v2579_v33 = vsel %vm3451_vm13, %v2576_v20, %v2578_v60 }
0x2602   :  { %v2583_v14 = vmul.f32 %v2579_v33, %v2569_v10 }
0x2604   :  { %v2585_v23 = vadd.f32 %v2584_v22, %v2583_v14 }
0x2606   :  { %2586 = vrot.lane.b32.xlu1 %v2585_v23, %s2933_s6 }
0x2611   :  { %v2545_v9 = vpop.permute.xlu1 %2544  ;;  %v2549_v16 = vpop.permute.xlu0 %2548 }
0x2612   :  { %v2551_v57 = vsel %vm3451_vm13, %v2545_v9, %v2549_v16 }
0x2613   :  { %v2580_v12 = vmul.f32 %v2551_v57, %v2542_v19 }
0x2615   :  { %v2554_v37 = vpop.permute.xlu1 %2553  ;;  %v2558_v24 = vpop.permute.xlu0 %2557 }
0x2616   :  { %v2560_v25 = vsel %vm3451_vm13, %v2554_v37, %v2558_v24 }
0x2617   :  { %v2581_v6 = vmul.f32 %v2579_v33, %v2560_v25 }
0x2619   :  { %v2582_v18 = vadd.f32 %v2581_v6, %v2580_v12 }
0x2678   :  { %v2587_v30 = vpop.permute.xlu1 %2586 }
0x2679   :  { %v2588_v32 = vmul.f32 %v2587_v30, %v3296_v7 }
0x267b   :  { %v2589_v35 = vadd.f32 %v2588_v32, %v2582_v18 }
0x267d   :  { %2590 = vst [vmem:[%s3879_s4] sm:$0xff] %v2589_v35 }

</bundles_post_ra>
